<compile_context>
chip_gen: v7x
topology: tpu7x:2x2x1
jax: 0.10.0
libtpu: 0.0.40
codegen_flags: <defaults>
</compile_context>

<pallas_src>
import functools

import jax
import jax.numpy as jnp
from jax.experimental import pallas as pl
from jax.experimental.pallas import tpu as pltpu

EPS = 1e-5
LANE = 128
VMEM_LIMIT_BYTES = 32 * 1024 * 1024  # explicit scoped-VMEM limit (v5e default is 16 MiB)


# ----------------------------- small helpers -------------------------------- #
def _round_up(v, m):
    return ((v + m - 1) // m) * m


def _pick_row_tile(nhw, cap):
    """Largest multiple-of-8 row tile <= cap that divides nhw (falls back to nhw)."""
    for t in (2048, 1024, 512, 256, 128, 64, 32, 16, 8):
        if t <= cap and nhw % t == 0:
            return t
    return nhw


def _pick_band_height(H, W, pp, budget_bytes=6 * 1024 * 1024):
    """Tallest divisor of H whose im2col band slab fits the VMEM budget."""
    for hb in range(H, 0, -1):
        if H % hb:
            continue
        if hb * W * 9 * pp * 6 <= budget_bytes:  # f32 concat + bf16 copy
            return hb
    return 1


def _compiler_params():
    return pltpu.CompilerParams(
        dimension_semantics=("parallel",),
        vmem_limit_bytes=VMEM_LIMIT_BYTES,
    )


def _stats_rows(y):
    """Pack per-channel sum / sum-of-squares of a (rows, C) f32 slab into (8, C)."""
    c = y.shape[1]
    s = jnp.sum(y, axis=0, keepdims=True)
    ss = jnp.sum(y * y, axis=0, keepdims=True)
    return jnp.concatenate([s, ss, jnp.zeros((6, c), jnp.float32)], axis=0)


def _bn_scale_shift(partials, gamma, beta, count):
    """Reduce per-tile partials -> packed (8, C): row0 = scale, row1 = shift."""
    s = jnp.sum(partials[:, 0, :], axis=0)
    ss = jnp.sum(partials[:, 1, :], axis=0)
    mu = s / count
    var = jnp.maximum(ss / count - mu * mu, 0.0)
    scale = gamma * jax.lax.rsqrt(var + EPS)
    shift = beta - mu * scale
    out = jnp.zeros((8, gamma.shape[0]), jnp.float32)
    return out.at[0].set(scale).at[1].set(shift)


# ------------------------------- kernels ------------------------------------ #
def _conv1_kernel(x_ref, w_ref, y_ref, p_ref):
    """conv1 (1x1) as a row-tile matmul + bn1 partial stats."""
    y = jnp.dot(x_ref[...].astype(jnp.bfloat16), w_ref[...],
                preferred_element_type=jnp.float32)
    y_ref[...] = y
    p_ref[...] = _stats_rows(y)[None]


def _bn_relu_conv1x1_kernel(h_ref, bn_ref, w_ref, y_ref, p_ref):
    """apply previous BN (scale/shift) + relu, conv (1x1), next-BN partial stats."""
    z = jnp.maximum(h_ref[...] * bn_ref[0:1, :] + bn_ref[1:2, :], 0.0)
    y = jnp.dot(z.astype(jnp.bfloat16), w_ref[...],
                preferred_element_type=jnp.float32)
    y_ref[...] = y
    p_ref[...] = _stats_rows(y)[None]


def _bn_residual_relu_kernel(h_ref, bn_ref, x_ref, y_ref):
    """bn3 + residual add + relu (residual tile re-read, not held resident)."""
    y_ref[...] = jnp.maximum(
        h_ref[...] * bn_ref[0:1, :] + bn_ref[1:2, :] + x_ref[...], 0.0)


def _make_bn_conv3x3_kernel(H, W, pp, d, hb):
    """bn1+relu, dilated 3x3 conv as one fused 9-tap matmul, bn2 partial stats."""
    Hp, Wp = H + 2 * d, W + 2 * d
    n_bands = H // hb
    band_rows = hb * W

    def kernel(h_ref, bn_ref, w_ref, y_ref, p_ref, pad_ref):
        # bn1 + relu on this image's (H*W, Pp) slab
        z = jnp.maximum(h_ref[...] * bn_ref[0:1, :] + bn_ref[1:2, :], 0.0)

        # zero only the 2*d-wide halo of the padded scratch, then write the interior
        zrow = jnp.zeros((d, Wp, pp), jnp.float32)
        pad_ref[0:d, :, :] = zrow
        pad_ref[Hp - d:Hp, :, :] = zrow
        zcol = jnp.zeros((Hp, d, pp), jnp.float32)
        pad_ref[:, 0:d, :] = zcol
        pad_ref[:, Wp - d:Wp, :] = zcol
        pad_ref[d:d + H, d:d + W, :] = z.reshape(H, W, pp)

        s_tot = jnp.zeros((1, pp), jnp.float32)
        ss_tot = jnp.zeros((1, pp), jnp.float32)
        for b in range(n_bands):                      # static unroll over H-bands
            h0 = b * hb
            cols = []
            for ki in range(3):
                for kj in range(3):
                    win = pad_ref[h0 + ki * d:h0 + ki * d + hb,
                                  kj * d:kj * d + W, :]      # (hb, W, pp)
                    cols.append(win.reshape(band_rows, pp))
            # single MXU matmul with K = 9*Pp (instead of 9 tiny matmuls)
            im2col = jnp.concatenate(cols, axis=1).astype(jnp.bfloat16)
            yb = jnp.dot(im2col, w_ref[...], preferred_element_type=jnp.float32)
            y_ref[h0 * W:h0 * W + band_rows, :] = yb
            s_tot = s_tot + jnp.sum(yb, axis=0, keepdims=True)
            ss_tot = ss_tot + jnp.sum(yb * yb, axis=0, keepdims=True)

        p_ref[...] = jnp.concatenate(
            [s_tot, ss_tot, jnp.zeros((6, pp), jnp.float32)], axis=0)[None]

    return kernel


# ------------------------------- wrapper ------------------------------------ #
def bottleneck_forward(x_nchw, params, *, planes, dilation=1,
                       max_rows_per_tile=1024, conv2_band_height=None):
    """Bottleneck forward. x_nchw: (N, Cin, H, W) f32 -> (N, 4*planes, H, W) f32.

    max_rows_per_tile: row-tile cap for the 1x1-conv passes (halve for v7x's
    smaller VMEM if pushing very large channel counts).
    """
    N, Cin, H, W = x_nchw.shape
    P = planes
    Cout = 4 * P
    assert Cin == Cout, "downsample=None requires inplanes == planes * expansion"
    # TODO(synk): stride != 1 requires the downsample branch; not modeled here.
    d = int(dilation)
    NHW, HW = N * H * W, H * W
    assert HW % 8 == 0, "H*W must be a multiple of 8 for the per-image conv2 tiles"

    Cp = max(LANE, _round_up(Cin, LANE))   # lane-padded in/out channels (== 4*planes)
    Pp = max(LANE, _round_up(P, LANE))     # lane-padded mid channels

    f32 = jnp.float32
    # NCHW -> NHWC -> (NHW, Cp) lane-dense slab
    x = jnp.transpose(x_nchw, (0, 2, 3, 1)).astype(f32).reshape(NHW, Cin)
    x = jnp.pad(x, ((0, 0), (0, Cp - Cin)))

    # Weights -> matmul layouts, zero-padded to lane-dense shapes, bf16 MXU operands.
    w1 = params["conv1"].reshape(P, Cin).T                         # (Cin, P)
    w1 = jnp.pad(w1, ((0, Cp - Cin), (0, Pp - P))).astype(jnp.bfloat16)
    w2 = jnp.transpose(params["conv2"], (2, 3, 1, 0))              # (3, 3, Pin, Pout)
    w2 = jnp.pad(w2, ((0, 0), (0, 0), (0, Pp - P), (0, Pp - P)))
    w2 = w2.reshape(9 * Pp, Pp).astype(jnp.bfloat16)               # tap-major rows
    w3 = params["conv3"].reshape(Cout, P).T                        # (P, 4P)
    w3 = jnp.pad(w3, ((0, Pp - P), (0, Cp - Cout))).astype(jnp.bfloat16)

    g1 = jnp.pad(params["bn1_g"].astype(f32), (0, Pp - P))
    b1 = jnp.pad(params["bn1_b"].astype(f32), (0, Pp - P))
    g2 = jnp.pad(params["bn2_g"].astype(f32), (0, Pp - P))
    b2 = jnp.pad(params["bn2_b"].astype(f32), (0, Pp - P))
    g3 = jnp.pad(params["bn3_g"].astype(f32), (0, Cp - Cout))
    b3 = jnp.pad(params["bn3_b"].astype(f32), (0, Cp - Cout))

    TR = _pick_row_tile(NHW, max_rows_per_tile)
    nt = NHW // TR
    hb = _pick_band_height(H, W, Pp) if conv2_band_height is None else int(conv2_band_height)
    assert H % hb == 0, "conv2_band_height must divide H"
    cparams = _compiler_params()

    # ---- pass 1: conv1 (1x1) + bn1 partial stats --------------------------------
    h1, p1 = pl.pallas_call(
        _conv1_kernel,
        out_shape=(jax.ShapeDtypeStruct((NHW, Pp), f32),
                   jax.ShapeDtypeStruct((nt, 8, Pp), f32)),
        grid=(nt,),
        in_specs=[pl.BlockSpec((TR, Cp), lambda i: (i, 0)),
                  pl.BlockSpec((Cp, Pp), lambda i: (0, 0))],        # weight resident
        out_specs=(pl.BlockSpec((TR, Pp), lambda i: (i, 0)),
                   pl.BlockSpec((1, 8, Pp), lambda i: (i, 0, 0))),
        compiler_params=cparams,
        cost_estimate=pl.CostEstimate(flops=2 * NHW * Cp * Pp, transcendentals=0,
                                      bytes_accessed=4 * NHW * (Cp + Pp)),
    )(x, w1)
    bn1 = _bn_scale_shift(p1, g1, b1, NHW)

    # ---- pass 2: bn1+relu, dilated 3x3 conv2 (fused 9-tap) + bn2 partial stats --
    h2, p2 = pl.pallas_call(
        _make_bn_conv3x3_kernel(H, W, Pp, d, hb),
        out_shape=(jax.ShapeDtypeStruct((NHW, Pp), f32),
                   jax.ShapeDtypeStruct((N, 8, Pp), f32)),
        grid=(N,),
        in_specs=[pl.BlockSpec((HW, Pp), lambda n: (n, 0)),
                  pl.BlockSpec((8, Pp), lambda n: (0, 0)),
                  pl.BlockSpec((9 * Pp, Pp), lambda n: (0, 0))],
        out_specs=(pl.BlockSpec((HW, Pp), lambda n: (n, 0)),
                   pl.BlockSpec((1, 8, Pp), lambda n: (n, 0, 0))),
        scratch_shapes=[pltpu.VMEM((H + 2 * d, W + 2 * d, Pp), f32)],
        compiler_params=cparams,
        cost_estimate=pl.CostEstimate(flops=2 * NHW * 9 * Pp * Pp, transcendentals=0,
                                      bytes_accessed=8 * NHW * Pp),
    )(h1, bn1, w2)
    bn2 = _bn_scale_shift(p2, g2, b2, NHW)

    # ---- pass 3: bn2+relu, conv3 (1x1) + bn3 partial stats ----------------------
    h3, p3 = pl.pallas_call(
        _bn_relu_conv1x1_kernel,
        out_shape=(jax.ShapeDtypeStruct((NHW, Cp), f32),
                   jax.ShapeDtypeStruct((nt, 8, Cp), f32)),
        grid=(nt,),
        in_specs=[pl.BlockSpec((TR, Pp), lambda i: (i, 0)),
                  pl.BlockSpec((8, Pp), lambda i: (0, 0)),
                  pl.BlockSpec((Pp, Cp), lambda i: (0, 0))],
        out_specs=(pl.BlockSpec((TR, Cp), lambda i: (i, 0)),
                   pl.BlockSpec((1, 8, Cp), lambda i: (i, 0, 0))),
        compiler_params=cparams,
        cost_estimate=pl.CostEstimate(flops=2 * NHW * Pp * Cp, transcendentals=0,
                                      bytes_accessed=4 * NHW * (Pp + Cp)),
    )(h2, bn2, w3)
    bn3 = _bn_scale_shift(p3, g3, b3, NHW)

    # ---- pass 4: bn3 + residual add + relu --------------------------------------
    y = pl.pallas_call(
        _bn_residual_relu_kernel,
        out_shape=jax.ShapeDtypeStruct((NHW, Cp), f32),
        grid=(nt,),
        in_specs=[pl.BlockSpec((TR, Cp), lambda i: (i, 0)),
                  pl.BlockSpec((8, Cp), lambda i: (0, 0)),
                  pl.BlockSpec((TR, Cp), lambda i: (i, 0))],        # residual tile
        out_specs=pl.BlockSpec((TR, Cp), lambda i: (i, 0)),
        compiler_params=cparams,
        cost_estimate=pl.CostEstimate(flops=3 * NHW * Cp, transcendentals=0,
                                      bytes_accessed=12 * NHW * Cp),
    )(h3, bn3, x)

    y = y.reshape(N, H, W, Cp)[..., :Cout]
    return jnp.transpose(y, (0, 3, 1, 2))


# ---------------------------- pure-JAX reference ----------------------------- #
def _bn_train_ref(h, g, b):
    mu = jnp.mean(h, axis=(0, 1, 2), keepdims=True)
    var = jnp.mean((h - mu) ** 2, axis=(0, 1, 2), keepdims=True)
    return (h - mu) * (g * jax.lax.rsqrt(var + EPS)) + b


def bottleneck_reference(x_nchw, params, *, planes, dilation=1,
                         matmul_dtype=jnp.float32):
    """Pure-JAX reference. matmul_dtype=jnp.bfloat16 mirrors the kernel's MXU
    operand precision (f32 accumulation and f32 BN either way)."""
    N, Cin, H, W = x_nchw.shape
    P, Cout = planes, 4 * planes
    md = matmul_dtype
    x = jnp.transpose(x_nchw, (0, 2, 3, 1)).astype(jnp.float32)

    w1 = params["conv1"].reshape(P, Cin).T
    h = jnp.einsum("nhwc,cp->nhwp", x.astype(md), w1.astype(md),
                   preferred_element_type=jnp.float32)
    h = jax.nn.relu(_bn_train_ref(h, params["bn1_g"], params["bn1_b"]))

    w2 = jnp.transpose(params["conv2"], (2, 3, 1, 0))   # HWIO
    h = jax.lax.conv_general_dilated(
        h.astype(md), w2.astype(md), window_strides=(1, 1),
        padding=[(dilation, dilation), (dilation, dilation)],
        rhs_dilation=(dilation, dilation),
        dimension_numbers=("NHWC", "HWIO", "NHWC"),
        preferred_element_type=jnp.float32)
    h = jax.nn.relu(_bn_train_ref(h, params["bn2_g"], params["bn2_b"]))

    w3 = params["conv3"].reshape(Cout, P).T
    h = jnp.einsum("nhwp,pq->nhwq", h.astype(md), w3.astype(md),
                   preferred_element_type=jnp.float32)
    h = _bn_train_ref(h, params["bn3_g"], params["bn3_b"])
    out = jax.nn.relu(h + x)
    return jnp.transpose(out, (0, 3, 1, 2))


# --------------------------------- main -------------------------------------- #
if __name__ == "__main__":
    # Small shapes consistent with the module: downsample=None requires
    # inplanes == planes * expansion (4) and stride == 1.
    N, H, W = 2, 16, 16
    planes = 4
    inplanes = planes * 4          # 16

    key = jax.random.PRNGKey(0)
    k = jax.random.split(key, 10)

    def _kaiming(rng, shape, fan_in):
        return jax.random.normal(rng, shape, jnp.float32) * jnp.sqrt(2.0 / fan_in)

    params = {
        # PyTorch conv weight layouts: (out_ch, in_ch, kH, kW)
        "conv1": _kaiming(k[0], (planes, inplanes, 1, 1), inplanes),
        "conv2": _kaiming(k[1], (planes, planes, 3, 3), planes * 9),
        "conv3": _kaiming(k[2], (planes * 4, planes, 1, 1), planes),
        "bn1_g": 1.0 + 0.1 * jax.random.normal(k[3], (planes,), jnp.float32),
        "bn1_b": 0.1 * jax.random.normal(k[4], (planes,), jnp.float32),
        "bn2_g": 1.0 + 0.1 * jax.random.normal(k[5], (planes,), jnp.float32),
        "bn2_b": 0.1 * jax.random.normal(k[6], (planes,), jnp.float32),
        "bn3_g": 1.0 + 0.1 * jax.random.normal(k[7], (planes * 4,), jnp.float32),
        "bn3_b": 0.1 * jax.random.normal(k[8], (planes * 4,), jnp.float32),
    }
    x = jax.random.normal(k[9], (N, inplanes, H, W), jnp.float32)

    # Two configs: dilation=1 (single conv2 H-band) and dilation=2 with an explicit
    # band height of 8 to also exercise the multi-band conv2 path.  A small
    # max_rows_per_tile forces a real multi-step grid at these toy sizes.
    for dil, band in ((1, None), (2, 8)):
        fwd = jax.jit(functools.partial(
            bottleneck_forward, planes=planes, dilation=dil,
            max_rows_per_tile=128, conv2_band_height=band))
        out = jax.block_until_ready(fwd(x, params))
        assert out.shape == (N, planes * 4, H, W), out.shape

        # Reference with the same MXU operand precision (bf16 operands, f32 accum);
        # vs a strict-f32 forward the deviation is at the ~1e-2 bf16-operand level.
        ref = bottleneck_reference(x, params, planes=planes, dilation=dil,
                                   matmul_dtype=jnp.bfloat16)
        err = float(jnp.max(jnp.abs(out - ref)))
        assert jnp.allclose(out, ref, atol=5e-3, rtol=5e-3), (dil, err)

    print("KERNEL_OK")
</pallas_src>

<mosaic_0001>
module attributes {stable_mosaic.version = 11 : i64} {
  func.func @_conv1_kernel(%arg0: i32, %arg1: memref<128x128xf32, #tpu.memory_space<vmem>>, %arg2: memref<128x128xbf16, #tpu.memory_space<vmem>>, %arg3: memref<128x128xf32, #tpu.memory_space<vmem>>, %arg4: memref<1x8x128xf32, #tpu.memory_space<vmem>>) attributes {dimension_semantics = [#tpu.dimension_semantics<parallel>], iteration_bounds = array<i64: 4>, scalar_prefetch = 0 : i64, scratch_operands = 0 : i64, tpu.core_type = #tpu.core_type<tc>, window_params = [{transform_indices = @transform_0, window_bounds = array<i64: 128, 128>}, {pipeline_mode = #tpu.pipeline_mode<synchronous>, transform_indices = @transform_1, window_bounds = array<i64: 128, 128>}, {transform_indices = @transform_2, window_bounds = array<i64: 128, 128>}, {transform_indices = @transform_3, window_bounds = array<i64: 1, 8, 128>}]} {
    %c0 = arith.constant 0 : index
    %c0_0 = arith.constant 0 : index
    %0 = vector.load %arg1[%c0, %c0_0] : memref<128x128xf32, #tpu.memory_space<vmem>>, vector<128x128xf32>
    %1 = arith.truncf %0 : vector<128x128xf32> to vector<128x128xbf16>
    %c0_1 = arith.constant 0 : index
    %c0_2 = arith.constant 0 : index
    %2 = vector.load %arg2[%c0_1, %c0_2] : memref<128x128xbf16, #tpu.memory_space<vmem>>, vector<128x128xbf16>
    %cst = arith.constant dense<0.000000e+00> : vector<128x128xf32>
    %3 = tpu.matmul %1, %2, %cst {dimension_numbers = #tpu.dot_dimension_numbers<[1], [0], [0], [1], [0, 0, 1, 1], [], []>} : vector<128x128xbf16>, vector<128x128xbf16>, vector<128x128xf32> -> vector<128x128xf32>
    %c0_3 = arith.constant 0 : index
    %c0_4 = arith.constant 0 : index
    %4 = vector.load %arg3[%c0_3, %c0_4] : memref<128x128xf32, #tpu.memory_space<vmem>>, vector<128x128xf32>
    tpu.vector_store %arg3[%c0_3, %c0_4], %3 {strides = array<i32>} : memref<128x128xf32, #tpu.memory_space<vmem>>, vector<128x128xf32>,
    %cst_5 = arith.constant dense<0.000000e+00> : vector<128xf32>
    %5 = vector.multi_reduction <add>, %3, %cst_5 [0] : vector<128x128xf32> to vector<128xf32>
    %6 = vector.shape_cast %5 : vector<128xf32> to vector<1x128xf32>
    %7 = arith.mulf %3, %3 : vector<128x128xf32>
    %cst_6 = arith.constant dense<0.000000e+00> : vector<128xf32>
    %8 = vector.multi_reduction <add>, %7, %cst_6 [0] : vector<128x128xf32> to vector<128xf32>
    %9 = vector.shape_cast %8 : vector<128xf32> to vector<1x128xf32>
    %cst_7 = arith.constant 0.000000e+00 : f32
    %10 = vector.broadcast %cst_7 : f32 to vector<6x128xf32>
    %11 = tpu.concatenate %6, %9, %10 in 0 : vector<1x128xf32>, vector<1x128xf32>, vector<6x128xf32> -> vector<8x128xf32>
    %12 = vector.shape_cast %11 : vector<8x128xf32> to vector<1x8x128xf32>
    %c0_8 = arith.constant 0 : index
    %c0_9 = arith.constant 0 : index
    %c0_10 = arith.constant 0 : index
    %13 = vector.load %arg4[%c0_8, %c0_9, %c0_10] : memref<1x8x128xf32, #tpu.memory_space<vmem>>, vector<1x8x128xf32>
    tpu.vector_store %arg4[%c0_8, %c0_9, %c0_10], %12 {strides = array<i32>} : memref<1x8x128xf32, #tpu.memory_space<vmem>>, vector<1x8x128xf32>,
    return
  }
  func.func @transform_0(%arg0: i32) -> (i32, i32) {
    %c0_i32 = arith.constant 0 : i32
    %c0_i32_0 = arith.constant 0 : i32
    return %arg0, %c0_i32 : i32, i32
  }
  func.func @transform_1(%arg0: i32) -> (i32, i32) {
    %c0_i32 = arith.constant 0 : i32
    %c0_i32_0 = arith.constant 0 : i32
    %c0_i32_1 = arith.constant 0 : i32
    return %c0_i32, %c0_i32_0 : i32, i32
  }
  func.func @transform_2(%arg0: i32) -> (i32, i32) {
    %c0_i32 = arith.constant 0 : i32
    %c0_i32_0 = arith.constant 0 : i32
    return %arg0, %c0_i32 : i32, i32
  }
  func.func @transform_3(%arg0: i32) -> (i32, i32, i32) {
    %c0_i32 = arith.constant 0 : i32
    %c0_i32_0 = arith.constant 0 : i32
    %c0_i32_1 = arith.constant 0 : i32
    return %arg0, %c0_i32, %c0_i32_0 : i32, i32, i32
  }
}

module attributes {stable_mosaic.version = 11 : i64} {
  func.func @kernel(%arg0: i32, %arg1: memref<256x128xf32, #tpu.memory_space<vmem>>, %arg2: memref<8x128xf32, #tpu.memory_space<vmem>>, %arg3: memref<1152x128xbf16, #tpu.memory_space<vmem>>, %arg4: memref<256x128xf32, #tpu.memory_space<vmem>>, %arg5: memref<1x8x128xf32, #tpu.memory_space<vmem>>, %arg6: memref<18x18x128xf32, #tpu.memory_space<vmem>>) attributes {dimension_semantics = [#tpu.dimension_semantics<parallel>], iteration_bounds = array<i64: 2>, scalar_prefetch = 0 : i64, scratch_operands = 1 : i64, tpu.core_type = #tpu.core_type<tc>, window_params = [{transform_indices = @transform_0, window_bounds = array<i64: 256, 128>}, {pipeline_mode = #tpu.pipeline_mode<synchronous>, transform_indices = @transform_1, window_bounds = array<i64: 8, 128>}, {pipeline_mode = #tpu.pipeline_mode<synchronous>, transform_indices = @transform_2, window_bounds = array<i64: 1152, 128>}, {transform_indices = @transform_3, window_bounds = array<i64: 256, 128>}, {transform_indices = @transform_4, window_bounds = array<i64: 1, 8, 128>}]} {
    %c0 = arith.constant 0 : index
    %c0_0 = arith.constant 0 : index
    %0 = vector.load %arg1[%c0, %c0_0] : memref<256x128xf32, #tpu.memory_space<vmem>>, vector<256x128xf32>
    %c0_1 = arith.constant 0 : index
    %c0_2 = arith.constant 0 : index
    %1 = vector.load %arg2[%c0_1, %c0_2] : memref<8x128xf32, #tpu.memory_space<vmem>>, vector<1x128xf32>
    %2 = vector.broadcast %1 : vector<1x128xf32> to vector<256x128xf32>
    %3 = arith.mulf %0, %2 : vector<256x128xf32>
    %c1 = arith.constant 1 : index
    %c0_3 = arith.constant 0 : index
    %4 = vector.load %arg2[%c1, %c0_3] : memref<8x128xf32, #tpu.memory_space<vmem>>, vector<1x128xf32>
    %5 = vector.broadcast %4 : vector<1x128xf32> to vector<256x128xf32>
    %6 = arith.addf %3, %5 : vector<256x128xf32>
    %cst = arith.constant 0.000000e+00 : f32
    %7 = vector.broadcast %cst : f32 to vector<256x128xf32>
    %8 = arith.maximumf %6, %7 : vector<256x128xf32>
    %cst_4 = arith.constant 0.000000e+00 : f32
    %9 = vector.broadcast %cst_4 : f32 to vector<1x18x128xf32>
    %c0_5 = arith.constant 0 : index
    %c0_6 = arith.constant 0 : index
    %c0_7 = arith.constant 0 : index
    %10 = vector.load %arg6[%c0_5, %c0_6, %c0_7] : memref<18x18x128xf32, #tpu.memory_space<vmem>>, vector<1x18x128xf32>
    tpu.vector_store %arg6[%c0_5, %c0_6, %c0_7], %9 {strides = array<i32>} : memref<18x18x128xf32, #tpu.memory_space<vmem>>, vector<1x18x128xf32>,
    %c17 = arith.constant 17 : index
    %c0_8 = arith.constant 0 : index
    %c0_9 = arith.constant 0 : index
    %11 = vector.load %arg6[%c17, %c0_8, %c0_9] : memref<18x18x128xf32, #tpu.memory_space<vmem>>, vector<1x18x128xf32>
    tpu.vector_store %arg6[%c17, %c0_8, %c0_9], %9 {strides = array<i32>} : memref<18x18x128xf32, #tpu.memory_space<vmem>>, vector<1x18x128xf32>,
    %cst_10 = arith.constant 0.000000e+00 : f32
    %12 = vector.broadcast %cst_10 : f32 to vector<18x1x128xf32>
    %c0_11 = arith.constant 0 : index
    %c0_12 = arith.constant 0 : index
    %c0_13 = arith.constant 0 : index
    %13 = vector.load %arg6[%c0_11, %c0_12, %c0_13] : memref<18x18x128xf32, #tpu.memory_space<vmem>>, vector<18x1x128xf32>
    tpu.vector_store %arg6[%c0_11, %c0_12, %c0_13], %12 {strides = array<i32>} : memref<18x18x128xf32, #tpu.memory_space<vmem>>, vector<18x1x128xf32>,
    %c0_14 = arith.constant 0 : index
    %c17_15 = arith.constant 17 : index
    %c0_16 = arith.constant 0 : index
    %14 = vector.load %arg6[%c0_14, %c17_15, %c0_16] : memref<18x18x128xf32, #tpu.memory_space<vmem>>, vector<18x1x128xf32>
    tpu.vector_store %arg6[%c0_14, %c17_15, %c0_16], %12 {strides = array<i32>} : memref<18x18x128xf32, #tpu.memory_space<vmem>>, vector<18x1x128xf32>,
    %15 = vector.shape_cast %8 : vector<256x128xf32> to vector<16x16x128xf32>
    %c1_17 = arith.constant 1 : index
    %c1_18 = arith.constant 1 : index
    %c0_19 = arith.constant 0 : index
    %16 = vector.load %arg6[%c1_17, %c1_18, %c0_19] : memref<18x18x128xf32, #tpu.memory_space<vmem>>, vector<16x16x128xf32>
    tpu.vector_store %arg6[%c1_17, %c1_18, %c0_19], %15 {strides = array<i32>} : memref<18x18x128xf32, #tpu.memory_space<vmem>>, vector<16x16x128xf32>,
    %cst_20 = arith.constant 0.000000e+00 : f32
    %17 = vector.broadcast %cst_20 : f32 to vector<1x128xf32>
    %cst_21 = arith.constant 0.000000e+00 : f32
    %18 = vector.broadcast %cst_21 : f32 to vector<1x128xf32>
    %c0_22 = arith.constant 0 : index
    %c0_23 = arith.constant 0 : index
    %c0_24 = arith.constant 0 : index
    %19 = vector.load %arg6[%c0_22, %c0_23, %c0_24] : memref<18x18x128xf32, #tpu.memory_space<vmem>>, vector<16x16x128xf32>
    %20 = vector.shape_cast %19 : vector<16x16x128xf32> to vector<256x128xf32>
    %c0_25 = arith.constant 0 : index
    %c1_26 = arith.constant 1 : index
    %c0_27 = arith.constant 0 : index
    %21 = vector.load %arg6[%c0_25, %c1_26, %c0_27] : memref<18x18x128xf32, #tpu.memory_space<vmem>>, vector<16x16x128xf32>
    %22 = vector.shape_cast %21 : vector<16x16x128xf32> to vector<256x128xf32>
    %c0_28 = arith.constant 0 : index
    %c2 = arith.constant 2 : index
    %c0_29 = arith.constant 0 : index
    %23 = vector.load %arg6[%c0_28, %c2, %c0_29] : memref<18x18x128xf32, #tpu.memory_space<vmem>>, vector<16x16x128xf32>
    %24 = vector.shape_cast %23 : vector<16x16x128xf32> to vector<256x128xf32>
    %c1_30 = arith.constant 1 : index
    %c0_31 = arith.constant 0 : index
    %c0_32 = arith.constant 0 : index
    %25 = vector.load %arg6[%c1_30, %c0_31, %c0_32] : memref<18x18x128xf32, #tpu.memory_space<vmem>>, vector<16x16x128xf32>
    %26 = vector.shape_cast %25 : vector<16x16x128xf32> to vector<256x128xf32>
    %c1_33 = arith.constant 1 : index
    %c1_34 = arith.constant 1 : index
    %c0_35 = arith.constant 0 : index
    %27 = vector.load %arg6[%c1_33, %c1_34, %c0_35] : memref<18x18x128xf32, #tpu.memory_space<vmem>>, vector<16x16x128xf32>
    %28 = vector.shape_cast %27 : vector<16x16x128xf32> to vector<256x128xf32>
    %c1_36 = arith.constant 1 : index
    %c2_37 = arith.constant 2 : index
    %c0_38 = arith.constant 0 : index
    %29 = vector.load %arg6[%c1_36, %c2_37, %c0_38] : memref<18x18x128xf32, #tpu.memory_space<vmem>>, vector<16x16x128xf32>
    %30 = vector.shape_cast %29 : vector<16x16x128xf32> to vector<256x128xf32>
    %c2_39 = arith.constant 2 : index
    %c0_40 = arith.constant 0 : index
    %c0_41 = arith.constant 0 : index
    %31 = vector.load %arg6[%c2_39, %c0_40, %c0_41] : memref<18x18x128xf32, #tpu.memory_space<vmem>>, vector<16x16x128xf32>
    %32 = vector.shape_cast %31 : vector<16x16x128xf32> to vector<256x128xf32>
    %c2_42 = arith.constant 2 : index
    %c1_43 = arith.constant 1 : index
    %c0_44 = arith.constant 0 : index
    %33 = vector.load %arg6[%c2_42, %c1_43, %c0_44] : memref<18x18x128xf32, #tpu.memory_space<vmem>>, vector<16x16x128xf32>
    %34 = vector.shape_cast %33 : vector<16x16x128xf32> to vector<256x128xf32>
    %c2_45 = arith.constant 2 : index
    %c2_46 = arith.constant 2 : index
    %c0_47 = arith.constant 0 : index
    %35 = vector.load %arg6[%c2_45, %c2_46, %c0_47] : memref<18x18x128xf32, #tpu.memory_space<vmem>>, vector<16x16x128xf32>
    %36 = vector.shape_cast %35 : vector<16x16x128xf32> to vector<256x128xf32>
    %37 = tpu.concatenate %20, %22, %24, %26, %28, %30, %32, %34, %36 in 1 : vector<256x128xf32>, vector<256x128xf32>, vector<256x128xf32>, vector<256x128xf32>, vector<256x128xf32>, vector<256x128xf32>, vector<256x128xf32>, vector<256x128xf32>, vector<256x128xf32> -> vector<256x1152xf32>
    %38 = arith.truncf %37 : vector<256x1152xf32> to vector<256x1152xbf16>
    %c0_48 = arith.constant 0 : index
    %c0_49 = arith.constant 0 : index
    %39 = vector.load %arg3[%c0_48, %c0_49] : memref<1152x128xbf16, #tpu.memory_space<vmem>>, vector<1152x128xbf16>
    %cst_50 = arith.constant dense<0.000000e+00> : vector<256x128xf32>
    %40 = tpu.matmul %38, %39, %cst_50 {dimension_numbers = #tpu.dot_dimension_numbers<[1], [0], [0], [1], [0, 0, 1, 1], [], []>} : vector<256x1152xbf16>, vector<1152x128xbf16>, vector<256x128xf32> -> vector<256x128xf32>
    %c0_51 = arith.constant 0 : index
    %c0_52 = arith.constant 0 : index
    %41 = vector.load %arg4[%c0_51, %c0_52] : memref<256x128xf32, #tpu.memory_space<vmem>>, vector<256x128xf32>
    tpu.vector_store %arg4[%c0_51, %c0_52], %40 {strides = array<i32>} : memref<256x128xf32, #tpu.memory_space<vmem>>, vector<256x128xf32>,
    %cst_53 = arith.constant dense<0.000000e+00> : vector<128xf32>
    %42 = vector.multi_reduction <add>, %40, %cst_53 [0] : vector<256x128xf32> to vector<128xf32>
    %43 = vector.shape_cast %42 : vector<128xf32> to vector<1x128xf32>
    %44 = arith.addf %17, %43 : vector<1x128xf32>
    %45 = arith.mulf %40, %40 : vector<256x128xf32>
    %cst_54 = arith.constant dense<0.000000e+00> : vector<128xf32>
    %46 = vector.multi_reduction <add>, %45, %cst_54 [0] : vector<256x128xf32> to vector<128xf32>
    %47 = vector.shape_cast %46 : vector<128xf32> to vector<1x128xf32>
    %48 = arith.addf %18, %47 : vector<1x128xf32>
    %cst_55 = arith.constant 0.000000e+00 : f32
    %49 = vector.broadcast %cst_55 : f32 to vector<6x128xf32>
    %50 = tpu.concatenate %44, %48, %49 in 0 : vector<1x128xf32>, vector<1x128xf32>, vector<6x128xf32> -> vector<8x128xf32>
    %51 = vector.shape_cast %50 : vector<8x128xf32> to vector<1x8x128xf32>
    %c0_56 = arith.constant 0 : index
    %c0_57 = arith.constant 0 : index
    %c0_58 = arith.constant 0 : index
    %52 = vector.load %arg5[%c0_56, %c0_57, %c0_58] : memref<1x8x128xf32, #tpu.memory_space<vmem>>, vector<1x8x128xf32>
    tpu.vector_store %arg5[%c0_56, %c0_57, %c0_58], %51 {strides = array<i32>} : memref<1x8x128xf32, #tpu.memory_space<vmem>>, vector<1x8x128xf32>,
    return
  }
  func.func @transform_0(%arg0: i32) -> (i32, i32) {
    %c0_i32 = arith.constant 0 : i32
    %c0_i32_0 = arith.constant 0 : i32
    return %arg0, %c0_i32 : i32, i32
  }
  func.func @transform_1(%arg0: i32) -> (i32, i32) {
    %c0_i32 = arith.constant 0 : i32
    %c0_i32_0 = arith.constant 0 : i32
    %c0_i32_1 = arith.constant 0 : i32
    return %c0_i32, %c0_i32_0 : i32, i32
  }
  func.func @transform_2(%arg0: i32) -> (i32, i32) {
    %c0_i32 = arith.constant 0 : i32
    %c0_i32_0 = arith.constant 0 : i32
    %c0_i32_1 = arith.constant 0 : i32
    return %c0_i32, %c0_i32_0 : i32, i32
  }
  func.func @transform_3(%arg0: i32) -> (i32, i32) {
    %c0_i32 = arith.constant 0 : i32
    %c0_i32_0 = arith.constant 0 : i32
    return %arg0, %c0_i32 : i32, i32
  }
  func.func @transform_4(%arg0: i32) -> (i32, i32, i32) {
    %c0_i32 = arith.constant 0 : i32
    %c0_i32_0 = arith.constant 0 : i32
    %c0_i32_1 = arith.constant 0 : i32
    return %arg0, %c0_i32, %c0_i32_0 : i32, i32, i32
  }
}

module attributes {stable_mosaic.version = 11 : i64} {
  func.func @_bn_residual_relu_kernel(%arg0: i32, %arg1: memref<128x128xf32, #tpu.memory_space<vmem>>, %arg2: memref<8x128xf32, #tpu.memory_space<vmem>>, %arg3: memref<128x128xf32, #tpu.memory_space<vmem>>, %arg4: memref<128x128xf32, #tpu.memory_space<vmem>>) attributes {dimension_semantics = [#tpu.dimension_semantics<parallel>], iteration_bounds = array<i64: 4>, scalar_prefetch = 0 : i64, scratch_operands = 0 : i64, tpu.core_type = #tpu.core_type<tc>, window_params = [{transform_indices = @transform_0, window_bounds = array<i64: 128, 128>}, {pipeline_mode = #tpu.pipeline_mode<synchronous>, transform_indices = @transform_1, window_bounds = array<i64: 8, 128>}, {transform_indices = @transform_2, window_bounds = array<i64: 128, 128>}, {transform_indices = @transform_3, window_bounds = array<i64: 128, 128>}]} {
    %c0 = arith.constant 0 : index
    %c0_0 = arith.constant 0 : index
    %0 = vector.load %arg1[%c0, %c0_0] : memref<128x128xf32, #tpu.memory_space<vmem>>, vector<128x128xf32>
    %c0_1 = arith.constant 0 : index
    %c0_2 = arith.constant 0 : index
    %1 = vector.load %arg2[%c0_1, %c0_2] : memref<8x128xf32, #tpu.memory_space<vmem>>, vector<1x128xf32>
    %2 = vector.broadcast %1 : vector<1x128xf32> to vector<128x128xf32>
    %3 = arith.mulf %0, %2 : vector<128x128xf32>
    %c1 = arith.constant 1 : index
    %c0_3 = arith.constant 0 : index
    %4 = vector.load %arg2[%c1, %c0_3] : memref<8x128xf32, #tpu.memory_space<vmem>>, vector<1x128xf32>
    %5 = vector.broadcast %4 : vector<1x128xf32> to vector<128x128xf32>
    %6 = arith.addf %3, %5 : vector<128x128xf32>
    %c0_4 = arith.constant 0 : index
    %c0_5 = arith.constant 0 : index
    %7 = vector.load %arg3[%c0_4, %c0_5] : memref<128x128xf32, #tpu.memory_space<vmem>>, vector<128x128xf32>
    %8 = arith.addf %6, %7 : vector<128x128xf32>
    %cst = arith.constant 0.000000e+00 : f32
    %9 = vector.broadcast %cst : f32 to vector<128x128xf32>
    %10 = arith.maximumf %8, %9 : vector<128x128xf32>
    %c0_6 = arith.constant 0 : index
    %c0_7 = arith.constant 0 : index
    %11 = vector.load %arg4[%c0_6, %c0_7] : memref<128x128xf32, #tpu.memory_space<vmem>>, vector<128x128xf32>
    tpu.vector_store %arg4[%c0_6, %c0_7], %10 {strides = array<i32>} : memref<128x128xf32, #tpu.memory_space<vmem>>, vector<128x128xf32>,
    return
  }
  func.func @transform_0(%arg0: i32) -> (i32, i32) {
    %c0_i32 = arith.constant 0 : i32
    %c0_i32_0 = arith.constant 0 : i32
    return %arg0, %c0_i32 : i32, i32
  }
  func.func @transform_1(%arg0: i32) -> (i32, i32) {
    %c0_i32 = arith.constant 0 : i32
    %c0_i32_0 = arith.constant 0 : i32
    %c0_i32_1 = arith.constant 0 : i32
    return %c0_i32, %c0_i32_0 : i32, i32
  }
  func.func @transform_2(%arg0: i32) -> (i32, i32) {
    %c0_i32 = arith.constant 0 : i32
    %c0_i32_0 = arith.constant 0 : i32
    return %arg0, %c0_i32 : i32, i32
  }
  func.func @transform_3(%arg0: i32) -> (i32, i32) {
    %c0_i32 = arith.constant 0 : i32
    %c0_i32_0 = arith.constant 0 : i32
    return %arg0, %c0_i32 : i32, i32
  }
}

module attributes {stable_mosaic.version = 11 : i64} {
  func.func @_bn_relu_conv1x1_kernel(%arg0: i32, %arg1: memref<128x128xf32, #tpu.memory_space<vmem>>, %arg2: memref<8x128xf32, #tpu.memory_space<vmem>>, %arg3: memref<128x128xbf16, #tpu.memory_space<vmem>>, %arg4: memref<128x128xf32, #tpu.memory_space<vmem>>, %arg5: memref<1x8x128xf32, #tpu.memory_space<vmem>>) attributes {dimension_semantics = [#tpu.dimension_semantics<parallel>], iteration_bounds = array<i64: 4>, scalar_prefetch = 0 : i64, scratch_operands = 0 : i64, tpu.core_type = #tpu.core_type<tc>, window_params = [{transform_indices = @transform_0, window_bounds = array<i64: 128, 128>}, {pipeline_mode = #tpu.pipeline_mode<synchronous>, transform_indices = @transform_1, window_bounds = array<i64: 8, 128>}, {pipeline_mode = #tpu.pipeline_mode<synchronous>, transform_indices = @transform_2, window_bounds = array<i64: 128, 128>}, {transform_indices = @transform_3, window_bounds = array<i64: 128, 128>}, {transform_indices = @transform_4, window_bounds = array<i64: 1, 8, 128>}]} {
    %c0 = arith.constant 0 : index
    %c0_0 = arith.constant 0 : index
    %0 = vector.load %arg1[%c0, %c0_0] : memref<128x128xf32, #tpu.memory_space<vmem>>, vector<128x128xf32>
    %c0_1 = arith.constant 0 : index
    %c0_2 = arith.constant 0 : index
    %1 = vector.load %arg2[%c0_1, %c0_2] : memref<8x128xf32, #tpu.memory_space<vmem>>, vector<1x128xf32>
    %2 = vector.broadcast %1 : vector<1x128xf32> to vector<128x128xf32>
    %3 = arith.mulf %0, %2 : vector<128x128xf32>
    %c1 = arith.constant 1 : index
    %c0_3 = arith.constant 0 : index
    %4 = vector.load %arg2[%c1, %c0_3] : memref<8x128xf32, #tpu.memory_space<vmem>>, vector<1x128xf32>
    %5 = vector.broadcast %4 : vector<1x128xf32> to vector<128x128xf32>
    %6 = arith.addf %3, %5 : vector<128x128xf32>
    %cst = arith.constant 0.000000e+00 : f32
    %7 = vector.broadcast %cst : f32 to vector<128x128xf32>
    %8 = arith.maximumf %6, %7 : vector<128x128xf32>
    %9 = arith.truncf %8 : vector<128x128xf32> to vector<128x128xbf16>
    %c0_4 = arith.constant 0 : index
    %c0_5 = arith.constant 0 : index
    %10 = vector.load %arg3[%c0_4, %c0_5] : memref<128x128xbf16, #tpu.memory_space<vmem>>, vector<128x128xbf16>
    %cst_6 = arith.constant dense<0.000000e+00> : vector<128x128xf32>
    %11 = tpu.matmul %9, %10, %cst_6 {dimension_numbers = #tpu.dot_dimension_numbers<[1], [0], [0], [1], [0, 0, 1, 1], [], []>} : vector<128x128xbf16>, vector<128x128xbf16>, vector<128x128xf32> -> vector<128x128xf32>
    %c0_7 = arith.constant 0 : index
    %c0_8 = arith.constant 0 : index
    %12 = vector.load %arg4[%c0_7, %c0_8] : memref<128x128xf32, #tpu.memory_space<vmem>>, vector<128x128xf32>
    tpu.vector_store %arg4[%c0_7, %c0_8], %11 {strides = array<i32>} : memref<128x128xf32, #tpu.memory_space<vmem>>, vector<128x128xf32>,
    %cst_9 = arith.constant dense<0.000000e+00> : vector<128xf32>
    %13 = vector.multi_reduction <add>, %11, %cst_9 [0] : vector<128x128xf32> to vector<128xf32>
    %14 = vector.shape_cast %13 : vector<128xf32> to vector<1x128xf32>
    %15 = arith.mulf %11, %11 : vector<128x128xf32>
    %cst_10 = arith.constant dense<0.000000e+00> : vector<128xf32>
    %16 = vector.multi_reduction <add>, %15, %cst_10 [0] : vector<128x128xf32> to vector<128xf32>
    %17 = vector.shape_cast %16 : vector<128xf32> to vector<1x128xf32>
    %cst_11 = arith.constant 0.000000e+00 : f32
    %18 = vector.broadcast %cst_11 : f32 to vector<6x128xf32>
    %19 = tpu.concatenate %14, %17, %18 in 0 : vector<1x128xf32>, vector<1x128xf32>, vector<6x128xf32> -> vector<8x128xf32>
    %20 = vector.shape_cast %19 : vector<8x128xf32> to vector<1x8x128xf32>
    %c0_12 = arith.constant 0 : index
    %c0_13 = arith.constant 0 : index
    %c0_14 = arith.constant 0 : index
    %21 = vector.load %arg5[%c0_12, %c0_13, %c0_14] : memref<1x8x128xf32, #tpu.memory_space<vmem>>, vector<1x8x128xf32>
    tpu.vector_store %arg5[%c0_12, %c0_13, %c0_14], %20 {strides = array<i32>} : memref<1x8x128xf32, #tpu.memory_space<vmem>>, vector<1x8x128xf32>,
    return
  }
  func.func @transform_0(%arg0: i32) -> (i32, i32) {
    %c0_i32 = arith.constant 0 : i32
    %c0_i32_0 = arith.constant 0 : i32
    return %arg0, %c0_i32 : i32, i32
  }
  func.func @transform_1(%arg0: i32) -> (i32, i32) {
    %c0_i32 = arith.constant 0 : i32
    %c0_i32_0 = arith.constant 0 : i32
    %c0_i32_1 = arith.constant 0 : i32
    return %c0_i32, %c0_i32_0 : i32, i32
  }
  func.func @transform_2(%arg0: i32) -> (i32, i32) {
    %c0_i32 = arith.constant 0 : i32
    %c0_i32_0 = arith.constant 0 : i32
    %c0_i32_1 = arith.constant 0 : i32
    return %c0_i32, %c0_i32_0 : i32, i32
  }
  func.func @transform_3(%arg0: i32) -> (i32, i32) {
    %c0_i32 = arith.constant 0 : i32
    %c0_i32_0 = arith.constant 0 : i32
    return %arg0, %c0_i32 : i32, i32
  }
  func.func @transform_4(%arg0: i32) -> (i32, i32, i32) {
    %c0_i32 = arith.constant 0 : i32
    %c0_i32_0 = arith.constant 0 : i32
    %c0_i32_1 = arith.constant 0 : i32
    return %arg0, %c0_i32, %c0_i32_0 : i32, i32, i32
  }
}

</mosaic_0001>

<bundles_post_ra>
// kernel: bottleneck_forward.4
= control target key start
LH: loop header
LB: loop body
LE: loop exit
PB: predicated region body
PF: predicated region fallthrough
CT: control target
= control target key end

     0   :  { %s665_s12 = smov 0   ;;  %s757_s0 = inlined_call_operand.vmem [shape: f32[512,128], index: 0, kind: input, shape index: {}]   ;;  %s758_s1 = inlined_call_operand.vmem [shape: bf16[128,128], index: 1, kind: input, shape index: {}]   ;;  %s759_s2 = inlined_call_operand.vmem [shape: f32[512,128], index: 2, kind: output, shape index: {0}]   ;;  %s760_s3 = inlined_call_operand.vmem [shape: f32[4,8,128], index: 3, kind: output, shape index: {1}]  }
   0x1 LB: > { %s671_s13 = sadd.s32 4294967295, %s643_s12   ;;  %p541_p0 = scmp.ge.s32.totalorder %s643_s12, 1  ;;  %s643_s12 = sphi %s665_s12, %s14_s12  }
   0x2   : > { %p141_p1 = scmp.lt.s32.totalorder %s643_s12, 5 }
   0x4   : > { %p142_p2 = pnand %p541_p0, %p141_p1 }
   0x5   : > { %v629_v0 = vld [vmem:[%s758_s1] sm:$0xff] (!%p142_p2)   ;;  %s542_s16 = sshll.u32 (!%p142_p2), %s671_s13, 4  ;;  %v630_v1 = vld [vmem:[%s758_s1 + $0x8] sm:$0xff] (!%p142_p2)   ;;  %v631_v2 = vld [vmem:[%s758_s1 + $0x10] sm:$0xff] (!%p142_p2)   ;;  %p181_p4 = scmp.lt.s32.totalorder (!%p142_p2), %s671_s13, 3  ;;  %vm445_vm0 = vcmask (!%p142_p2), 1040384  }
   0x6   : > { %145 = sbr.rel (%p142_p2) target bundleno = 300 (0x12c), region = 28  ;;  %p170_p3 = scmp.lt.s32.totalorder (!%p142_p2), %s542_s16, 63  ;;  %573 = vmatprep.subr.bf16.mxu0 (!%p142_p2), %v629_v0  ;;  %605 = vmatprep.subr.bf16.mxu1 (!%p142_p2), %v629_v0  ;;  %v632_v3 = vld [vmem:[%s758_s1 + $0x18] sm:$0xff] (!%p142_p2)   ;;  %v633_v9 = vld [vmem:[%s758_s1 + $0x20] sm:$0xff] (!%p142_p2)   ;;  %v634_v11 = vld [vmem:[%s758_s1 + $0x28] sm:$0xff] (!%p142_p2)   ;;  %vm447_vm1 = vcmask (!%p142_p2), 1041408  }
   0x7   : > { %574 = vmatpush3.bf16.msra.mxu0 (!%p142_p2), %v629_v0  ;;  %613 = vmatpush3.bf16.msra.mxu1 (!%p142_p2), %v629_v0  ;;  %v635_v12 = vld [vmem:[%s758_s1 + $0x30] sm:$0xff] (!%p142_p2)   ;;  %v636_v13 = vld [vmem:[%s758_s1 + $0x38] sm:$0xff] (!%p142_p2)  }
   0x8   : > { %575 = vmatprep.subr.bf16.mxu0 (!%p142_p2), %v630_v1  ;;  %606 = vmatprep.subr.bf16.mxu1 (!%p142_p2), %v630_v1 }
   0xb   : > { %576 = vmatpush3.bf16.msra.mxu0 (!%p142_p2), %v630_v1  ;;  %614 = vmatpush3.bf16.msra.mxu1 (!%p142_p2), %v630_v1 }
   0xc   : > { %577 = vmatprep.subr.bf16.mxu0 (!%p142_p2), %v631_v2  ;;  %607 = vmatprep.subr.bf16.mxu1 (!%p142_p2), %v631_v2 }
   0xd   : > { %s762_s16 = smov (!%p170_p3, %s542_s16), 63  ;;  %s764_s13 = smov (!%p181_p4, %s671_s13), 3 }
   0xe   : > { %s543_s21 = sshll.u32 %s762_s16, 3  ;;  %s546_s11 = sshll.u32 %s764_s13, 3 }
   0xf   : > { %s693_s24 = scalar_lea.vmem %s757_s0, %s543_s21  ;;  %578 = vmatpush3.bf16.msra.mxu0 %v631_v2  ;;  %615 = vmatpush3.bf16.msra.mxu1 %v631_v2  ;;  %s731_s10 = scalar_lea.vmem %s759_s2, %s543_s21 }
  0x10   : > { %v186_v4 = vld [vmem:[%s693_s24] sm:$0xff]  ;;  %v187_v5 = vld [vmem:[%s693_s24 + $0x8] sm:$0xff]  ;;  %579 = vmatprep.subr.bf16.mxu0 %v632_v3  ;;  %608 = vmatprep.subr.bf16.mxu1 %v632_v3  ;;  %v188_v14 = vld [vmem:[%s693_s24 + $0x10] sm:$0xff]  ;;  %s184_s16 = scalar_lea.vmem %s760_s3, %s546_s11 }
  0x11   : > { %v202_v6 = vpack.c.bf16 %v187_v5, %v186_v4  ;;  %v194_v7 = vld [vmem:[%s693_s24 + $0x40] sm:$0xff]  ;;  %v195_v8 = vld [vmem:[%s693_s24 + $0x48] sm:$0xff]  ;;  %v189_v15 = vld [vmem:[%s693_s24 + $0x18] sm:$0xff] }
  0x12   : > { %v206_v10 = vpack.c.bf16 %v195_v8, %v194_v7  ;;  %v190_v16 = vld [vmem:[%s693_s24 + $0x20] sm:$0xff]  ;;  %v196_v17 = vld [vmem:[%s693_s24 + $0x50] sm:$0xff]  ;;  %v197_v18 = vld [vmem:[%s693_s24 + $0x58] sm:$0xff]  ;;  %v203_v22 = vpack.c.bf16 %v189_v15, %v188_v14 }
  0x13   : > { %589 = vmatprep.mubr.bf16.mxu0 %v202_v6  ;;  %580 = vmatpush3.bf16.msra.mxu0 %v632_v3  ;;  %v191_v19 = vld [vmem:[%s693_s24 + $0x28] sm:$0xff]  ;;  %v198_v20 = vld [vmem:[%s693_s24 + $0x60] sm:$0xff]  ;;  %v207_v23 = vpack.c.bf16 %v197_v18, %v196_v17  ;;  %v192_v26 = vld [vmem:[%s693_s24 + $0x30] sm:$0xff] }
  0x14   : > { %597 = vmatprep.mubr.bf16.mxu1 %v206_v10  ;;  %616 = vmatpush3.bf16.msra.mxu1 %v632_v3  ;;  %v199_v21 = vld [vmem:[%s693_s24 + $0x68] sm:$0xff]  ;;  %v204_v24 = vpack.c.bf16 %v191_v19, %v190_v16  ;;  %v193_v27 = vld [vmem:[%s693_s24 + $0x38] sm:$0xff]  ;;  %v200_v28 = vld [vmem:[%s693_s24 + $0x70] sm:$0xff] }
  0x15   : > { %581 = vmatprep.subr.bf16.mxu0 %v633_v9  ;;  %609 = vmatprep.subr.bf16.mxu1 %v633_v9  ;;  %v208_v25 = vpack.c.bf16 %v199_v21, %v198_v20  ;;  %v201_v29 = vld [vmem:[%s693_s24 + $0x78] sm:$0xff]  ;;  %v205_v30 = vpack.c.bf16 %v193_v27, %v192_v26 }
  0x16   : > { %v209_v31 = vpack.c.bf16 %v201_v29, %v200_v28 }
  0x17   : > { %582 = vmatpush3.bf16.msra.mxu0 %v633_v9 }
  0x18   : > { %617 = vmatpush3.bf16.msra.mxu1 %v633_v9  ;;  %583 = vmatprep.subr.bf16.mxu0 %v634_v11 }
  0x19   : > { %610 = vmatprep.subr.bf16.mxu1 %v634_v11 }
  0x1b   : > { %584 = vmatpush3.bf16.msra.mxu0 %v634_v11 }
  0x1c   : > { %618 = vmatpush3.bf16.msra.mxu1 %v634_v11  ;;  %585 = vmatprep.subr.bf16.mxu0 %v635_v12 }
  0x1d   : > { %611 = vmatprep.subr.bf16.mxu1 %v635_v12 }
  0x1f   : > { %586 = vmatpush3.bf16.msra.mxu0 %v635_v12 }
  0x20   : > { %619 = vmatpush3.bf16.msra.mxu1 %v635_v12  ;;  %587 = vmatprep.subr.bf16.mxu0 %v636_v13 }
  0x21   : > { %612 = vmatprep.subr.bf16.mxu1 %v636_v13 }
  0x23   : > { %588 = vmatpush3.bf16.msra.mxu0 %v636_v13 }
  0x24   : > { %620 = vmatpush3.bf16.msra.mxu1 %v636_v13 }
  0x26   : > { %590 = vmatmul.mubr.bf16.vlgmr.msra.gmra.mrb[0].mxu0 %v203_v22 }
  0x27   : > { %598 = vmatmul.mubr.bf16.vlgmr.msra.gmra.mrb[0].mxu1 %v207_v23  ;;  %593 = vmatprep.mubr.bf16.mxu0 %v204_v24 }
  0x28   : > { %601 = vmatprep.mubr.bf16.mxu1 %v208_v25 }
  0x2e   : > { %594 = vmatmul.mubr.bf16.gmra.mrb[4].mxu0 %v205_v30 }
  0x2f   : > { %602 = vmatmul.mubr.bf16.gmra.mrb[4].mxu1 %v209_v31 }
  0xf9   : > { %v591_v32 = vpop.f32.mrb[0].mxu0 }
  0xfa   : > { %v599_v33 = vpop.f32.mrb[0].mxu1  ;;  %373 = vst [vmem:[%s731_s10 + $0x10] sm:$0xff] %v591_v32  ;;  %v308_v34 = vpop.f32.mrb[1].mxu0  ;;  %v410_v43 = vmul.f32 %v591_v32, %v591_v32 }
  0xfb   : > { %381 = vst [vmem:[%s731_s10 + $0x50] sm:$0xff] %v599_v33  ;;  %v340_v35 = vpop.f32.mrb[1].mxu1  ;;  %371 = vst [vmem:[%s731_s10] sm:$0xff] %v308_v34  ;;  %v592_v36 = vpop.f32.mrb[2].mxu0  ;;  %v408_v40 = vmul.f32 %v308_v34, %v308_v34  ;;  %v418_v11 = vmul.f32 %v599_v33, %v599_v33 }
  0xfc   : > { %379 = vst [vmem:[%s731_s10 + $0x40] sm:$0xff] %v340_v35  ;;  %v600_v37 = vpop.f32.mrb[2].mxu1  ;;  %374 = vst [vmem:[%s731_s10 + $0x18] sm:$0xff] %v592_v36  ;;  %v311_v38 = vpop.f32.mrb[3].mxu0  ;;  %v411_v46 = vmul.f32 %v592_v36, %v592_v36  ;;  %v416_v5 = vmul.f32 %v340_v35, %v340_v35 }
  0xfd   : > { %382 = vst [vmem:[%s731_s10 + $0x58] sm:$0xff] %v600_v37  ;;  %v343_v39 = vpop.f32.mrb[3].mxu1  ;;  %372 = vst [vmem:[%s731_s10 + $0x8] sm:$0xff] %v311_v38  ;;  %v387_v41 = vadd.f32 %v311_v38, %v308_v34  ;;  %v409_v42 = vmul.f32 %v311_v38, %v311_v38  ;;  %v419_v14 = vmul.f32 %v600_v37, %v600_v37 }
  0xfe   : > { %380 = vst [vmem:[%s731_s10 + $0x48] sm:$0xff] %v343_v39  ;;  %v417_v10 = vmul.f32 %v343_v39, %v343_v39 }
  0xff   : > { %v388_v44 = vadd.f32 %v591_v32, %v387_v41  ;;  %v424_v45 = vadd.f32 %v409_v42, %v408_v40 }
 0x101   : > { %v425_v47 = vadd.f32 %v424_v45, %v410_v43  ;;  %v595_v48 = vpop.f32.mrb[4].mxu0  ;;  %v389_v49 = vadd.f32 %v592_v36, %v388_v44 }
 0x102   : > { %v603_v50 = vpop.f32.mrb[4].mxu1  ;;  %377 = vst [vmem:[%s731_s10 + $0x30] sm:$0xff] %v595_v48  ;;  %v324_v51 = vpop.f32.mrb[5].mxu0  ;;  %v414_v63 = vmul.f32 %v595_v48, %v595_v48 }
 0x103   : > { %385 = vst [vmem:[%s731_s10 + $0x70] sm:$0xff] %v603_v50  ;;  %v356_v52 = vpop.f32.mrb[5].mxu1  ;;  %375 = vst [vmem:[%s731_s10 + $0x20] sm:$0xff] %v324_v51  ;;  %v390_v53 = vadd.f32 %v389_v49, %v324_v51  ;;  %v412_v54 = vmul.f32 %v324_v51, %v324_v51  ;;  %v426_v55 = vadd.f32 %v425_v47, %v411_v46  ;;  %v596_v56 = vpop.f32.mrb[6].mxu0 }
 0x104   : > { %383 = vst [vmem:[%s731_s10 + $0x60] sm:$0xff] %v356_v52  ;;  %v604_v57 = vpop.f32.mrb[6].mxu1  ;;  %378 = vst [vmem:[%s731_s10 + $0x38] sm:$0xff] %v596_v56  ;;  %v327_v58 = vpop.f32.mrb[7].mxu0  ;;  %v415_v2 = vmul.f32 %v596_v56, %v596_v56  ;;  %v420_v17 = vmul.f32 %v356_v52, %v356_v52  ;;  %v422_v23 = vmul.f32 %v603_v50, %v603_v50 }
 0x105   : > { %386 = vst [vmem:[%s731_s10 + $0x78] sm:$0xff] %v604_v57  ;;  %v359_v59 = vpop.f32.mrb[7].mxu1  ;;  %v427_v60 = vadd.f32 %v426_v55, %v412_v54  ;;  %376 = vst [vmem:[%s731_s10 + $0x28] sm:$0xff] %v327_v58  ;;  %v391_v61 = vadd.f32 %v390_v53, %v327_v58  ;;  %v413_v62 = vmul.f32 %v327_v58, %v327_v58 }
 0x106   : > { %384 = vst [vmem:[%s731_s10 + $0x68] sm:$0xff] %v359_v59  ;;  %v421_v22 = vmul.f32 %v359_v59, %v359_v59  ;;  %v423_v26 = vmul.f32 %v604_v57, %v604_v57 }
 0x107   : > { %v392_v0 = vadd.f32 %v595_v48, %v391_v61  ;;  %v428_v1 = vadd.f32 %v427_v60, %v413_v62 }
 0x109   : > { %v429_v3 = vadd.f32 %v428_v1, %v414_v63  ;;  %v393_v4 = vadd.f32 %v596_v56, %v392_v0 }
 0x10b   : > { %v394_v6 = vadd.f32 %v393_v4, %v340_v35  ;;  %v430_v7 = vadd.f32 %v429_v3, %v415_v2 }
 0x10d   : > { %v431_v8 = vadd.f32 %v430_v7, %v416_v5  ;;  %v395_v9 = vadd.f32 %v394_v6, %v343_v39 }
 0x10f   : > { %v396_v12 = vadd.f32 %v599_v33, %v395_v9  ;;  %v432_v13 = vadd.f32 %v431_v8, %v417_v10 }
 0x111   : > { %v433_v15 = vadd.f32 %v432_v13, %v418_v11  ;;  %v397_v16 = vadd.f32 %v600_v37, %v396_v12 }
 0x113   : > { %v398_v18 = vadd.f32 %v397_v16, %v356_v52  ;;  %v434_v19 = vadd.f32 %v433_v15, %v419_v14 }
 0x115   : > { %v435_v20 = vadd.f32 %v434_v19, %v420_v17  ;;  %v399_v21 = vadd.f32 %v398_v18, %v359_v59 }
 0x117   : > { %v400_v24 = vadd.f32 %v603_v50, %v399_v21  ;;  %v436_v25 = vadd.f32 %v435_v20, %v421_v22 }
 0x119   : > { %v401_v27 = vadd.f32 %v604_v57, %v400_v24  ;;  %v437_v28 = vadd.f32 %v436_v25, %v422_v23 }
 0x11b   : > { %v402_v29 = vrot.slane %v401_v27, 4  ;;  %v438_v30 = vadd.f32 %v437_v28, %v423_v26 }
 0x11d   : > { %v403_v31 = vadd.f32 %v402_v29, %v401_v27  ;;  %v439_v32 = vrot.slane %v438_v30, 4 }
 0x11f   : > { %v404_v33 = vrot.slane %v403_v31, 2  ;;  %v440_v34 = vadd.f32 %v439_v32, %v438_v30 }
 0x121   : > { %v405_v35 = vadd.f32 %v404_v33, %v403_v31  ;;  %v441_v36 = vrot.slane %v440_v34, 2 }
 0x123   : > { %v406_v37 = vrot.slane %v405_v35, 1  ;;  %v442_v38 = vadd.f32 %v441_v36, %v440_v34 }
 0x125   : > { %v443_v39 = vrot.slane %v442_v38, 1  ;;  %v407_v40 = vadd.f32 %v406_v37, %v405_v35 }
 0x127   : > { %v444_v41 = vadd.f32 %v443_v39, %v442_v38 }
 0x129   : > { %v446_v42 = vsel %vm445_vm0, %v407_v40, %v444_v41 }
 0x12a   : > { %v448_v43 = vsel %vm447_vm1, %v446_v42, 0.0 }
 0x12b   : > { %449 = vst [vmem:[%s184_s16] sm:$0xff] %v448_v43 }
 0x12c PF: > { %s14_s12 = sadd.s32 1, %s643_s12  }
 0x12d   : > { %p11_p5 = scmp.ge.s32.totalorder %s14_s12, 6  }
 0x12f   :  { %13 = sbr.rel (!%p11_p5) target bundleno = 1 (0x1), region = 70 }

// kernel: bottleneck_forward.7
= control target key start
LH: loop header
LB: loop body
LE: loop exit
PB: predicated region body
PF: predicated region fallthrough
CT: control target
= control target key end

     0   :  { %s437_s12 = smov 0   ;;  %s558_s0 = inlined_call_operand.vmem [shape: f32[512,128], index: 0, kind: input, shape index: {}]   ;;  %s559_s1 = inlined_call_operand.vmem [shape: f32[8,128], index: 1, kind: input, shape index: {}]   ;;  %s560_s2 = inlined_call_operand.vmem [shape: f32[512,128], index: 2, kind: input, shape index: {}]   ;;  %s561_s3 = inlined_call_operand.vmem [shape: f32[512,128], index: 3, kind: output, shape index: {}]  }
   0x1 LB: > { %s386_s13 = sadd.s32 4294967295, %s415_s12   ;;  %p390_p0 = scmp.ge.s32.totalorder %s415_s12, 1  ;;  %s415_s12 = sphi %s437_s12, %s13_s12  }
   0x2   : > { %p149_p1 = scmp.lt.s32.totalorder %s415_s12, 5 }
   0x4   : > { %p150_p2 = pnand %p390_p0, %p149_p1 }
   0x5   : > { %s391_s14 = sshll.u32 (!%p150_p2), %s386_s13, 4  ;;  %v450_v0 = vld [vmem:[%s559_s1] ss:$0 sm:$0xff] (!%p150_p2)  ;;  %v468_v2 = vld [vmem:[%s559_s1 + $0x1] ss:$0 sm:$0xff] (!%p150_p2) }
   0x6   : > { %153 = sbr.rel (%p150_p2) target bundleno = 39 (0x27), region = 32  ;;  %p179_p3 = scmp.lt.s32.totalorder (!%p150_p2), %s391_s14, 63 }
   0xd   : > { %s563_s14 = smov (!%p179_p3, %s391_s14), 63 }
   0xe   : > { %s445_s15 = sshll.u32 %s563_s14, 3 }
   0xf   : > { %s456_s20 = scalar_lea.vmem %s558_s0, %s445_s15  ;;  %s462_s23 = scalar_lea.vmem %s560_s2, %s445_s15 }
  0x10   : > { %v196_v1 = vld [vmem:[%s456_s20] sm:$0xff]  ;;  %v197_v3 = vld [vmem:[%s456_s20 + $0x8] sm:$0xff]  ;;  %v198_v7 = vld [vmem:[%s456_s20 + $0x10] sm:$0xff]  ;;  %s498_s28 = scalar_lea.vmem %s561_s3, %s445_s15 }
  0x11   : > { %v217_v4 = vmul.f32 %v450_v0, %v196_v1  ;;  %v254_v5 = vld [vmem:[%s462_s23] sm:$0xff]  ;;  %v218_v6 = vmul.f32 %v450_v0, %v197_v3  ;;  %v255_v8 = vld [vmem:[%s462_s23 + $0x8] sm:$0xff]  ;;  %v219_v9 = vmul.f32 %v450_v0, %v198_v7  ;;  %v199_v10 = vld [vmem:[%s456_s20 + $0x18] sm:$0xff] }
  0x12   : > { %v200_v11 = vld [vmem:[%s456_s20 + $0x20] sm:$0xff]  ;;  %v256_v14 = vld [vmem:[%s462_s23 + $0x10] sm:$0xff]  ;;  %v220_v15 = vmul.f32 %v450_v0, %v199_v10  ;;  %v257_v16 = vld [vmem:[%s462_s23 + $0x18] sm:$0xff] }
  0x13   : > { %v238_v12 = vadd.f32 %v468_v2, %v217_v4  ;;  %v239_v13 = vadd.f32 %v468_v2, %v218_v6  ;;  %v221_v17 = vmul.f32 %v450_v0, %v200_v11  ;;  %v201_v18 = vld [vmem:[%s456_s20 + $0x28] sm:$0xff]  ;;  %v240_v19 = vadd.f32 %v468_v2, %v219_v9  ;;  %v258_v20 = vld [vmem:[%s462_s23 + $0x20] sm:$0xff]  ;;  %v202_v22 = vld [vmem:[%s456_s20 + $0x30] sm:$0xff] }
  0x14   : > { %v222_v21 = vmul.f32 %v450_v0, %v201_v18  ;;  %v203_v23 = vld [vmem:[%s456_s20 + $0x38] sm:$0xff]  ;;  %v241_v26 = vadd.f32 %v468_v2, %v220_v15  ;;  %v259_v28 = vld [vmem:[%s462_s23 + $0x28] sm:$0xff]  ;;  %v223_v31 = vmul.f32 %v450_v0, %v202_v22  ;;  %v204_v33 = vld [vmem:[%s456_s20 + $0x40] sm:$0xff] }
  0x15   : > { %v270_v24 = vadd.f32 %v254_v5, %v238_v12  ;;  %v271_v25 = vadd.f32 %v255_v8, %v239_v13  ;;  %v242_v27 = vadd.f32 %v468_v2, %v221_v17  ;;  %v272_v29 = vadd.f32 %v256_v14, %v240_v19  ;;  %v205_v34 = vld [vmem:[%s456_s20 + $0x48] sm:$0xff]  ;;  %v260_v39 = vld [vmem:[%s462_s23 + $0x30] sm:$0xff]  ;;  %v261_v40 = vld [vmem:[%s462_s23 + $0x38] sm:$0xff] }
  0x16   : > { %v243_v30 = vadd.f32 %v468_v2, %v222_v21  ;;  %v224_v32 = vmul.f32 %v450_v0, %v203_v23  ;;  %v273_v37 = vadd.f32 %v257_v16, %v241_v26  ;;  %v206_v41 = vld [vmem:[%s456_s20 + $0x50] sm:$0xff]  ;;  %v244_v44 = vadd.f32 %v468_v2, %v223_v31  ;;  %v207_v46 = vld [vmem:[%s456_s20 + $0x58] sm:$0xff]  ;;  %v208_v47 = vld [vmem:[%s456_s20 + $0x60] sm:$0xff] }
  0x17   : > { %v286_v35 = vmax.f32 %v270_v24, 0.0  ;;  %v287_v36 = vmax.f32 %v271_v25, 0.0  ;;  %v274_v38 = vadd.f32 %v258_v20, %v242_v27  ;;  %v288_v42 = vmax.f32 %v272_v29, 0.0  ;;  %v209_v52 = vld [vmem:[%s456_s20 + $0x68] sm:$0xff]  ;;  %v262_v56 = vld [vmem:[%s462_s23 + $0x40] sm:$0xff]  ;;  %v264_v61 = vld [vmem:[%s462_s23 + $0x50] sm:$0xff] }
  0x18   : > { %v275_v43 = vadd.f32 %v259_v28, %v243_v30  ;;  %v245_v45 = vadd.f32 %v468_v2, %v224_v32  ;;  %v289_v48 = vmax.f32 %v273_v37, 0.0  ;;  %v225_v50 = vmul.f32 %v450_v0, %v204_v33  ;;  %v263_v57 = vld [vmem:[%s462_s23 + $0x48] sm:$0xff]  ;;  %v210_v1 = vld [vmem:[%s456_s20 + $0x70] sm:$0xff]  ;;  %v211_v3 = vld [vmem:[%s456_s20 + $0x78] sm:$0xff] }
  0x19   : > { %302 = vst [vmem:[%s498_s28] sm:$0xff] %v286_v35  ;;  %303 = vst [vmem:[%s498_s28 + $0x8] sm:$0xff] %v287_v36  ;;  %v290_v49 = vmax.f32 %v274_v38, 0.0  ;;  %v226_v51 = vmul.f32 %v450_v0, %v205_v34  ;;  %v276_v54 = vadd.f32 %v260_v39, %v244_v44  ;;  %v227_v58 = vmul.f32 %v450_v0, %v206_v41  ;;  %v265_v7 = vld [vmem:[%s462_s23 + $0x58] sm:$0xff]  ;;  %v266_v8 = vld [vmem:[%s462_s23 + $0x60] sm:$0xff] }
  0x1a   : > { %304 = vst [vmem:[%s498_s28 + $0x10] sm:$0xff] %v288_v42  ;;  %v291_v53 = vmax.f32 %v275_v43, 0.0  ;;  %v277_v55 = vadd.f32 %v261_v40, %v245_v45  ;;  %305 = vst [vmem:[%s498_s28 + $0x18] sm:$0xff] %v289_v48  ;;  %v246_v59 = vadd.f32 %v468_v2, %v225_v50  ;;  %v228_v62 = vmul.f32 %v450_v0, %v207_v46  ;;  %v267_v14 = vld [vmem:[%s462_s23 + $0x68] sm:$0xff]  ;;  %v268_v23 = vld [vmem:[%s462_s23 + $0x70] sm:$0xff] }
  0x1b   : > { %306 = vst [vmem:[%s498_s28 + $0x20] sm:$0xff] %v290_v49  ;;  %v247_v60 = vadd.f32 %v468_v2, %v226_v51  ;;  %v229_v63 = vmul.f32 %v450_v0, %v208_v47  ;;  %v292_v4 = vmax.f32 %v276_v54, 0.0  ;;  %v248_v6 = vadd.f32 %v468_v2, %v227_v58  ;;  %v269_v24 = vld [vmem:[%s462_s23 + $0x78] sm:$0xff] }
  0x1c   : > { %307 = vst [vmem:[%s498_s28 + $0x28] sm:$0xff] %v291_v53  ;;  %v293_v5 = vmax.f32 %v277_v55, 0.0  ;;  %v230_v9 = vmul.f32 %v450_v0, %v209_v52  ;;  %v278_v10 = vadd.f32 %v262_v56, %v246_v59  ;;  %v249_v12 = vadd.f32 %v468_v2, %v228_v62 }
  0x1d   : > { %v279_v11 = vadd.f32 %v263_v57, %v247_v60  ;;  %v250_v13 = vadd.f32 %v468_v2, %v229_v63  ;;  %308 = vst [vmem:[%s498_s28 + $0x30] sm:$0xff] %v292_v4  ;;  %v280_v15 = vadd.f32 %v264_v61, %v248_v6  ;;  %v231_v17 = vmul.f32 %v450_v0, %v210_v1 }
  0x1e   : > { %309 = vst [vmem:[%s498_s28 + $0x38] sm:$0xff] %v293_v5  ;;  %v251_v16 = vadd.f32 %v468_v2, %v230_v9  ;;  %v232_v18 = vmul.f32 %v450_v0, %v211_v3  ;;  %v294_v19 = vmax.f32 %v278_v10, 0.0  ;;  %v281_v21 = vadd.f32 %v265_v7, %v249_v12 }
  0x1f   : > { %v295_v20 = vmax.f32 %v279_v11, 0.0  ;;  %v282_v22 = vadd.f32 %v266_v8, %v250_v13  ;;  %v296_v25 = vmax.f32 %v280_v15, 0.0  ;;  %v252_v27 = vadd.f32 %v468_v2, %v231_v17 }
  0x20   : > { %v283_v26 = vadd.f32 %v267_v14, %v251_v16  ;;  %v253_v28 = vadd.f32 %v468_v2, %v232_v18  ;;  %310 = vst [vmem:[%s498_s28 + $0x40] sm:$0xff] %v294_v19  ;;  %v297_v0 = vmax.f32 %v281_v21, 0.0 }
  0x21   : > { %311 = vst [vmem:[%s498_s28 + $0x48] sm:$0xff] %v295_v20  ;;  %v298_v29 = vmax.f32 %v282_v22, 0.0  ;;  %312 = vst [vmem:[%s498_s28 + $0x50] sm:$0xff] %v296_v25  ;;  %v284_v31 = vadd.f32 %v268_v23, %v252_v27 }
  0x22   : > { %v299_v30 = vmax.f32 %v283_v26, 0.0  ;;  %v285_v32 = vadd.f32 %v269_v24, %v253_v28  ;;  %313 = vst [vmem:[%s498_s28 + $0x58] sm:$0xff] %v297_v0 }
  0x23   : > { %314 = vst [vmem:[%s498_s28 + $0x60] sm:$0xff] %v298_v29  ;;  %v300_v33 = vmax.f32 %v284_v31, 0.0 }
  0x24   : > { %315 = vst [vmem:[%s498_s28 + $0x68] sm:$0xff] %v299_v30  ;;  %v301_v34 = vmax.f32 %v285_v32, 0.0 }
  0x25   : > { %316 = vst [vmem:[%s498_s28 + $0x70] sm:$0xff] %v300_v33 }
  0x26   : > { %317 = vst [vmem:[%s498_s28 + $0x78] sm:$0xff] %v301_v34 }
  0x27 PF: > { %s13_s12 = sadd.s32 1, %s415_s12  }
  0x28   : > { %p10_p4 = scmp.ge.s32.totalorder %s13_s12, 6  }
  0x2a   :  { %12 = sbr.rel (!%p10_p4) target bundleno = 1 (0x1), region = 65 }

// kernel: bottleneck_forward.6
= control target key start
LH: loop header
LB: loop body
LE: loop exit
PB: predicated region body
PF: predicated region fallthrough
CT: control target
= control target key end

     0   :  { %s757_s15 = smov 0   ;;  %s891_s0 = inlined_call_operand.vmem [shape: f32[512,128], index: 0, kind: input, shape index: {}]   ;;  %s892_s1 = inlined_call_operand.vmem [shape: f32[8,128], index: 1, kind: input, shape index: {}]   ;;  %s893_s2 = inlined_call_operand.vmem [shape: bf16[128,128], index: 2, kind: input, shape index: {}]   ;;  %s894_s3 = inlined_call_operand.vmem [shape: f32[512,128], index: 3, kind: output, shape index: {0}]   ;;  %s895_s4 = inlined_call_operand.vmem [shape: f32[4,8,128], index: 4, kind: output, shape index: {1}]  }
   0x1 LB: > { %s763_s16 = sadd.s32 4294967295, %s730_s15   ;;  %p626_p0 = scmp.ge.s32.totalorder %s730_s15, 1  ;;  %s730_s15 = sphi %s757_s15, %s15_s15  }
   0x2   : > { %p166_p1 = scmp.lt.s32.totalorder %s730_s15, 5 }
   0x4   : > { %p167_p2 = pnand %p626_p0, %p166_p1 }
   0x5   : > { %v716_v0 = vld [vmem:[%s893_s2] sm:$0xff] (!%p167_p2)   ;;  %s627_s19 = sshll.u32 (!%p167_p2), %s763_s16, 4  ;;  %v717_v1 = vld [vmem:[%s893_s2 + $0x8] sm:$0xff] (!%p167_p2)   ;;  %v718_v2 = vld [vmem:[%s893_s2 + $0x10] sm:$0xff] (!%p167_p2)   ;;  %p208_p4 = scmp.lt.s32.totalorder (!%p167_p2), %s763_s16, 3  ;;  %vm530_vm0 = vcmask (!%p167_p2), 1040384  }
   0x6   : > { %170 = sbr.rel (%p167_p2) target bundleno = 300 (0x12c), region = 32  ;;  %p197_p3 = scmp.lt.s32.totalorder (!%p167_p2), %s627_s19, 63  ;;  %660 = vmatprep.subr.bf16.mxu0 (!%p167_p2), %v716_v0  ;;  %692 = vmatprep.subr.bf16.mxu1 (!%p167_p2), %v716_v0  ;;  %v719_v3 = vld [vmem:[%s893_s2 + $0x18] sm:$0xff] (!%p167_p2)   ;;  %v795_v6 = vld [vmem:[%s892_s1] ss:$0 sm:$0xff] (!%p167_p2)  ;;  %v721_v17 = vld [vmem:[%s893_s2 + $0x28] sm:$0xff] (!%p167_p2)  }
   0x7   : > { %661 = vmatpush3.bf16.msra.mxu0 (!%p167_p2), %v716_v0  ;;  %700 = vmatpush3.bf16.msra.mxu1 (!%p167_p2), %v716_v0  ;;  %v802_v9 = vld [vmem:[%s892_s1 + $0x1] ss:$0 sm:$0xff] (!%p167_p2)  ;;  %v722_v40 = vld [vmem:[%s893_s2 + $0x30] sm:$0xff] (!%p167_p2)   ;;  %v723_v55 = vld [vmem:[%s893_s2 + $0x38] sm:$0xff] (!%p167_p2)   ;;  %vm532_vm1 = vcmask (!%p167_p2), 1041408  }
   0x8   : > { %662 = vmatprep.subr.bf16.mxu0 (!%p167_p2), %v717_v1  ;;  %693 = vmatprep.subr.bf16.mxu1 (!%p167_p2), %v717_v1  ;;  %v720_v12 = vld [vmem:[%s893_s2 + $0x20] sm:$0xff] (!%p167_p2)  }
   0xb   : > { %663 = vmatpush3.bf16.msra.mxu0 (!%p167_p2), %v717_v1  ;;  %701 = vmatpush3.bf16.msra.mxu1 (!%p167_p2), %v717_v1 }
   0xc   : > { %664 = vmatprep.subr.bf16.mxu0 (!%p167_p2), %v718_v2  ;;  %694 = vmatprep.subr.bf16.mxu1 (!%p167_p2), %v718_v2 }
   0xd   : > { %s897_s19 = smov (!%p197_p3, %s627_s19), 63  ;;  %s899_s16 = smov (!%p208_p4, %s763_s16), 3 }
   0xe   : > { %s628_s24 = sshll.u32 %s897_s19, 3  ;;  %s631_s19 = sshll.u32 %s899_s16, 3 }
   0xf   : > { %s785_s27 = scalar_lea.vmem %s891_s0, %s628_s24  ;;  %665 = vmatpush3.bf16.msra.mxu0 %v718_v2  ;;  %702 = vmatpush3.bf16.msra.mxu1 %v718_v2  ;;  %s865_s21 = scalar_lea.vmem %s894_s3, %s628_s24 }
  0x10   : > { %v213_v4 = vld [vmem:[%s785_s27] sm:$0xff]  ;;  %v214_v5 = vld [vmem:[%s785_s27 + $0x8] sm:$0xff]  ;;  %666 = vmatprep.subr.bf16.mxu0 %v719_v3  ;;  %695 = vmatprep.subr.bf16.mxu1 %v719_v3  ;;  %v215_v18 = vld [vmem:[%s785_s27 + $0x10] sm:$0xff]  ;;  %s211_s24 = scalar_lea.vmem %s895_s4, %s631_s19 }
  0x11   : > { %v234_v7 = vmul.f32 %v795_v6, %v213_v4  ;;  %v235_v8 = vmul.f32 %v795_v6, %v214_v5  ;;  %v221_v13 = vld [vmem:[%s785_s27 + $0x40] sm:$0xff]  ;;  %v222_v16 = vld [vmem:[%s785_s27 + $0x48] sm:$0xff]  ;;  %v216_v19 = vld [vmem:[%s785_s27 + $0x18] sm:$0xff]  ;;  %v236_v29 = vmul.f32 %v795_v6, %v215_v18 }
  0x12   : > { %v217_v21 = vld [vmem:[%s785_s27 + $0x20] sm:$0xff]  ;;  %v242_v22 = vmul.f32 %v795_v6, %v221_v13  ;;  %v223_v23 = vld [vmem:[%s785_s27 + $0x50] sm:$0xff]  ;;  %v224_v24 = vld [vmem:[%s785_s27 + $0x58] sm:$0xff]  ;;  %v243_v26 = vmul.f32 %v795_v6, %v222_v16  ;;  %v237_v30 = vmul.f32 %v795_v6, %v216_v19 }
  0x13   : > { %v255_v10 = vadd.f32 %v802_v9, %v234_v7  ;;  %v256_v11 = vadd.f32 %v802_v9, %v235_v8  ;;  %667 = vmatpush3.bf16.msra.mxu0 %v719_v3  ;;  %703 = vmatpush3.bf16.msra.mxu1 %v719_v3  ;;  %v218_v25 = vld [vmem:[%s785_s27 + $0x28] sm:$0xff]  ;;  %v225_v27 = vld [vmem:[%s785_s27 + $0x60] sm:$0xff]  ;;  %v238_v32 = vmul.f32 %v795_v6, %v217_v21  ;;  %v219_v45 = vld [vmem:[%s785_s27 + $0x30] sm:$0xff] }
  0x14   : > { %668 = vmatprep.subr.bf16.mxu0 %v720_v12  ;;  %696 = vmatprep.subr.bf16.mxu1 %v720_v12  ;;  %v226_v28 = vld [vmem:[%s785_s27 + $0x68] sm:$0xff]  ;;  %v263_v31 = vadd.f32 %v802_v9, %v242_v22  ;;  %v264_v33 = vadd.f32 %v802_v9, %v243_v26  ;;  %v244_v34 = vmul.f32 %v795_v6, %v223_v23  ;;  %v220_v46 = vld [vmem:[%s785_s27 + $0x38] sm:$0xff]  ;;  %v227_v53 = vld [vmem:[%s785_s27 + $0x70] sm:$0xff] }
  0x15   : > { %v271_v14 = vmax.f32 %v255_v10, 0.0  ;;  %v272_v15 = vmax.f32 %v256_v11, 0.0  ;;  %v245_v35 = vmul.f32 %v795_v6, %v224_v24  ;;  %v239_v36 = vmul.f32 %v795_v6, %v218_v25  ;;  %v228_v54 = vld [vmem:[%s785_s27 + $0x78] sm:$0xff] }
  0x16   : > { %v279_v37 = vmax.f32 %v263_v31, 0.0  ;;  %v246_v38 = vmul.f32 %v795_v6, %v225_v27  ;;  %v247_v39 = vmul.f32 %v795_v6, %v226_v28  ;;  %v280_v41 = vmax.f32 %v264_v33, 0.0 }
  0x17   : > { %v287_v20 = vpack.c.bf16 %v272_v15, %v271_v14  ;;  %669 = vmatpush3.bf16.msra.mxu0 %v720_v12  ;;  %704 = vmatpush3.bf16.msra.mxu1 %v720_v12  ;;  %v257_v42 = vadd.f32 %v802_v9, %v236_v29  ;;  %v258_v43 = vadd.f32 %v802_v9, %v237_v30 }
  0x18   : > { %670 = vmatprep.subr.bf16.mxu0 %v721_v17  ;;  %697 = vmatprep.subr.bf16.mxu1 %v721_v17  ;;  %v259_v44 = vadd.f32 %v802_v9, %v238_v32  ;;  %v291_v47 = vpack.c.bf16 %v280_v41, %v279_v37  ;;  %v265_v48 = vadd.f32 %v802_v9, %v244_v34 }
  0x19   : > { %676 = vmatprep.mubr.bf16.mxu0 %v287_v20  ;;  %v266_v49 = vadd.f32 %v802_v9, %v245_v35  ;;  %v260_v50 = vadd.f32 %v802_v9, %v239_v36  ;;  %v267_v51 = vadd.f32 %v802_v9, %v246_v38  ;;  %v268_v52 = vadd.f32 %v802_v9, %v247_v39 }
  0x1a   : > { %v273_v56 = vmax.f32 %v257_v42, 0.0  ;;  %v274_v57 = vmax.f32 %v258_v43, 0.0  ;;  %v240_v58 = vmul.f32 %v795_v6, %v219_v45  ;;  %v241_v59 = vmul.f32 %v795_v6, %v220_v46  ;;  %684 = vmatprep.mubr.bf16.mxu1 %v291_v47 }
  0x1b   : > { %671 = vmatpush3.bf16.msra.mxu0 %v721_v17  ;;  %705 = vmatpush3.bf16.msra.mxu1 %v721_v17  ;;  %v281_v60 = vmax.f32 %v265_v48, 0.0  ;;  %v282_v61 = vmax.f32 %v266_v49, 0.0  ;;  %v248_v62 = vmul.f32 %v795_v6, %v227_v53  ;;  %v249_v63 = vmul.f32 %v795_v6, %v228_v54 }
  0x1c   : > { %672 = vmatprep.subr.bf16.mxu0 %v722_v40  ;;  %698 = vmatprep.subr.bf16.mxu1 %v722_v40  ;;  %v275_v0 = vmax.f32 %v259_v44, 0.0  ;;  %v276_v1 = vmax.f32 %v260_v50, 0.0  ;;  %v283_v2 = vmax.f32 %v267_v51, 0.0  ;;  %v284_v3 = vmax.f32 %v268_v52, 0.0 }
  0x1d   : > { %v288_v4 = vpack.c.bf16 %v274_v57, %v273_v56  ;;  %v261_v5 = vadd.f32 %v802_v9, %v240_v58  ;;  %v262_v7 = vadd.f32 %v802_v9, %v241_v59  ;;  %v292_v8 = vpack.c.bf16 %v282_v61, %v281_v60 }
  0x1e   : > { %v269_v10 = vadd.f32 %v802_v9, %v248_v62  ;;  %v270_v11 = vadd.f32 %v802_v9, %v249_v63  ;;  %v289_v6 = vpack.c.bf16 %v276_v1, %v275_v0  ;;  %v293_v12 = vpack.c.bf16 %v284_v3, %v283_v2 }
  0x1f   : > { %673 = vmatpush3.bf16.msra.mxu0 %v722_v40  ;;  %706 = vmatpush3.bf16.msra.mxu1 %v722_v40  ;;  %v277_v13 = vmax.f32 %v261_v5, 0.0  ;;  %v278_v14 = vmax.f32 %v262_v7, 0.0 }
  0x20   : > { %674 = vmatprep.subr.bf16.mxu0 %v723_v55  ;;  %699 = vmatprep.subr.bf16.mxu1 %v723_v55  ;;  %v285_v15 = vmax.f32 %v269_v10, 0.0  ;;  %v286_v16 = vmax.f32 %v270_v11, 0.0 }
  0x21   : > { %v290_v17 = vpack.c.bf16 %v278_v14, %v277_v13 }
  0x22   : > { %v294_v18 = vpack.c.bf16 %v286_v16, %v285_v15 }
  0x23   : > { %675 = vmatpush3.bf16.msra.mxu0 %v723_v55  ;;  %707 = vmatpush3.bf16.msra.mxu1 %v723_v55 }
  0x26   : > { %677 = vmatmul.mubr.bf16.vlgmr.msra.gmra.mrb[0].mxu0 %v288_v4  ;;  %685 = vmatmul.mubr.bf16.vlgmr.msra.gmra.mrb[0].mxu1 %v292_v8 }
  0x27   : > { %680 = vmatprep.mubr.bf16.mxu0 %v289_v6  ;;  %688 = vmatprep.mubr.bf16.mxu1 %v293_v12 }
  0x2e   : > { %681 = vmatmul.mubr.bf16.gmra.mrb[4].mxu0 %v290_v17  ;;  %689 = vmatmul.mubr.bf16.gmra.mrb[4].mxu1 %v294_v18 }
  0xf9   : > { %v678_v9 = vpop.f32.mrb[0].mxu0  ;;  %v686_v19 = vpop.f32.mrb[0].mxu1 }
  0xfa   : > { %458 = vst [vmem:[%s865_s21 + $0x10] sm:$0xff] %v678_v9  ;;  %v393_v20 = vpop.f32.mrb[1].mxu0  ;;  %466 = vst [vmem:[%s865_s21 + $0x50] sm:$0xff] %v686_v19  ;;  %v425_v21 = vpop.f32.mrb[1].mxu1  ;;  %v495_v29 = vmul.f32 %v678_v9, %v678_v9  ;;  %v503_v61 = vmul.f32 %v686_v19, %v686_v19 }
  0xfb   : > { %456 = vst [vmem:[%s865_s21] sm:$0xff] %v393_v20  ;;  %v679_v22 = vpop.f32.mrb[2].mxu0  ;;  %464 = vst [vmem:[%s865_s21 + $0x40] sm:$0xff] %v425_v21  ;;  %v687_v23 = vpop.f32.mrb[2].mxu1  ;;  %v493_v26 = vmul.f32 %v393_v20, %v393_v20  ;;  %v501_v55 = vmul.f32 %v425_v21, %v425_v21 }
  0xfc   : > { %459 = vst [vmem:[%s865_s21 + $0x18] sm:$0xff] %v679_v22  ;;  %v396_v24 = vpop.f32.mrb[3].mxu0  ;;  %467 = vst [vmem:[%s865_s21 + $0x58] sm:$0xff] %v687_v23  ;;  %v428_v25 = vpop.f32.mrb[3].mxu1  ;;  %v496_v32 = vmul.f32 %v679_v22, %v679_v22  ;;  %v504_v0 = vmul.f32 %v687_v23, %v687_v23 }
  0xfd   : > { %457 = vst [vmem:[%s865_s21 + $0x8] sm:$0xff] %v396_v24  ;;  %v472_v27 = vadd.f32 %v396_v24, %v393_v20  ;;  %v494_v28 = vmul.f32 %v396_v24, %v396_v24  ;;  %465 = vst [vmem:[%s865_s21 + $0x48] sm:$0xff] %v428_v25  ;;  %v502_v60 = vmul.f32 %v428_v25, %v428_v25 }
  0xff   : > { %v473_v30 = vadd.f32 %v678_v9, %v472_v27  ;;  %v509_v31 = vadd.f32 %v494_v28, %v493_v26 }
 0x101   : > { %v510_v33 = vadd.f32 %v509_v31, %v495_v29  ;;  %v682_v34 = vpop.f32.mrb[4].mxu0  ;;  %v474_v35 = vadd.f32 %v679_v22, %v473_v30  ;;  %v690_v36 = vpop.f32.mrb[4].mxu1 }
 0x102   : > { %462 = vst [vmem:[%s865_s21 + $0x30] sm:$0xff] %v682_v34  ;;  %v409_v37 = vpop.f32.mrb[5].mxu0  ;;  %470 = vst [vmem:[%s865_s21 + $0x70] sm:$0xff] %v690_v36  ;;  %v441_v38 = vpop.f32.mrb[5].mxu1  ;;  %v499_v49 = vmul.f32 %v682_v34, %v682_v34  ;;  %v507_v11 = vmul.f32 %v690_v36, %v690_v36 }
 0x103   : > { %460 = vst [vmem:[%s865_s21 + $0x20] sm:$0xff] %v409_v37  ;;  %v475_v39 = vadd.f32 %v474_v35, %v409_v37  ;;  %v497_v40 = vmul.f32 %v409_v37, %v409_v37  ;;  %v511_v41 = vadd.f32 %v510_v33, %v496_v32  ;;  %v683_v42 = vpop.f32.mrb[6].mxu0  ;;  %468 = vst [vmem:[%s865_s21 + $0x60] sm:$0xff] %v441_v38  ;;  %v691_v43 = vpop.f32.mrb[6].mxu1 }
 0x104   : > { %463 = vst [vmem:[%s865_s21 + $0x38] sm:$0xff] %v683_v42  ;;  %v412_v44 = vpop.f32.mrb[7].mxu0  ;;  %471 = vst [vmem:[%s865_s21 + $0x78] sm:$0xff] %v691_v43  ;;  %v444_v45 = vpop.f32.mrb[7].mxu1  ;;  %v500_v52 = vmul.f32 %v683_v42, %v683_v42  ;;  %v505_v3 = vmul.f32 %v441_v38, %v441_v38  ;;  %v508_v13 = vmul.f32 %v691_v43, %v691_v43 }
 0x105   : > { %v512_v46 = vadd.f32 %v511_v41, %v497_v40  ;;  %461 = vst [vmem:[%s865_s21 + $0x28] sm:$0xff] %v412_v44  ;;  %v476_v47 = vadd.f32 %v475_v39, %v412_v44  ;;  %v498_v48 = vmul.f32 %v412_v44, %v412_v44  ;;  %469 = vst [vmem:[%s865_s21 + $0x68] sm:$0xff] %v444_v45 }
 0x106   : > { %v506_v10 = vmul.f32 %v444_v45, %v444_v45 }
 0x107   : > { %v477_v50 = vadd.f32 %v682_v34, %v476_v47  ;;  %v513_v51 = vadd.f32 %v512_v46, %v498_v48 }
 0x109   : > { %v514_v53 = vadd.f32 %v513_v51, %v499_v49  ;;  %v478_v54 = vadd.f32 %v683_v42, %v477_v50 }
 0x10b   : > { %v479_v56 = vadd.f32 %v478_v54, %v425_v21  ;;  %v515_v57 = vadd.f32 %v514_v53, %v500_v52 }
 0x10d   : > { %v516_v58 = vadd.f32 %v515_v57, %v501_v55  ;;  %v480_v59 = vadd.f32 %v479_v56, %v428_v25 }
 0x10f   : > { %v481_v62 = vadd.f32 %v686_v19, %v480_v59  ;;  %v517_v63 = vadd.f32 %v516_v58, %v502_v60 }
 0x111   : > { %v518_v1 = vadd.f32 %v517_v63, %v503_v61  ;;  %v482_v2 = vadd.f32 %v687_v23, %v481_v62 }
 0x113   : > { %v483_v4 = vadd.f32 %v482_v2, %v441_v38  ;;  %v519_v5 = vadd.f32 %v518_v1, %v504_v0 }
 0x115   : > { %v520_v7 = vadd.f32 %v519_v5, %v505_v3  ;;  %v484_v8 = vadd.f32 %v483_v4, %v444_v45 }
 0x117   : > { %v485_v6 = vadd.f32 %v690_v36, %v484_v8  ;;  %v521_v12 = vadd.f32 %v520_v7, %v506_v10 }
 0x119   : > { %v486_v14 = vadd.f32 %v691_v43, %v485_v6  ;;  %v522_v15 = vadd.f32 %v521_v12, %v507_v11 }
 0x11b   : > { %v487_v16 = vrot.slane %v486_v14, 4  ;;  %v523_v17 = vadd.f32 %v522_v15, %v508_v13 }
 0x11d   : > { %v488_v18 = vadd.f32 %v487_v16, %v486_v14  ;;  %v524_v9 = vrot.slane %v523_v17, 4 }
 0x11f   : > { %v489_v19 = vrot.slane %v488_v18, 2  ;;  %v525_v20 = vadd.f32 %v524_v9, %v523_v17 }
 0x121   : > { %v490_v21 = vadd.f32 %v489_v19, %v488_v18  ;;  %v526_v22 = vrot.slane %v525_v20, 2 }
 0x123   : > { %v491_v23 = vrot.slane %v490_v21, 1  ;;  %v527_v24 = vadd.f32 %v526_v22, %v525_v20 }
 0x125   : > { %v528_v25 = vrot.slane %v527_v24, 1  ;;  %v492_v26 = vadd.f32 %v491_v23, %v490_v21 }
 0x127   : > { %v529_v27 = vadd.f32 %v528_v25, %v527_v24 }
 0x129   : > { %v531_v28 = vsel %vm530_vm0, %v492_v26, %v529_v27 }
 0x12a   : > { %v533_v29 = vsel %vm532_vm1, %v531_v28, 0.0 }
 0x12b   : > { %534 = vst [vmem:[%s211_s24] sm:$0xff] %v533_v29 }
 0x12c PF: > { %s15_s15 = sadd.s32 1, %s730_s15  }
 0x12d   : > { %p12_p5 = scmp.ge.s32.totalorder %s15_s15, 6  }
 0x12f   :  { %14 = sbr.rel (!%p12_p5) target bundleno = 1 (0x1), region = 74 }

// kernel: bottleneck_forward.5
= control target key start
LH: loop header
LB: loop body
LE: loop exit
PB: predicated region body
PF: predicated region fallthrough
CT: control target
= control target key end

     0   :  { %s3211_s15 = smov 0   ;;  %s4289_s0 = inlined_call_operand.vmem [shape: f32[512,128], index: 0, kind: input, shape index: {}]   ;;  %s4290_s1 = inlined_call_operand.vmem [shape: f32[8,128], index: 1, kind: input, shape index: {}]   ;;  %s4291_s2 = inlined_call_operand.vmem [shape: bf16[1152,128], index: 2, kind: input, shape index: {}]   ;;  %s4292_s3 = inlined_call_operand.vmem [shape: f32[512,128], index: 3, kind: output, shape index: {0}]   ;;  %s4293_s4 = inlined_call_operand.vmem [shape: f32[2,8,128], index: 4, kind: output, shape index: {1}]  }
   0x1 LB: > { %s3217_s16 = sadd.s32 4294967295, %s3183_s15   ;;  %p2477_p0 = scmp.ge.s32.totalorder %s3183_s15, 1  ;;  %s3183_s15 = sphi %s3211_s15, %s15_s15  }
   0x2   : > { %p166_p1 = scmp.lt.s32.totalorder %s3183_s15, 3 }
   0x4   : > { %p167_p2 = pnand %p2477_p0, %p166_p1 }
   0x5   : > { %v3104_v0 = vld [vmem:[%s4291_s2 + $0x40] sm:$0xff] (!%p167_p2)   ;;  %v3185_v2 = vmov (!%p167_p2), 0.0   ;;  %s2478_s21 = sshll.u32 (!%p167_p2), %s3217_s16, 5  ;;  %v3106_v3 = vld [vmem:[%s4291_s2 + $0x48] sm:$0xff] (!%p167_p2)   ;;  %v3108_v5 = vld [vmem:[%s4291_s2 + $0x50] sm:$0xff] (!%p167_p2)   ;;  %p208_p4 = scmp.lt.s32.totalorder (!%p167_p2), %s3217_s16, 1 }
   0x6   : > { %170 = sbr.rel (%p167_p2) target bundleno = 559 (0x22f), region = 32  ;;  %v3105_v1 = vld [vmem:[%s4291_s2] sm:$0xff] (!%p167_p2)   ;;  %351 = vst [vmem:[#allocation2] sm:$0xff] (!%p167_p2), %v3185_v2  ;;  %352 = vst [vmem:[#allocation2 + $0x8] sm:$0xff] (!%p167_p2), %v3185_v2  ;;  %2559 = vmatprep.subr.bf16.mxu0 (!%p167_p2), %v3104_v0  ;;  %3079 = vmatprep.subr.bf16.mxu1 (!%p167_p2), %v3104_v0  ;;  %p197_p3 = scmp.lt.s32.totalorder (!%p167_p2), %s2478_s21, 63  ;;  %v3107_v4 = vld [vmem:[%s4291_s2 + $0x8] sm:$0xff] (!%p167_p2)  }
   0x7   : > { %353 = vst [vmem:[#allocation2 + $0x10] sm:$0x3] (!%p167_p2), %v3185_v2  ;;  %355 = vst [vmem:[#allocation2 + $0x198] sm:$0xff] (!%p167_p2), %v3185_v2  ;;  %2560 = vmatpush3.bf16.msra.mxu0 (!%p167_p2), %v3105_v1  ;;  %3087 = vmatpush3.bf16.msra.mxu1 (!%p167_p2), %v3105_v1  ;;  %v3109_v6 = vld [vmem:[%s4291_s2 + $0x10] sm:$0xff] (!%p167_p2)   ;;  %v3110_v7 = vld [vmem:[%s4291_s2 + $0x58] sm:$0xff] (!%p167_p2)   ;;  %vm2381_vm0 = vcmask (!%p167_p2), 1040384  }
   0x8   : > { %356 = vst [vmem:[#allocation2 + $0x1a0] sm:$0xff] (!%p167_p2), %v3185_v2  ;;  %357 = vst [vmem:[#allocation2 + $0x1a8] sm:$0x3] (!%p167_p2), %v3185_v2  ;;  %2561 = vmatprep.subr.bf16.mxu0 (!%p167_p2), %v3106_v3  ;;  %3080 = vmatprep.subr.bf16.mxu1 (!%p167_p2), %v3106_v3  ;;  %v3111_v8 = vld [vmem:[%s4291_s2 + $0x18] sm:$0xff] (!%p167_p2)   ;;  %v3112_v9 = vld [vmem:[%s4291_s2 + $0x60] sm:$0xff] (!%p167_p2)   ;;  %vm2383_vm1 = vcmask (!%p167_p2), 1041408  }
   0x9   : > { %359 = vst [vmem:[#allocation2 + $0x18] sm:$0x1] (!%p167_p2), %v3185_v2  ;;  %360 = vst [vmem:[#allocation2 + $0x30] sm:$0x1] (!%p167_p2), %v3185_v2  ;;  %v3113_v10 = vld [vmem:[%s4291_s2 + $0x20] sm:$0xff] (!%p167_p2)   ;;  %v3114_v11 = vld [vmem:[%s4291_s2 + $0x68] sm:$0xff] (!%p167_p2)  }
   0xa   : > { %361 = vst [vmem:[#allocation2 + $0x48] sm:$0x1] (!%p167_p2), %v3185_v2  ;;  %362 = vst [vmem:[#allocation2 + $0x60] sm:$0x1] (!%p167_p2), %v3185_v2  ;;  %v3312_v17 = vld [vmem:[%s4290_s1] ss:$0 sm:$0xff] (!%p167_p2) }
   0xb   : > { %363 = vst [vmem:[#allocation2 + $0x78] sm:$0x1] (!%p167_p2), %v3185_v2  ;;  %364 = vst [vmem:[#allocation2 + $0x90] sm:$0x1] (!%p167_p2), %v3185_v2  ;;  %2562 = vmatpush3.bf16.msra.mxu0 (!%p167_p2), %v3107_v4  ;;  %3088 = vmatpush3.bf16.msra.mxu1 (!%p167_p2), %v3107_v4  ;;  %v3317_v18 = vld [vmem:[%s4290_s1 + $0x1] ss:$0 sm:$0xff] (!%p167_p2) }
   0xc   : > { %365 = vst [vmem:[#allocation2 + $0xa8] sm:$0x1] (!%p167_p2), %v3185_v2  ;;  %366 = vst [vmem:[#allocation2 + $0xc0] sm:$0x1] (!%p167_p2), %v3185_v2  ;;  %2563 = vmatprep.subr.bf16.mxu0 (!%p167_p2), %v3108_v5  ;;  %3081 = vmatprep.subr.bf16.mxu1 (!%p167_p2), %v3108_v5  ;;  %v3115_v21 = vld [vmem:[%s4291_s2 + $0x28] sm:$0xff] (!%p167_p2)   ;;  %v3116_v22 = vld [vmem:[%s4291_s2 + $0x70] sm:$0xff] (!%p167_p2)  }
   0xd   : > { %367 = vst [vmem:[#allocation2 + $0xd8] sm:$0x1] %v3185_v2  ;;  %368 = vst [vmem:[#allocation2 + $0xf0] sm:$0x1] %v3185_v2  ;;  %s4295_s21 = smov (!%p197_p3, %s2478_s21), 63  ;;  %v459_v12 = vld [vmem:[#allocation2 + $0x1] sm:$0xff] }
   0xe   : > { %369 = vst [vmem:[#allocation2 + $0x108] sm:$0x1] %v3185_v2  ;;  %370 = vst [vmem:[#allocation2 + $0x120] sm:$0x1] %v3185_v2  ;;  %s2479_s6 = sshll.u32 %s4295_s21, 3  ;;  %v460_v13 = vld [vmem:[#allocation2 + $0x9] sm:$0xff] }
   0xf   : > { %371 = vst [vmem:[#allocation2 + $0x138] sm:$0x1] %v3185_v2  ;;  %372 = vst [vmem:[#allocation2 + $0x150] sm:$0x1] %v3185_v2  ;;  %2564 = vmatpush3.bf16.msra.mxu0 %v3109_v6  ;;  %3089 = vmatpush3.bf16.msra.mxu1 %v3109_v6  ;;  %s3299_s13 = scalar_lea.vmem %s4289_s0, %s2479_s6  ;;  %v717_v15 = vpack.c.bf16 %v460_v13, %v459_v12  ;;  %v3117_v25 = vld [vmem:[%s4291_s2 + $0x30] sm:$0xff]   ;;  %v3118_v28 = vld [vmem:[%s4291_s2 + $0x78] sm:$0xff]   ;;  %s4197_s22 = scalar_lea.vmem %s4292_s3, %s2479_s6 }
  0x10   : > { %373 = vst [vmem:[#allocation2 + $0x168] sm:$0x1] %v3185_v2  ;;  %374 = vst [vmem:[#allocation2 + $0x180] sm:$0x1] %v3185_v2  ;;  %2565 = vmatprep.subr.bf16.mxu0 %v3110_v7  ;;  %3082 = vmatprep.subr.bf16.mxu1 %v3110_v7  ;;  %v235_v14 = vld [vmem:[%s3299_s13 + $0xb0] sm:$0xff]  ;;  %v236_v16 = vld [vmem:[%s3299_s13 + $0xb8] sm:$0xff] }
  0x11   : > { %377 = vst [vmem:[#allocation2 + $0x29] sm:$0x1] %v3185_v2  ;;  %378 = vst [vmem:[#allocation2 + $0x41] sm:$0x1] %v3185_v2  ;;  %v272_v19 = vmul.f32 %v3312_v17, %v235_v14  ;;  %v273_v20 = vmul.f32 %v3312_v17, %v236_v16  ;;  %1468 = vmatprep.mubr.bf16.mxu0 %v717_v15  ;;  %v213_v30 = vld [vmem:[%s3299_s13] sm:$0xff]  ;;  %v214_v31 = vld [vmem:[%s3299_s13 + $0x8] sm:$0xff] }
  0x12   : > { %379 = vst [vmem:[#allocation2 + $0x59] sm:$0x1] %v3185_v2  ;;  %380 = vst [vmem:[#allocation2 + $0x71] sm:$0x1] %v3185_v2  ;;  %v3119_v32 = vld [vmem:[%s4291_s2 + $0x38] sm:$0xff]   ;;  %v250_v33 = vmul.f32 %v3312_v17, %v213_v30  ;;  %v251_v34 = vmul.f32 %v3312_v17, %v214_v31  ;;  %v237_v35 = vld [vmem:[%s3299_s13 + $0xc0] sm:$0xff] }
  0x13   : > { %381 = vst [vmem:[#allocation2 + $0x89] sm:$0x1] %v3185_v2  ;;  %382 = vst [vmem:[#allocation2 + $0xa1] sm:$0x1] %v3185_v2  ;;  %2566 = vmatpush3.bf16.msra.mxu0 %v3111_v8  ;;  %3090 = vmatpush3.bf16.msra.mxu1 %v3111_v8  ;;  %v309_v23 = vadd.f32 %v3317_v18, %v272_v19  ;;  %v310_v24 = vadd.f32 %v3317_v18, %v273_v20  ;;  %v238_v36 = vld [vmem:[%s3299_s13 + $0xc8] sm:$0xff]  ;;  %v3120_v40 = vld [vmem:[%s4291_s2 + $0xc0] sm:$0xff]  }
  0x14   : > { %383 = vst [vmem:[#allocation2 + $0xb9] sm:$0x1] %v3185_v2  ;;  %384 = vst [vmem:[#allocation2 + $0xd1] sm:$0x1] %v3185_v2  ;;  %2567 = vmatprep.subr.bf16.mxu0 %v3112_v9  ;;  %3083 = vmatprep.subr.bf16.mxu1 %v3112_v9  ;;  %v274_v38 = vmul.f32 %v3312_v17, %v237_v35  ;;  %v275_v39 = vmul.f32 %v3312_v17, %v238_v36  ;;  %v3121_v43 = vld [vmem:[%s4291_s2 + $0x140] sm:$0xff]   ;;  %v3124_v51 = vld [vmem:[%s4291_s2 + $0xc8] sm:$0xff]  }
  0x15   : > { %385 = vst [vmem:[#allocation2 + $0xe9] sm:$0x1] %v3185_v2  ;;  %386 = vst [vmem:[#allocation2 + $0x101] sm:$0x1] %v3185_v2  ;;  %v341_v26 = vmax.f32 %v309_v23, 0.0  ;;  %v342_v27 = vmax.f32 %v310_v24, 0.0  ;;  %v287_v41 = vadd.f32 %v3317_v18, %v250_v33  ;;  %v288_v42 = vadd.f32 %v3317_v18, %v251_v34 }
  0x16   : > { %387 = vst [vmem:[#allocation2 + $0x119] sm:$0x1] %v3185_v2  ;;  %388 = vst [vmem:[#allocation2 + $0x131] sm:$0x1] %v3185_v2  ;;  %v311_v44 = vadd.f32 %v3317_v18, %v274_v38  ;;  %v312_v45 = vadd.f32 %v3317_v18, %v275_v39  ;;  %v3122_v46 = vld [vmem:[%s4291_s2 + $0x80] sm:$0xff]   ;;  %v3129_v58 = vld [vmem:[%s4291_s2 + $0x148] sm:$0xff]  }
  0x17   : > { %389 = vst [vmem:[#allocation2 + $0x149] sm:$0x1] %v3185_v2  ;;  %390 = vst [vmem:[#allocation2 + $0x161] sm:$0x1] %v3185_v2  ;;  %2568 = vmatpush3.bf16.msra.mxu0 %v3113_v10  ;;  %3091 = vmatpush3.bf16.msra.mxu1 %v3113_v10  ;;  %v825_v29 = vpack.c.bf16 %v342_v27, %v341_v26  ;;  %v3123_v47 = vld [vmem:[%s4291_s2 + $0x100] sm:$0xff]   ;;  %v319_v48 = vmax.f32 %v287_v41, 0.0 }
  0x18   : > { %391 = vst [vmem:[#allocation2 + $0x179] sm:$0x1] %v3185_v2  ;;  %392 = vst [vmem:[#allocation2 + $0x191] sm:$0x1] %v3185_v2  ;;  %2569 = vmatprep.subr.bf16.mxu0 %v3114_v11  ;;  %3084 = vmatprep.subr.bf16.mxu1 %v3114_v11  ;;  %v320_v49 = vmax.f32 %v288_v42, 0.0  ;;  %v343_v52 = vmax.f32 %v311_v44, 0.0 }
  0x19   : > { %376 = vst [vmem:[#allocation2 + $0x11] sm:$0x1] %v3185_v2  ;;  %358 = vst [vmem:[#allocation2] sm:$0x1] %v3185_v2  ;;  %1564 = vmatprep.mubr.bf16.mxu1 %v825_v29  ;;  %v344_v53 = vmax.f32 %v312_v45, 0.0  ;;  %v215_v59 = vld [vmem:[%s3299_s13 + $0x10] sm:$0xff] }
  0x1a   : > { %375 = vst [vmem:[#allocation2 + $0x198] sm:$0x1] %v3185_v2  ;;  %393 = vst [vmem:[#allocation2 + $0x1a9] sm:$0x1] %v3185_v2  ;;  %v3366_v57 = vpack.c.bf16 %v320_v49, %v319_v48  ;;  %v216_v61 = vld [vmem:[%s3299_s13 + $0x18] sm:$0xff]  ;;  %v252_v62 = vmul.f32 %v3312_v17, %v215_v59  ;;  %v239_v63 = vld [vmem:[%s3299_s13 + $0xd0] sm:$0xff] }
  0x1b   : > { %2570 = vmatpush3.bf16.msra.mxu0 %v3115_v21  ;;  %3092 = vmatpush3.bf16.msra.mxu1 %v3115_v21  ;;  %417 = vst [vmem:[#allocation2 + $0x121] sm:$0xff] %v341_v26  ;;  %418 = vst [vmem:[#allocation2 + $0x129] sm:$0xff] %v342_v27  ;;  %v834_v60 = vpack.c.bf16 %v344_v53, %v343_v52  ;;  %v240_v0 = vld [vmem:[%s3299_s13 + $0xd8] sm:$0xff]  ;;  %v3125_v1 = vld [vmem:[%s4291_s2 + $0x88] sm:$0xff]   ;;  %v276_v3 = vmul.f32 %v3312_v17, %v239_v63  ;;  %s4297_s16 = smov (!%p208_p4, %s3217_s16), 1 }
  0x1c   : > { %2571 = vmatprep.subr.bf16.mxu0 %v3116_v22  ;;  %3085 = vmatprep.subr.bf16.mxu1 %v3116_v22  ;;  %395 = vst [vmem:[#allocation2 + $0x19] sm:$0xff] %v319_v48  ;;  %396 = vst [vmem:[#allocation2 + $0x21] sm:$0xff] %v320_v49  ;;  %v277_v4 = vmul.f32 %v3312_v17, %v240_v0  ;;  %v3131_v5 = vld [vmem:[%s4291_s2 + $0x108] sm:$0xff]   ;;  %v289_v6 = vadd.f32 %v3317_v18, %v252_v62  ;;  %v3126_v7 = vld [vmem:[%s4291_s2 + $0xd0] sm:$0xff]   ;;  %s2482_s21 = sshll.u32 %s4297_s16, 3 }
  0x1d   : > { %419 = vst [vmem:[#allocation2 + $0x139] sm:$0xff] %v343_v52  ;;  %420 = vst [vmem:[#allocation2 + $0x141] sm:$0xff] %v344_v53  ;;  %v313_v9 = vadd.f32 %v3317_v18, %v276_v3  ;;  %v3127_v11 = vld [vmem:[%s4291_s2 + $0x90] sm:$0xff]   ;;  %v3128_v15 = vld [vmem:[%s4291_s2 + $0xd8] sm:$0xff]   ;;  %s211_s24 = scalar_lea.vmem %s4293_s4, %s2482_s21 }
  0x1e   : > { %v314_v10 = vadd.f32 %v3317_v18, %v277_v4  ;;  %v321_v12 = vmax.f32 %v289_v6, 0.0  ;;  %v217_v21 = vld [vmem:[%s3299_s13 + $0x20] sm:$0xff]  ;;  %v3130_v33 = vld [vmem:[%s4291_s2 + $0x98] sm:$0xff]   ;;  %v3137_v38 = vld [vmem:[%s4291_s2 + $0x150] sm:$0xff]  }
  0x1f   : > { %2572 = vmatpush3.bf16.msra.mxu0 %v3117_v25  ;;  %3093 = vmatpush3.bf16.msra.mxu1 %v3117_v25  ;;  %v345_v19 = vmax.f32 %v313_v9, 0.0  ;;  %v218_v25 = vld [vmem:[%s3299_s13 + $0x28] sm:$0xff]  ;;  %v254_v26 = vmul.f32 %v3312_v17, %v217_v21  ;;  %v241_v31 = vld [vmem:[%s3299_s13 + $0xe0] sm:$0xff]  ;;  %v3139_v44 = vld [vmem:[%s4291_s2 + $0x110] sm:$0xff]  }
  0x20   : > { %v427_v37 = vld [vmem:[#allocation2] sm:$0xff]  ;;  %2573 = vmatprep.subr.bf16.mxu0 %v3118_v28  ;;  %3086 = vmatprep.subr.bf16.mxu1 %v3118_v28  ;;  %v346_v20 = vmax.f32 %v314_v10, 0.0  ;;  %397 = vst [vmem:[#allocation2 + $0x31] sm:$0xff] %v321_v12  ;;  %v255_v30 = vmul.f32 %v3312_v17, %v218_v25  ;;  %v278_v35 = vmul.f32 %v3312_v17, %v241_v31  ;;  %v220_v59 = vld [vmem:[%s3299_s13 + $0x38] sm:$0xff]  ;;  %v3135_v62 = vld [vmem:[%s4291_s2 + $0xa8] sm:$0xff]  }
  0x21   : > { %v716_v50 = vpack.c.bf16 %v3185_v2, %v427_v37  ;;  %v253_v2 = vmul.f32 %v3312_v17, %v216_v61  ;;  %421 = vst [vmem:[#allocation2 + $0x151] sm:$0xff] %v345_v19  ;;  %v291_v34 = vadd.f32 %v3317_v18, %v254_v26  ;;  %v3132_v39 = vld [vmem:[%s4291_s2 + $0xe0] sm:$0xff]   ;;  %v257_v61 = vmul.f32 %v3312_v17, %v220_v59  ;;  %v3136_v63 = vld [vmem:[%s4291_s2 + $0xf0] sm:$0xff]   ;;  %v3144_v3 = vld [vmem:[%s4291_s2 + $0x158] sm:$0xff]  }
  0x22   : > { %v451_v54 = vld [vmem:[#allocation2 + $0x120] sm:$0xff]  ;;  %v452_v55 = vld [vmem:[#allocation2 + $0x128] sm:$0xff]  ;;  %422 = vst [vmem:[#allocation2 + $0x159] sm:$0xff] %v346_v20  ;;  %v843_v29 = vpack.c.bf16 %v346_v20, %v345_v19  ;;  %v292_v37 = vadd.f32 %v3317_v18, %v255_v30  ;;  %v315_v41 = vadd.f32 %v3317_v18, %v278_v35  ;;  %v3140_v19 = vld [vmem:[%s4291_s2 + $0xf8] sm:$0xff]  }
  0x23   : > { %2574 = vmatpush3.bf16.msra.mxu0 %v3119_v32  ;;  %3094 = vmatpush3.bf16.msra.mxu1 %v3119_v32  ;;  %v824_v56 = vpack.c.bf16 %v452_v55, %v451_v54  ;;  %v290_v8 = vadd.f32 %v3317_v18, %v253_v2  ;;  %v429_v13 = vld [vmem:[#allocation2 + $0x18] sm:$0xff]  ;;  %v430_v14 = vld [vmem:[#allocation2 + $0x20] sm:$0xff]  ;;  %v242_v32 = vld [vmem:[%s3299_s13 + $0xe8] sm:$0xff] }
  0x24   : > { %2671 = vmatprep.subr.bf16.mxu1 %v3120_v40  ;;  %2783 = vmatprep.subr.bf16.mxu0 %v3121_v43  ;;  %v3400_v22 = vpack.c.bf16 %v430_v14, %v429_v13  ;;  %v453_v23 = vld [vmem:[#allocation2 + $0x138] sm:$0xff]  ;;  %v454_v24 = vld [vmem:[#allocation2 + $0x140] sm:$0xff]  ;;  %v279_v36 = vmul.f32 %v3312_v17, %v242_v32  ;;  %v323_v40 = vmax.f32 %v291_v34, 0.0  ;;  %v324_v43 = vmax.f32 %v292_v37, 0.0  ;;  %v3134_v55 = vld [vmem:[%s4291_s2 + $0xe8] sm:$0xff]  }
  0x25   : > { %v322_v16 = vmax.f32 %v290_v8, 0.0  ;;  %v3404_v27 = vpack.c.bf16 %v454_v24, %v453_v23  ;;  %v3133_v45 = vld [vmem:[%s4291_s2 + $0xa0] sm:$0xff]   ;;  %v3138_v13 = vld [vmem:[%s4291_s2 + $0xb0] sm:$0xff]   ;;  %v224_v23 = vld [vmem:[%s3299_s13 + $0x58] sm:$0xff] }
  0x26   : > { %1469 = vmatmul.mubr.bf16.vlgmr.msra.gmra.mrb[0].mxu0 %v716_v50  ;;  %1565 = vmatmul.mubr.bf16.vlgmr.msra.gmra.mrb[0].mxu1 %v824_v56  ;;  %v316_v42 = vadd.f32 %v3317_v18, %v279_v36  ;;  %399 = vst [vmem:[#allocation2 + $0x49] sm:$0xff] %v323_v40  ;;  %400 = vst [vmem:[#allocation2 + $0x51] sm:$0xff] %v324_v43  ;;  %v3435_v52 = vpack.c.bf16 %v324_v43, %v323_v40  ;;  %v223_v21 = vld [vmem:[%s3299_s13 + $0x50] sm:$0xff]  ;;  %v3141_v24 = vld [vmem:[%s4291_s2 + $0xb8] sm:$0xff]  }
  0x27   : > { %2672 = vmatpush3.bf16.msra.mxu1 %v3122_v46  ;;  %2784 = vmatpush3.bf16.msra.mxu0 %v3123_v47  ;;  %398 = vst [vmem:[#allocation2 + $0x39] sm:$0xff] %v322_v16  ;;  %v3406_v28 = vpack.c.bf16 %v322_v16, %v321_v12  ;;  %v347_v46 = vmax.f32 %v315_v41, 0.0  ;;  %v431_v48 = vld [vmem:[#allocation2 + $0x30] sm:$0xff]  ;;  %v491_v25 = vld [vmem:[#allocation2 + $0x2] sm:$0xff]  ;;  %v260_v30 = vmul.f32 %v3312_v17, %v223_v21 }
  0x28   : > { %2673 = vmatprep.subr.bf16.mxu1 %v3124_v51  ;;  %1476 = vmatprep.mubr.bf16.mxu0 %v3366_v57  ;;  %v348_v47 = vmax.f32 %v316_v42, 0.0  ;;  %v455_v50 = vld [vmem:[#allocation2 + $0x150] sm:$0xff]  ;;  %v261_v31 = vmul.f32 %v3312_v17, %v224_v23  ;;  %v3142_v34 = vld [vmem:[%s4291_s2 + $0x1c0] sm:$0xff]   ;;  %v226_v43 = vld [vmem:[%s3299_s13 + $0x68] sm:$0xff] }
  0x29   : > { %1572 = vmatprep.mubr.bf16.mxu1 %v834_v60  ;;  %2785 = vmatprep.subr.bf16.mxu0 %v3129_v58  ;;  %v456_v51 = vld [vmem:[#allocation2 + $0x158] sm:$0xff]  ;;  %423 = vst [vmem:[#allocation2 + $0x169] sm:$0xff] %v347_v46  ;;  %v219_v58 = vld [vmem:[%s3299_s13 + $0x30] sm:$0xff]  ;;  %v3500_v36 = vadd.f32 %v3317_v18, %v260_v30  ;;  %v225_v42 = vld [vmem:[%s3299_s13 + $0x60] sm:$0xff] }
  0x2a   : > { %424 = vst [vmem:[#allocation2 + $0x171] sm:$0xff] %v348_v47  ;;  %v3439_v54 = vpack.c.bf16 %v456_v51, %v455_v50  ;;  %v852_v56 = vpack.c.bf16 %v348_v47, %v347_v46  ;;  %v256_v60 = vmul.f32 %v3312_v17, %v219_v58  ;;  %v492_v26 = vld [vmem:[#allocation2 + $0xa] sm:$0xff]  ;;  %v298_v37 = vadd.f32 %v3317_v18, %v261_v31  ;;  %v493_v51 = vld [vmem:[#allocation2 + $0x1a] sm:$0xff] }
  0x2b   : > { %2674 = vmatpush3.bf16.msra.mxu1 %v3125_v1  ;;  %2786 = vmatpush3.bf16.msra.mxu0 %v3131_v5  ;;  %v294_v1 = vadd.f32 %v3317_v18, %v257_v61  ;;  %v329_v40 = vmax.f32 %v3500_v36, 0.0  ;;  %v718_v46 = vpack.c.bf16 %v492_v26, %v491_v25  ;;  %v263_v47 = vmul.f32 %v3312_v17, %v226_v43  ;;  %v3150_v59 = vld [vmem:[%s4291_s2 + $0x168] sm:$0xff]   ;;  %v228_v61 = vld [vmem:[%s3299_s13 + $0x78] sm:$0xff]  ;;  %v3153_v23 = vld [vmem:[%s4291_s2 + $0x190] sm:$0xff]  }
  0x2c   : > { %2675 = vmatprep.subr.bf16.mxu1 %v3126_v7  ;;  %2787 = vmatprep.subr.bf16.mxu0 %v3137_v38  ;;  %v293_v0 = vadd.f32 %v3317_v18, %v256_v60  ;;  %v3145_v7 = vld [vmem:[%s4291_s2 + $0x118] sm:$0xff]   ;;  %v330_v41 = vmax.f32 %v298_v37, 0.0  ;;  %v227_v60 = vld [vmem:[%s3299_s13 + $0x70] sm:$0xff] }
  0x2d   : > { %v433_v2 = vld [vmem:[#allocation2 + $0x48] sm:$0xff]  ;;  %v434_v4 = vld [vmem:[#allocation2 + $0x50] sm:$0xff]  ;;  %v326_v6 = vmax.f32 %v294_v1, 0.0  ;;  %405 = vst [vmem:[#allocation2 + $0x91] sm:$0xff] %v329_v40  ;;  %v3526_v58 = vadd.f32 %v3317_v18, %v263_v47  ;;  %v3156_v43 = vld [vmem:[%s4291_s2 + $0x1d8] sm:$0xff]  }
  0x2e   : > { %1477 = vmatmul.mubr.bf16.gmra.mrb[4].mxu0 %v3400_v22  ;;  %1573 = vmatmul.mubr.bf16.gmra.mrb[4].mxu1 %v3404_v27  ;;  %v432_v49 = vld [vmem:[#allocation2 + $0x38] sm:$0xff]  ;;  %v325_v5 = vmax.f32 %v293_v0, 0.0  ;;  %v3465_v8 = vpack.c.bf16 %v434_v4, %v433_v2  ;;  %406 = vst [vmem:[#allocation2 + $0x99] sm:$0xff] %v330_v41  ;;  %v3151_v1 = vld [vmem:[%s4291_s2 + $0x128] sm:$0xff]   ;;  %v264_v2 = vmul.f32 %v3312_v17, %v227_v60  ;;  %v3154_v26 = vld [vmem:[%s4291_s2 + $0x170] sm:$0xff]  }
  0x2f   : > { %2676 = vmatpush3.bf16.msra.mxu1 %v3127_v11  ;;  %1484 = vmatprep.mubr.bf16.mxu0 %v3406_v28  ;;  %v3437_v53 = vpack.c.bf16 %v432_v49, %v431_v48  ;;  %v221_v11 = vld [vmem:[%s3299_s13 + $0x40] sm:$0xff]  ;;  %402 = vst [vmem:[#allocation2 + $0x69] sm:$0xff] %v326_v6  ;;  %v332_v0 = vmax.f32 %v3526_v58, 0.0  ;;  %v3149_v4 = vld [vmem:[%s4291_s2 + $0x188] sm:$0xff]   ;;  %v3568_v21 = vpack.c.bf16 %v330_v41, %v329_v40  ;;  %v3155_v30 = vld [vmem:[%s4291_s2 + $0x130] sm:$0xff]  }
  0x30   : > { %2677 = vmatprep.subr.bf16.mxu1 %v3128_v15  ;;  %1580 = vmatprep.mubr.bf16.mxu1 %v843_v29  ;;  %v457_v9 = vld [vmem:[#allocation2 + $0x168] sm:$0xff]  ;;  %401 = vst [vmem:[#allocation2 + $0x61] sm:$0xff] %v325_v5  ;;  %v3473_v14 = vpack.c.bf16 %v326_v6, %v325_v5  ;;  %v258_v16 = vmul.f32 %v3312_v17, %v221_v11  ;;  %v3143_v49 = vld [vmem:[%s4291_s2 + $0x180] sm:$0xff]   ;;  %v231_v31 = vld [vmem:[%s3299_s13 + $0x90] sm:$0xff] }
  0x31   : > { %2788 = vmatpush3.bf16.msra.mxu0 %v3139_v44  ;;  %v458_v10 = vld [vmem:[#allocation2 + $0x170] sm:$0xff]  ;;  %v222_v15 = vld [vmem:[%s3299_s13 + $0x48] sm:$0xff]  ;;  %408 = vst [vmem:[#allocation2 + $0xb1] sm:$0xff] %v332_v0  ;;  %v3551_v6 = vadd.f32 %v3317_v18, %v264_v2  ;;  %v229_v11 = vld [vmem:[%s3299_s13 + $0x80] sm:$0xff]  ;;  %v268_v36 = vmul.f32 %v3312_v17, %v231_v31 }
  0x32   : > { %2789 = vmatprep.subr.bf16.mxu0 %v3144_v3  ;;  %v3468_v12 = vpack.c.bf16 %v458_v10, %v457_v9  ;;  %v259_v20 = vmul.f32 %v3312_v17, %v222_v15  ;;  %v295_v29 = vadd.f32 %v3317_v18, %v258_v16  ;;  %v265_v3 = vmul.f32 %v3312_v17, %v228_v61  ;;  %v3152_v9 = vld [vmem:[%s4291_s2 + $0x1d0] sm:$0xff]   ;;  %v3158_v47 = vld [vmem:[%s4291_s2 + $0x178] sm:$0xff]  }
  0x33   : > { %2678 = vmatpush3.bf16.msra.mxu1 %v3130_v33  ;;  %v3146_v33 = vld [vmem:[%s4291_s2 + $0x160] sm:$0xff]   ;;  %v333_v16 = vmax.f32 %v3551_v6, 0.0  ;;  %v3603_v41 = vadd.f32 %v3317_v18, %v268_v36  ;;  %v497_v61 = vld [vmem:[#allocation2 + $0x4a] sm:$0xff] }
  0x34   : > { %2679 = vmatprep.subr.bf16.mxu1 %v3132_v39  ;;  %v296_v32 = vadd.f32 %v3317_v18, %v259_v20  ;;  %v327_v35 = vmax.f32 %v295_v29, 0.0  ;;  %v3148_v39 = vld [vmem:[%s4291_s2 + $0x120] sm:$0xff]   ;;  %v266_v20 = vmul.f32 %v3312_v17, %v229_v11 }
  0x35   : > { %2790 = vmatpush3.bf16.msra.mxu0 %v3145_v7  ;;  %v3554_v7 = vadd.f32 %v3317_v18, %v265_v3  ;;  %409 = vst [vmem:[#allocation2 + $0xc1] sm:$0xff] %v333_v16  ;;  %v3658_v3 = vld [vmem:[%s4291_s2 + $0x200] sm:$0xff]  }
  0x36   : > { %1485 = vmatmul.mubr.bf16.gmra.mrb[8].mxu0 %v3437_v53  ;;  %1581 = vmatmul.mubr.bf16.gmra.mrb[8].mxu1 %v3439_v54  ;;  %v328_v38 = vmax.f32 %v296_v32, 0.0  ;;  %403 = vst [vmem:[#allocation2 + $0x79] sm:$0xff] %v327_v35  ;;  %v3579_v25 = vadd.f32 %v3317_v18, %v266_v20  ;;  %v232_v32 = vld [vmem:[%s3299_s13 + $0x98] sm:$0xff]  ;;  %v3163_v20 = vld [vmem:[%s4291_s2 + $0x1e8] sm:$0xff]  }
  0x37   : > { %2680 = vmatpush3.bf16.msra.mxu1 %v3133_v45  ;;  %1492 = vmatprep.mubr.bf16.mxu0 %v3435_v52  ;;  %v435_v44 = vld [vmem:[#allocation2 + $0x60] sm:$0xff]  ;;  %v436_v45 = vld [vmem:[#allocation2 + $0x68] sm:$0xff]  ;;  %v269_v37 = vmul.f32 %v3312_v17, %v232_v32  ;;  %v3168_v32 = vld [vmem:[%s4291_s2 + $0x1b0] sm:$0xff]  }
  0x38   : > { %2681 = vmatprep.subr.bf16.mxu1 %v3134_v55  ;;  %1588 = vmatprep.mubr.bf16.mxu1 %v852_v56  ;;  %404 = vst [vmem:[#allocation2 + $0x81] sm:$0xff] %v328_v38  ;;  %v3512_v48 = vpack.c.bf16 %v436_v45, %v435_v44  ;;  %v3517_v50 = vpack.c.bf16 %v328_v38, %v327_v35  ;;  %v3147_v55 = vld [vmem:[%s4291_s2 + $0x1c8] sm:$0xff]   ;;  %v335_v35 = vmax.f32 %v3579_v25, 0.0  ;;  %v439_v38 = vld [vmem:[#allocation2 + $0x90] sm:$0xff]  ;;  %v3169_v25 = vld [vmem:[%s4291_s2 + $0x1f8] sm:$0xff]  }
  0x39   : > { %2791 = vmatprep.subr.bf16.mxu0 %v3146_v33  ;;  %v495_v33 = vld [vmem:[#allocation2 + $0x32] sm:$0xff]  ;;  %v499_v6 = vld [vmem:[#allocation2 + $0x62] sm:$0xff] }
  0x3a   : > { %2792 = vmatpush3.bf16.msra.mxu0 %v3148_v39  ;;  %v440_v39 = vld [vmem:[#allocation2 + $0x98] sm:$0xff]  ;;  %411 = vst [vmem:[#allocation2 + $0xd9] sm:$0xff] %v335_v35 }
  0x3b   : > { %2682 = vmatpush3.bf16.msra.mxu1 %v3135_v62  ;;  %v494_v62 = vld [vmem:[#allocation2 + $0x22] sm:$0xff]  ;;  %2793 = vmatprep.subr.bf16.mxu0 %v3150_v59  ;;  %v3616_v44 = vpack.c.bf16 %v440_v39, %v439_v38  ;;  %v244_v38 = vld [vmem:[%s3299_s13 + $0xf8] sm:$0xff] }
  0x3c   : > { %2683 = vmatprep.subr.bf16.mxu1 %v3136_v63  ;;  %v234_v59 = vld [vmem:[%s3299_s13 + $0xa8] sm:$0xff] }
  0x3d   : > { %v437_v5 = vld [vmem:[#allocation2 + $0x78] sm:$0xff]  ;;  %v271_v58 = vmul.f32 %v3312_v17, %v234_v59 }
  0x3e   : > { %1493 = vmatmul.mubr.bf16.gmra.mrb[12].mxu0 %v3465_v8  ;;  %1589 = vmatmul.mubr.bf16.gmra.mrb[12].mxu1 %v3468_v12 }
  0x3f   : > { %2684 = vmatpush3.bf16.msra.mxu1 %v3138_v13  ;;  %1500 = vmatprep.mubr.bf16.mxu0 %v3473_v14  ;;  %v438_v10 = vld [vmem:[#allocation2 + $0x80] sm:$0xff]  ;;  %v230_v13 = vld [vmem:[%s3299_s13 + $0x88] sm:$0xff]  ;;  %v3653_v2 = vadd.f32 %v3317_v18, %v271_v58 }
  0x40   : > { %2685 = vmatprep.subr.bf16.mxu1 %v3140_v19  ;;  %1629 = vmatprep.mubr.bf16.mxu1 %v3400_v22  ;;  %v262_v22 = vmul.f32 %v3312_v17, %v225_v42  ;;  %v3563_v15 = vpack.c.bf16 %v438_v10, %v437_v5  ;;  %v334_v19 = vmax.f32 %v3554_v7, 0.0  ;;  %v3606_v42 = vadd.f32 %v3317_v18, %v269_v37  ;;  %v3165_v7 = vld [vmem:[%s4291_s2 + $0x1a8] sm:$0xff]   ;;  %v243_v37 = vld [vmem:[%s3299_s13 + $0xf0] sm:$0xff] }
  0x41   : > { %2794 = vmatpush3.bf16.msra.mxu0 %v3151_v1  ;;  %v340_v5 = vmax.f32 %v3653_v2, 0.0  ;;  %v502_v36 = vld [vmem:[#allocation2 + $0x82] sm:$0xff]  ;;  %v280_v39 = vmul.f32 %v3312_v17, %v243_v37 }
  0x42   : > { %v3523_v56 = vadd.f32 %v3317_v18, %v262_v22  ;;  %410 = vst [vmem:[#allocation2 + $0xc9] sm:$0xff] %v334_v19  ;;  %2795 = vmatprep.subr.bf16.mxu0 %v3154_v26  ;;  %v338_v22 = vmax.f32 %v3606_v42, 0.0  ;;  %v504_v42 = vld [vmem:[#allocation2 + $0x9a] sm:$0xff] }
  0x43   : > { %2686 = vmatpush3.bf16.msra.mxu1 %v3141_v24  ;;  %v267_v24 = vmul.f32 %v3312_v17, %v230_v13  ;;  %v3674_v13 = vpack.c.bf16 %v334_v19, %v333_v16  ;;  %416 = vst [vmem:[#allocation2 + $0x111] sm:$0xff] %v340_v5  ;;  %v443_v16 = vld [vmem:[#allocation2 + $0xc0] sm:$0xff] }
  0x44   : > { %2895 = vmatprep.subr.bf16.mxu1 %v3142_v34  ;;  %v331_v63 = vmax.f32 %v3523_v56, 0.0  ;;  %v496_v34 = vld [vmem:[#allocation2 + $0x3a] sm:$0xff]  ;;  %414 = vst [vmem:[#allocation2 + $0xf9] sm:$0xff] %v338_v22 }
  0x45   : > { %v3585_v29 = vadd.f32 %v3317_v18, %v267_v24  ;;  %2796 = vmatpush3.bf16.msra.mxu0 %v3155_v30  ;;  %v3618_v45 = vpack.c.bf16 %v496_v34, %v495_v33  ;;  %v3166_v24 = vld [vmem:[%s4291_s2 + $0x1f0] sm:$0xff]   ;;  %v445_v33 = vld [vmem:[#allocation2 + $0xd8] sm:$0xff] }
  0x46   : > { %1501 = vmatmul.mubr.bf16.gmra.mrb[16].mxu0 %v3512_v48  ;;  %1630 = vmatmul.mubr.bf16.vlgmr.msra.gmra.mrb[16].mxu1 %v718_v46  ;;  %407 = vst [vmem:[#allocation2 + $0xa9] sm:$0xff] %v331_v63  ;;  %v337_v46 = vmax.f32 %v3603_v41, 0.0  ;;  %v501_v34 = vld [vmem:[#allocation2 + $0x7a] sm:$0xff] }
  0x47   : > { %2896 = vmatpush3.bf16.msra.mxu1 %v3143_v49  ;;  %1508 = vmatprep.mubr.bf16.mxu0 %v3517_v50  ;;  %v336_v40 = vmax.f32 %v3585_v29, 0.0  ;;  %v3159_v49 = vld [vmem:[%s4291_s2 + $0x138] sm:$0xff]  }
  0x48   : > { %1637 = vmatprep.mubr.bf16.mxu1 %v3437_v53  ;;  %2897 = vmatprep.subr.bf16.mxu1 %v3147_v55  ;;  %v3559_v53 = vpack.c.bf16 %v494_v62, %v493_v51  ;;  %v3632_v51 = vpack.c.bf16 %v332_v0, %v331_v63  ;;  %413 = vst [vmem:[#allocation2 + $0xf1] sm:$0xff] %v337_v46  ;;  %v233_v55 = vld [vmem:[%s3299_s13 + $0xa0] sm:$0xff]  ;;  %v498_v62 = vld [vmem:[#allocation2 + $0x52] sm:$0xff] }
  0x49   : > { %412 = vst [vmem:[#allocation2 + $0xe1] sm:$0xff] %v336_v40  ;;  %2797 = vmatprep.subr.bf16.mxu0 %v3158_v47  ;;  %v270_v56 = vmul.f32 %v3312_v17, %v233_v55  ;;  %v3160_v63 = vld [vmem:[%s4291_s2 + $0x1e0] sm:$0xff]   ;;  %v3667_v11 = vpack.c.bf16 %v498_v62, %v497_v61  ;;  %v444_v19 = vld [vmem:[#allocation2 + $0xc8] sm:$0xff]  ;;  %v3701_v31 = vpack.c.bf16 %v336_v40, %v335_v35  ;;  %v3171_v35 = vld [vmem:[%s4291_s2 + $0x1b8] sm:$0xff]  }
  0x4a   : > { %2798 = vmatpush3.bf16.msra.mxu0 %v3159_v49  ;;  %v3693_v26 = vpack.c.bf16 %v444_v19, %v443_v16  ;;  %v3728_v47 = vpack.c.bf16 %v338_v22, %v337_v46  ;;  %v317_v49 = vadd.f32 %v3317_v18, %v280_v39  ;;  %v507_v2 = vld [vmem:[#allocation2 + $0xc2] sm:$0xff] }
  0x4b   : > { %2898 = vmatpush3.bf16.msra.mxu1 %v3149_v4  ;;  %v3650_v1 = vadd.f32 %v3317_v18, %v270_v56  ;;  %3031 = vmatprep.subr.bf16.mxu0 %v3658_v3  ;;  %v545_v19 = vld [vmem:[#allocation2 + $0x120] sm:$0xff] }
  0x4c   : > { %2899 = vmatprep.subr.bf16.mxu1 %v3152_v9  ;;  %v3162_v9 = vld [vmem:[%s4291_s2 + $0x1a0] sm:$0xff]   ;;  %v349_v59 = vmax.f32 %v317_v49, 0.0 }
  0x4d   : > { %v441_v60 = vld [vmem:[#allocation2 + $0xa8] sm:$0xff]  ;;  %v442_v0 = vld [vmem:[#allocation2 + $0xb0] sm:$0xff]  ;;  %v339_v4 = vmax.f32 %v3650_v1, 0.0  ;;  %v520_v49 = vld [vmem:[#allocation2 + $0x15a] sm:$0xff] }
  0x4e   : > { %1509 = vmatmul.mubr.bf16.gmra.mrb[20].mxu0 %v3563_v15  ;;  %1638 = vmatmul.mubr.bf16.gmra.mrb[20].mxu1 %v3559_v53  ;;  %v3665_v10 = vpack.c.bf16 %v442_v0, %v441_v60  ;;  %v503_v60 = vld [vmem:[#allocation2 + $0x92] sm:$0xff]  ;;  %425 = vst [vmem:[#allocation2 + $0x181] sm:$0xff] %v349_v59  ;;  %v505_v62 = vld [vmem:[#allocation2 + $0xaa] sm:$0xff]  ;;  %v518_v39 = vld [vmem:[#allocation2 + $0x142] sm:$0xff] }
  0x4f   : > { %1516 = vmatprep.mubr.bf16.mxu0 %v3568_v21  ;;  %1645 = vmatprep.mubr.bf16.mxu1 %v3465_v8  ;;  %v3157_v8 = vld [vmem:[%s4291_s2 + $0x198] sm:$0xff]   ;;  %415 = vst [vmem:[#allocation2 + $0x109] sm:$0xff] %v339_v4  ;;  %v3738_v22 = vpack.c.bf16 %v504_v42, %v503_v60 }
  0x50   : > { %2900 = vmatpush3.bf16.msra.mxu1 %v3153_v23  ;;  %v500_v23 = vld [vmem:[#allocation2 + $0x6a] sm:$0xff]  ;;  %v446_v29 = vld [vmem:[#allocation2 + $0xe0] sm:$0xff]  ;;  %v448_v41 = vld [vmem:[#allocation2 + $0xf8] sm:$0xff] }
  0x51   : > { %2901 = vmatprep.subr.bf16.mxu1 %v3156_v43  ;;  %v3695_v30 = vpack.c.bf16 %v500_v23, %v499_v6  ;;  %v3719_v40 = vpack.c.bf16 %v446_v29, %v445_v33  ;;  %v3721_v43 = vpack.c.bf16 %v502_v36, %v501_v34  ;;  %v509_v6 = vld [vmem:[#allocation2 + $0xda] sm:$0xff]  ;;  %v546_v23 = vld [vmem:[#allocation2 + $0x128] sm:$0xff]  ;;  %v514_v34 = vld [vmem:[#allocation2 + $0x112] sm:$0xff] }
  0x52   : > { %v3787_v33 = vpack.c.bf16 %v546_v23, %v545_v19  ;;  %v3174_v36 = vld [vmem:[%s4291_s2 + $0x230] sm:$0xff]   ;;  %v515_v29 = vld [vmem:[#allocation2 + $0x122] sm:$0xff] }
  0x53   : > { %v580_v19 = vld [vmem:[#allocation2 + $0x141] sm:$0xff] }
  0x54   : > { %2902 = vmatpush3.bf16.msra.mxu1 %v3157_v8  ;;  %v281_v8 = vmul.f32 %v3312_v17, %v244_v38  ;;  %v447_v17 = vld [vmem:[#allocation2 + $0xf0] sm:$0xff]  ;;  %v517_v38 = vld [vmem:[#allocation2 + $0x13a] sm:$0xff] }
  0x55   : > { %2903 = vmatprep.subr.bf16.mxu1 %v3160_v63  ;;  %v3736_v46 = vpack.c.bf16 %v448_v41, %v447_v17  ;;  %v506_v63 = vld [vmem:[#allocation2 + $0xb2] sm:$0xff] }
  0x56   : > { %1517 = vmatmul.mubr.bf16.gmra.mrb[24].mxu0 %v3616_v44  ;;  %1646 = vmatmul.mubr.bf16.gmra.mrb[24].mxu1 %v3618_v45  ;;  %v318_v55 = vadd.f32 %v3317_v18, %v281_v8  ;;  %v3744_v18 = vpack.c.bf16 %v340_v5, %v339_v4  ;;  %v449_v56 = vld [vmem:[#allocation2 + $0x108] sm:$0xff]  ;;  %v450_v58 = vld [vmem:[#allocation2 + $0x110] sm:$0xff]  ;;  %v653_v41 = vld [vmem:[#allocation2 + $0x39] sm:$0xff] }
  0x57   : > { %1524 = vmatprep.mubr.bf16.mxu0 %v3632_v51  ;;  %1653 = vmatprep.mubr.bf16.mxu1 %v3512_v48  ;;  %v3750_v0 = vpack.c.bf16 %v450_v58, %v449_v56  ;;  %v508_v4 = vld [vmem:[#allocation2 + $0xca] sm:$0xff]  ;;  %v519_v8 = vld [vmem:[#allocation2 + $0x152] sm:$0xff] }
  0x58   : > { %2904 = vmatpush3.bf16.msra.mxu1 %v3162_v9  ;;  %v350_v61 = vmax.f32 %v318_v55, 0.0  ;;  %v3752_v9 = vpack.c.bf16 %v506_v63, %v505_v62  ;;  %v3760_v5 = vpack.c.bf16 %v508_v4, %v507_v2  ;;  %v553_v55 = vld [vmem:[#allocation2 + $0x180] sm:$0xff]  ;;  %v3820_v60 = vpack.c.bf16 %v520_v49, %v519_v8  ;;  %v652_v17 = vld [vmem:[#allocation2 + $0x31] sm:$0xff]  ;;  %v654_v63 = vld [vmem:[#allocation2 + $0x49] sm:$0xff] }
  0x59   : > { %2905 = vmatprep.subr.bf16.mxu1 %v3163_v20  ;;  %v3164_v20 = vld [vmem:[%s4291_s2 + $0x208] sm:$0xff]   ;;  %v723_v62 = vpack.c.bf16 %v653_v41, %v652_v17  ;;  %v620_v56 = vld [vmem:[#allocation2 + $0x30] sm:$0xff]  ;;  %v621_v58 = vld [vmem:[#allocation2 + $0x38] sm:$0xff] }
  0x5a   : > { %426 = vst [vmem:[#allocation2 + $0x189] sm:$0xff] %v350_v61  ;;  %v3754_v1 = vpack.c.bf16 %v350_v61, %v349_v59  ;;  %v521_v61 = vld [vmem:[#allocation2 + $0x16a] sm:$0xff]  ;;  %v722_v4 = vpack.c.bf16 %v621_v58, %v620_v56 }
  0x5b   : > { %v655_v2 = vld [vmem:[#allocation2 + $0x51] sm:$0xff] }
  0x5c   : > { %2906 = vmatpush3.bf16.msra.mxu1 %v3165_v7  ;;  %v510_v7 = vld [vmem:[#allocation2 + $0xe2] sm:$0xff] }
  0x5d   : > { %2907 = vmatprep.subr.bf16.mxu1 %v3166_v24  ;;  %v3773_v16 = vpack.c.bf16 %v510_v7, %v509_v6  ;;  %v3172_v24 = vld [vmem:[%s4291_s2 + $0x220] sm:$0xff]   ;;  %v622_v6 = vld [vmem:[#allocation2 + $0x48] sm:$0xff]  ;;  %v623_v7 = vld [vmem:[#allocation2 + $0x50] sm:$0xff] }
  0x5e   : > { %1525 = vmatmul.mubr.bf16.gmra.mrb[28].mxu0 %v3665_v10  ;;  %1654 = vmatmul.mubr.bf16.gmra.mrb[28].mxu1 %v3667_v11 }
  0x5f   : > { %1532 = vmatprep.mubr.bf16.mxu0 %v3674_v13  ;;  %1661 = vmatprep.mubr.bf16.mxu1 %v3563_v15 }
  0x60   : > { %2908 = vmatpush3.bf16.msra.mxu1 %v3168_v32 }
  0x61   : > { %2909 = vmatprep.subr.bf16.mxu1 %v3169_v25  ;;  %v554_v59 = vld [vmem:[#allocation2 + $0x188] sm:$0xff] }
  0x64   : > { %2910 = vmatpush3.bf16.msra.mxu1 %v3171_v35  ;;  %v516_v35 = vld [vmem:[#allocation2 + $0x12a] sm:$0xff] }
  0x65   : > { %v3808_v37 = vpack.c.bf16 %v516_v35, %v515_v29 }
  0x66   : > { %1533 = vmatmul.mubr.bf16.gmra.mrb[32].mxu0 %v3693_v26  ;;  %1662 = vmatmul.mubr.bf16.gmra.mrb[32].mxu1 %v3695_v30 }
  0x67   : > { %1540 = vmatprep.mubr.bf16.mxu0 %v3701_v31  ;;  %1669 = vmatprep.mubr.bf16.mxu1 %v3616_v44 }
  0x6e   : > { %1541 = vmatmul.mubr.bf16.gmra.mrb[36].mxu0 %v3719_v40  ;;  %1670 = vmatmul.mubr.bf16.gmra.mrb[36].mxu1 %v3721_v43 }
  0x6f   : > { %1548 = vmatprep.mubr.bf16.mxu0 %v3728_v47  ;;  %1677 = vmatprep.mubr.bf16.mxu1 %v3665_v10 }
  0x76   : > { %1549 = vmatmul.mubr.bf16.gmra.mrb[40].mxu0 %v3736_v46  ;;  %1678 = vmatmul.mubr.bf16.gmra.mrb[40].mxu1 %v3738_v22 }
  0x77   : > { %1556 = vmatprep.mubr.bf16.mxu0 %v3744_v18  ;;  %1685 = vmatprep.mubr.bf16.mxu1 %v3693_v26 }
  0x7e   : > { %1557 = vmatmul.mubr.bf16.gmra.mrb[44].mxu0 %v3750_v0  ;;  %1686 = vmatmul.mubr.bf16.gmra.mrb[44].mxu1 %v3752_v9 }
  0x7f   : > { %1693 = vmatprep.mubr.bf16.mxu1 %v3719_v40  ;;  %1790 = vmatprep.mubr.bf16.mxu0 %v3559_v53  ;;  %v3167_v53 = vld [vmem:[%s4291_s2 + $0x210] sm:$0xff]  }
  0x86   : > { %1694 = vmatmul.mubr.bf16.gmra.mrb[48].mxu1 %v3760_v5  ;;  %1791 = vmatmul.mubr.bf16.vlgmr.msra.gmra.mrb[48].mxu0 %v3366_v57  ;;  %v3170_v57 = vld [vmem:[%s4291_s2 + $0x218] sm:$0xff]  }
  0x87   : > { %3032 = vmatpush3.bf16.msra.mxu0 %v3658_v3  ;;  %1701 = vmatprep.mubr.bf16.mxu1 %v3736_v46  ;;  %v512_v3 = vld [vmem:[#allocation2 + $0xfa] sm:$0xff] }
  0x88   : > { %1798 = vmatprep.mubr.bf16.mxu0 %v3618_v45  ;;  %3033 = vmatprep.subr.bf16.mxu0 %v3164_v20  ;;  %v511_v45 = vld [vmem:[#allocation2 + $0xf2] sm:$0xff] }
  0x89   : > { %v3785_v32 = vpack.c.bf16 %v512_v3, %v511_v45  ;;  %v578_v45 = vld [vmem:[#allocation2 + $0x129] sm:$0xff] }
  0x8b   : > { %3034 = vmatpush3.bf16.msra.mxu0 %v3164_v20  ;;  %v732_v20 = vpack.c.bf16 %v655_v2, %v654_v63 }
  0x8c   : > { %3035 = vmatprep.subr.bf16.mxu0 %v3167_v53 }
  0x8e   : > { %1702 = vmatmul.mubr.bf16.gmra.mrb[52].mxu1 %v3773_v16  ;;  %1799 = vmatmul.mubr.bf16.gmra.mrb[52].mxu0 %v3406_v28  ;;  %v3173_v28 = vld [vmem:[%s4291_s2 + $0x228] sm:$0xff]  }
  0x8f   : > { %1709 = vmatprep.mubr.bf16.mxu1 %v3750_v0  ;;  %1806 = vmatprep.mubr.bf16.mxu0 %v3667_v11  ;;  %v513_v11 = vld [vmem:[#allocation2 + $0x10a] sm:$0xff] }
  0x90   : > { %3036 = vmatpush3.bf16.msra.mxu0 %v3167_v53  ;;  %v3799_v25 = vpack.c.bf16 %v514_v34, %v513_v11  ;;  %v731_v53 = vpack.c.bf16 %v623_v7, %v622_v6 }
  0x91   : > { %3037 = vmatprep.subr.bf16.mxu0 %v3170_v57 }
  0x94   : > { %3038 = vmatpush3.bf16.msra.mxu0 %v3170_v57  ;;  %v577_v57 = vld [vmem:[#allocation2 + $0x121] sm:$0xff] }
  0x95   : > { %3039 = vmatprep.subr.bf16.mxu0 %v3172_v24  ;;  %v3842_v3 = vpack.c.bf16 %v578_v45, %v577_v57 }
  0x96   : > { %1710 = vmatmul.mubr.bf16.gmra.mrb[56].mxu1 %v3785_v32  ;;  %1807 = vmatmul.mubr.bf16.gmra.mrb[56].mxu0 %v3435_v52  ;;  %v3175_v52 = vld [vmem:[%s4291_s2 + $0x238] sm:$0xff]  }
  0x97   : > { %1717 = vmatprep.mubr.bf16.mxu1 %v3787_v33  ;;  %1814 = vmatprep.mubr.bf16.mxu0 %v3695_v30 }
  0x98   : > { %3040 = vmatpush3.bf16.msra.mxu0 %v3172_v24 }
  0x99   : > { %3041 = vmatprep.subr.bf16.mxu0 %v3173_v28 }
  0x9c   : > { %3042 = vmatpush3.bf16.msra.mxu0 %v3173_v28  ;;  %v617_v28 = vld [vmem:[#allocation2 + $0x182] sm:$0xff] }
  0x9d   : > { %3043 = vmatprep.subr.bf16.mxu0 %v3174_v36 }
  0x9e   : > { %1718 = vmatmul.mubr.bf16.gmra.mrb[60].mxu1 %v3799_v25  ;;  %1815 = vmatmul.mubr.bf16.gmra.mrb[60].mxu0 %v3473_v14 }
  0x9f   : > { %1725 = vmatprep.mubr.bf16.mxu1 %v3404_v27  ;;  %1822 = vmatprep.mubr.bf16.mxu0 %v3721_v43  ;;  %v3814_v27 = vpack.c.bf16 %v518_v39, %v517_v38 }
  0xa0   : > { %3044 = vmatpush3.bf16.msra.mxu0 %v3174_v36 }
  0xa1   : > { %3045 = vmatprep.subr.bf16.mxu0 %v3175_v52 }
  0xa4   : > { %3046 = vmatpush3.bf16.msra.mxu0 %v3175_v52 }
  0xa6   : > { %1726 = vmatmul.mubr.bf16.gmra.mrb[64].mxu1 %v3808_v37  ;;  %1823 = vmatmul.mubr.bf16.gmra.mrb[64].mxu0 %v3517_v50 }
  0xa7   : > { %1733 = vmatprep.mubr.bf16.mxu1 %v3439_v54  ;;  %1830 = vmatprep.mubr.bf16.mxu0 %v3738_v22  ;;  %v3822_v54 = vpack.c.bf16 %v554_v59, %v553_v55 }
  0xae   : > { %1734 = vmatmul.mubr.bf16.gmra.mrb[68].mxu1 %v3814_v27  ;;  %1831 = vmatmul.mubr.bf16.gmra.mrb[68].mxu0 %v3568_v21 }
  0xaf   : > { %1741 = vmatprep.mubr.bf16.mxu1 %v3468_v12  ;;  %1838 = vmatprep.mubr.bf16.mxu0 %v3752_v9  ;;  %v522_v12 = vld [vmem:[#allocation2 + $0x172] sm:$0xff] }
  0xb0   : > { %v3828_v42 = vpack.c.bf16 %v522_v12, %v521_v61  ;;  %v687_v12 = vld [vmem:[#allocation2 + $0x52] sm:$0xff] }
  0xb6   : > { %1742 = vmatmul.mubr.bf16.gmra.mrb[72].mxu1 %v3820_v60  ;;  %1839 = vmatmul.mubr.bf16.gmra.mrb[72].mxu0 %v3632_v51 }
  0xb7   : > { %1749 = vmatprep.mubr.bf16.mxu1 %v3822_v54  ;;  %1846 = vmatprep.mubr.bf16.mxu0 %v3760_v5 }
  0xbe   : > { %1750 = vmatmul.mubr.bf16.gmra.mrb[76].mxu1 %v3828_v42  ;;  %1847 = vmatmul.mubr.bf16.gmra.mrb[76].mxu0 %v3674_v13 }
  0xbf   : > { %1854 = vmatprep.mubr.bf16.mxu0 %v3773_v16  ;;  %1951 = vmatprep.mubr.bf16.mxu1 %v723_v62 }
  0xc6   : > { %1855 = vmatmul.mubr.bf16.gmra.mrb[80].mxu0 %v3701_v31  ;;  %1952 = vmatmul.mubr.bf16.vlgmr.msra.gmra.mrb[80].mxu1 %v722_v4 }
  0xc7   : > { %1862 = vmatprep.mubr.bf16.mxu0 %v3785_v32  ;;  %1959 = vmatprep.mubr.bf16.mxu1 %v732_v20 }
  0xce   : > { %1863 = vmatmul.mubr.bf16.gmra.mrb[84].mxu0 %v3728_v47  ;;  %1960 = vmatmul.mubr.bf16.gmra.mrb[84].mxu1 %v731_v53 }
  0xcf   : > { %1870 = vmatprep.mubr.bf16.mxu0 %v3799_v25  ;;  %1967 = vmatprep.mubr.bf16.mxu1 %v3473_v14  ;;  %v579_v14 = vld [vmem:[#allocation2 + $0x139] sm:$0xff] }
  0xd0   : > { %v3848_v23 = vpack.c.bf16 %v580_v19, %v579_v14 }
  0xd6   : > { %1871 = vmatmul.mubr.bf16.gmra.mrb[88].mxu0 %v3744_v18  ;;  %1968 = vmatmul.mubr.bf16.gmra.mrb[88].mxu1 %v3512_v48  ;;  %v581_v48 = vld [vmem:[#allocation2 + $0x151] sm:$0xff] }
  0xd7   : > { %1878 = vmatprep.mubr.bf16.mxu0 %v3808_v37  ;;  %1975 = vmatprep.mubr.bf16.mxu1 %v3517_v50  ;;  %v582_v50 = vld [vmem:[#allocation2 + $0x159] sm:$0xff] }
  0xd8   : > { %v3854_v24 = vpack.c.bf16 %v582_v50, %v581_v48 }
  0xde   : > { %1879 = vmatmul.mubr.bf16.gmra.mrb[92].mxu0 %v3842_v3  ;;  %1976 = vmatmul.mubr.bf16.gmra.mrb[92].mxu1 %v3563_v15  ;;  %v583_v15 = vld [vmem:[#allocation2 + $0x169] sm:$0xff] }
  0xdf   : > { %1886 = vmatprep.mubr.bf16.mxu0 %v3814_v27  ;;  %1983 = vmatprep.mubr.bf16.mxu1 %v3568_v21  ;;  %v584_v21 = vld [vmem:[#allocation2 + $0x171] sm:$0xff] }
  0xe0   : > { %v3860_v11 = vpack.c.bf16 %v584_v21, %v583_v15 }
  0xe6   : > { %1887 = vmatmul.mubr.bf16.gmra.mrb[96].mxu0 %v3848_v23  ;;  %1984 = vmatmul.mubr.bf16.gmra.mrb[96].mxu1 %v3616_v44  ;;  %v618_v44 = vld [vmem:[#allocation2 + $0x18a] sm:$0xff] }
  0xe7   : > { %1894 = vmatprep.mubr.bf16.mxu0 %v3820_v60  ;;  %1991 = vmatprep.mubr.bf16.mxu1 %v3632_v51  ;;  %v3862_v34 = vpack.c.bf16 %v618_v44, %v617_v28  ;;  %v684_v51 = vld [vmem:[#allocation2 + $0x32] sm:$0xff] }
  0xee   : > { %1895 = vmatmul.mubr.bf16.gmra.mrb[100].mxu0 %v3854_v24  ;;  %1992 = vmatmul.mubr.bf16.gmra.mrb[100].mxu1 %v3665_v10  ;;  %v685_v10 = vld [vmem:[#allocation2 + $0x3a] sm:$0xff] }
  0xef   : > { %1902 = vmatprep.mubr.bf16.mxu0 %v3828_v42  ;;  %1999 = vmatprep.mubr.bf16.mxu1 %v3674_v13  ;;  %v724_v49 = vpack.c.bf16 %v685_v10, %v684_v51 }
  0xf6   : > { %1903 = vmatmul.mubr.bf16.gmra.mrb[104].mxu0 %v3860_v11  ;;  %2000 = vmatmul.mubr.bf16.gmra.mrb[104].mxu1 %v3693_v26 }
  0xf7   : > { %1910 = vmatprep.mubr.bf16.mxu0 %v3862_v34  ;;  %2007 = vmatprep.mubr.bf16.mxu1 %v3701_v31  ;;  %v686_v31 = vld [vmem:[#allocation2 + $0x4a] sm:$0xff] }
  0xf8   : > { %v733_v58 = vpack.c.bf16 %v687_v12, %v686_v31 }
  0xf9   : > { %v2575_v36 = vpop.f32.mrb[0].mxu0  ;;  %v2647_v13 = vpop.f32.mrb[0].mxu1 }
  0xfa   : > { %v2576_v52 = vpop.f32.mrb[1].mxu0  ;;  %v2648_v29 = vpop.f32.mrb[1].mxu1 }
  0xfb   : > { %v3868_v35 = vadd.f32 %v2576_v52, %v2575_v36  ;;  %v3870_v38 = vadd.f32 %v2648_v29, %v2647_v13  ;;  %v2578_v39 = vpop.f32.mrb[2].mxu0  ;;  %v2650_v8 = vpop.f32.mrb[2].mxu1 }
  0xfc   : > { %v2579_v55 = vpop.f32.mrb[3].mxu0  ;;  %v2651_v59 = vpop.f32.mrb[3].mxu1 }
  0xfd   : > { %v3872_v26 = vadd.f32 %v2579_v55, %v2578_v39  ;;  %v3874_v61 = vadd.f32 %v2651_v59, %v2650_v8 }
  0xfe   : > { %1911 = vmatmul.mubr.bf16.gmra.mrb[108].mxu0 %v3754_v1  ;;  %2008 = vmatmul.mubr.bf16.gmra.mrb[108].mxu1 %v3719_v40 }
  0xff   : > { %2015 = vmatprep.mubr.bf16.mxu1 %v3728_v47  ;;  %3047 = vmatprep.mubr.bf16.mxu0 %v724_v49 }
 0x101   : > { %v2581_v17 = vpop.f32.mrb[4].mxu0  ;;  %v2653_v41 = vpop.f32.mrb[4].mxu1 }
 0x102   : > { %v2582_v62 = vpop.f32.mrb[5].mxu0  ;;  %v2654_v56 = vpop.f32.mrb[5].mxu1 }
 0x103   : > { %v3879_v63 = vadd.f32 %v2582_v62, %v2581_v17  ;;  %v3881_v2 = vadd.f32 %v2654_v56, %v2653_v41  ;;  %v2584_v4 = vpop.f32.mrb[6].mxu0  ;;  %v2656_v20 = vpop.f32.mrb[6].mxu1 }
 0x104   : > { %v2585_v6 = vpop.f32.mrb[7].mxu0  ;;  %v2657_v7 = vpop.f32.mrb[7].mxu1 }
 0x105   : > { %v3883_v53 = vadd.f32 %v2585_v6, %v2584_v4  ;;  %v3885_v40 = vadd.f32 %v2657_v7, %v2656_v20  ;;  %v644_v20 = vld [vmem:[#allocation2 + $0x150] sm:$0xff]  ;;  %v645_v6 = vld [vmem:[#allocation2 + $0x158] sm:$0xff] }
 0x106   : > { %2016 = vmatmul.mubr.bf16.gmra.mrb[112].mxu1 %v3736_v46  ;;  %3048 = vmatmul.mubr.bf16.vlgmr.msra.gmra.mrb[112].mxu0 %v733_v58 }
 0x107   : > { %2023 = vmatprep.mubr.bf16.mxu1 %v3744_v18  ;;  %3051 = vmatprep.mubr.bf16.mxu0 %v3695_v30 }
 0x109   : > { %v2587_v47 = vpop.f32.mrb[8].mxu0  ;;  %v2659_v57 = vpop.f32.mrb[8].mxu1 }
 0x10a   : > { %v2588_v45 = vpop.f32.mrb[9].mxu0  ;;  %v2660_v14 = vpop.f32.mrb[9].mxu1 }
 0x10b   : > { %v3890_v19 = vadd.f32 %v2588_v45, %v2587_v47  ;;  %v3892_v48 = vadd.f32 %v2660_v14, %v2659_v57  ;;  %v2590_v50 = vpop.f32.mrb[10].mxu0  ;;  %v2662_v15 = vpop.f32.mrb[10].mxu1  ;;  %v830_v45 = vpack.c.bf16 %v645_v6, %v644_v20 }
 0x10c   : > { %v2591_v21 = vpop.f32.mrb[11].mxu0  ;;  %v2663_v28 = vpop.f32.mrb[11].mxu1 }
 0x10d   : > { %v3894_v44 = vadd.f32 %v2591_v21, %v2590_v50  ;;  %v3896_v46 = vadd.f32 %v2663_v28, %v2662_v15 }
 0x10e   : > { %2024 = vmatmul.mubr.bf16.gmra.mrb[116].mxu1 %v3750_v0  ;;  %3052 = vmatmul.mubr.bf16.gmra.mrb[116].mxu0 %v3721_v43  ;;  %v642_v43 = vld [vmem:[#allocation2 + $0x138] sm:$0xff] }
 0x10f   : > { %2031 = vmatprep.mubr.bf16.mxu1 %v3842_v3  ;;  %3055 = vmatprep.mubr.bf16.mxu0 %v3738_v22  ;;  %v643_v22 = vld [vmem:[#allocation2 + $0x140] sm:$0xff] }
 0x110   : > { %v821_v12 = vpack.c.bf16 %v643_v22, %v642_v43 }
 0x111   : > { %v2593_v30 = vpop.f32.mrb[12].mxu0  ;;  %v2665_v18 = vpop.f32.mrb[12].mxu1 }
 0x112   : > { %v2594_v51 = vpop.f32.mrb[13].mxu0  ;;  %v2666_v10 = vpop.f32.mrb[13].mxu1 }
 0x113   : > { %v3902_v36 = vadd.f32 %v2594_v51, %v2593_v30  ;;  %v3904_v13 = vadd.f32 %v2666_v10, %v2665_v18  ;;  %v2596_v52 = vpop.f32.mrb[14].mxu0  ;;  %v2668_v29 = vpop.f32.mrb[14].mxu1  ;;  %v646_v18 = vld [vmem:[#allocation2 + $0x168] sm:$0xff]  ;;  %v647_v51 = vld [vmem:[#allocation2 + $0x170] sm:$0xff] }
 0x114   : > { %v2597_v39 = vpop.f32.mrb[15].mxu0  ;;  %v2669_v8 = vpop.f32.mrb[15].mxu1 }
 0x115   : > { %v3906_v49 = vadd.f32 %v2597_v39, %v2596_v52  ;;  %v3908_v0 = vadd.f32 %v2669_v8, %v2668_v29  ;;  %v839_v39 = vpack.c.bf16 %v647_v51, %v646_v18 }
 0x116   : > { %2032 = vmatmul.mubr.bf16.gmra.mrb[120].mxu1 %v3787_v33  ;;  %3056 = vmatmul.mubr.bf16.gmra.mrb[120].mxu0 %v3752_v9 }
 0x117   : > { %2039 = vmatprep.mubr.bf16.mxu1 %v3848_v23  ;;  %3059 = vmatprep.mubr.bf16.mxu0 %v3760_v5 }
 0x119   : > { %v2599_v3 = vpop.f32.mrb[16].mxu0  ;;  %v2687_v55 = vpop.f32.mrb[16].mxu1 }
 0x11a   : > { %v2600_v59 = vpop.f32.mrb[17].mxu0  ;;  %v2688_v31 = vpop.f32.mrb[17].mxu1 }
 0x11b   : > { %v3914_v17 = vadd.f32 %v2600_v59, %v2599_v3  ;;  %v2689_v41 = vadd.f32 %v2688_v31, %v2687_v55  ;;  %v2602_v62 = vpop.f32.mrb[18].mxu0  ;;  %v2690_v56 = vpop.f32.mrb[18].mxu1  ;;  %v682_v31 = vld [vmem:[#allocation2 + $0x199] sm:$0xff] }
 0x11c   : > { %v2603_v58 = vpop.f32.mrb[19].mxu0  ;;  %v2691_v33 = vpop.f32.mrb[19].mxu1 }
 0x11d   : > { %v3917_v9 = vadd.f32 %v2689_v41, %v3868_v35  ;;  %v3919_v23 = vadd.f32 %v2603_v58, %v2602_v62  ;;  %v2692_v5 = vadd.f32 %v2691_v33, %v2690_v56 }
 0x11e   : > { %2040 = vmatmul.mubr.bf16.gmra.mrb[124].mxu1 %v821_v12  ;;  %3060 = vmatmul.mubr.bf16.gmra.mrb[124].mxu0 %v3773_v16  ;;  %v683_v12 = vld [vmem:[#allocation2 + $0x1a1] sm:$0xff] }
 0x11f   : > { %v3923_v4 = vadd.f32 %v2692_v5, %v3872_v26  ;;  %2047 = vmatprep.mubr.bf16.mxu1 %v3854_v24  ;;  %3063 = vmatprep.mubr.bf16.mxu0 %v3785_v32  ;;  %v858_v6 = vpack.c.bf16 %v683_v12, %v682_v31 }
 0x121   : > { %v2605_v7 = vpop.f32.mrb[20].mxu0  ;;  %v2693_v47 = vpop.f32.mrb[20].mxu1 }
 0x122   : > { %v2606_v57 = vpop.f32.mrb[21].mxu0  ;;  %v2694_v35 = vpop.f32.mrb[21].mxu1 }
 0x123   : > { %v3927_v14 = vadd.f32 %v2606_v57, %v2605_v7  ;;  %v2695_v50 = vadd.f32 %v2694_v35, %v2693_v47  ;;  %v2608_v15 = vpop.f32.mrb[22].mxu0  ;;  %v2696_v21 = vpop.f32.mrb[22].mxu1  ;;  %v650_v57 = vld [vmem:[#allocation2 + $0x198] sm:$0xff] }
 0x124   : > { %v2609_v16 = vpop.f32.mrb[23].mxu0  ;;  %v2697_v28 = vpop.f32.mrb[23].mxu1  ;;  %v714_v35 = vld [vmem:[#allocation2 + $0x19a] sm:$0xff] }
 0x125   : > { %v3930_v26 = vadd.f32 %v2695_v50, %v3879_v63  ;;  %v3932_v24 = vadd.f32 %v2609_v16, %v2608_v15  ;;  %v2698_v32 = vadd.f32 %v2697_v28, %v2696_v21  ;;  %v3176_v16 = vld [vmem:[#allocation2 + $0x8] sm:$0xff] }
 0x126   : > { %2048 = vmatmul.mubr.bf16.gmra.mrb[128].mxu1 %v830_v45  ;;  %3064 = vmatmul.mubr.bf16.gmra.mrb[128].mxu0 %v3799_v25  ;;  %v715_v45 = vld [vmem:[#allocation2 + $0x1a2] sm:$0xff]  ;;  %v857_v28 = vpack.c.bf16 %v3176_v16, %v650_v57 }
 0x127   : > { %v3936_v30 = vadd.f32 %v2698_v32, %v3883_v53  ;;  %2055 = vmatprep.mubr.bf16.mxu1 %v3860_v11  ;;  %3067 = vmatprep.mubr.bf16.mxu0 %v3808_v37  ;;  %v859_v32 = vpack.c.bf16 %v715_v45, %v714_v35 }
 0x129   : > { %v2611_v10 = vpop.f32.mrb[24].mxu0  ;;  %v2699_v52 = vpop.f32.mrb[24].mxu1 }
 0x12a   : > { %v2612_v29 = vpop.f32.mrb[25].mxu0  ;;  %v2700_v63 = vpop.f32.mrb[25].mxu1 }
 0x12b   : > { %v3940_v8 = vadd.f32 %v2612_v29, %v2611_v10  ;;  %v2701_v43 = vadd.f32 %v2700_v63, %v2699_v52  ;;  %v2614_v22 = vpop.f32.mrb[26].mxu0  ;;  %v2702_v3 = vpop.f32.mrb[26].mxu1 }
 0x12c   : > { %v2615_v25 = vpop.f32.mrb[27].mxu0  ;;  %v2703_v55 = vpop.f32.mrb[27].mxu1 }
 0x12d   : > { %v3943_v53 = vadd.f32 %v2701_v43, %v3890_v19  ;;  %v3945_v11 = vadd.f32 %v2615_v25, %v2614_v22  ;;  %v2704_v37 = vadd.f32 %v2703_v55, %v2702_v3 }
 0x12e   : > { %2056 = vmatmul.mubr.bf16.gmra.mrb[132].mxu1 %v839_v39  ;;  %3068 = vmatmul.mubr.bf16.gmra.mrb[132].mxu0 %v3814_v27 }
 0x12f   : > { %v3949_v59 = vadd.f32 %v2704_v37, %v3894_v44  ;;  %2063 = vmatprep.mubr.bf16.mxu1 %v3754_v1  ;;  %3071 = vmatprep.mubr.bf16.mxu0 %v3820_v60 }
 0x131   : > { %v2617_v41 = vpop.f32.mrb[28].mxu0  ;;  %v2705_v62 = vpop.f32.mrb[28].mxu1 }
 0x132   : > { %v2618_v56 = vpop.f32.mrb[29].mxu0  ;;  %v2706_v19 = vpop.f32.mrb[29].mxu1 }
 0x133   : > { %v3953_v58 = vadd.f32 %v2618_v56, %v2617_v41  ;;  %v2707_v33 = vadd.f32 %v2706_v19, %v2705_v62  ;;  %v2620_v5 = vpop.f32.mrb[30].mxu0  ;;  %v2708_v20 = vpop.f32.mrb[30].mxu1 }
 0x134   : > { %v2621_v27 = vpop.f32.mrb[31].mxu0  ;;  %v2709_v7 = vpop.f32.mrb[31].mxu1 }
 0x135   : > { %v3956_v44 = vadd.f32 %v2707_v33, %v3902_v36  ;;  %v3958_v1 = vadd.f32 %v2621_v27, %v2620_v5  ;;  %v2710_v60 = vadd.f32 %v2709_v7, %v2708_v20 }
 0x136   : > { %2064 = vmatmul.mubr.bf16.gmra.mrb[136].mxu1 %v3822_v54  ;;  %3072 = vmatmul.mubr.bf16.gmra.mrb[136].mxu0 %v3828_v42 }
 0x137   : > { %v3963_v47 = vadd.f32 %v2710_v60, %v3906_v49  ;;  %2071 = vmatprep.mubr.bf16.mxu1 %v858_v6  ;;  %3075 = vmatprep.mubr.bf16.mxu0 %v3862_v34 }
 0x139   : > { %v2623_v50 = vpop.f32.mrb[32].mxu0  ;;  %v2711_v15 = vpop.f32.mrb[32].mxu1 }
 0x13a   : > { %v2624_v36 = vpop.f32.mrb[33].mxu0  ;;  %v2712_v21 = vpop.f32.mrb[33].mxu1 }
 0x13b   : > { %v3966_v18 = vadd.f32 %v2624_v36, %v2623_v50  ;;  %v2713_v54 = vadd.f32 %v2712_v21, %v2711_v15  ;;  %v2626_v42 = vpop.f32.mrb[34].mxu0  ;;  %v2714_v51 = vpop.f32.mrb[34].mxu1 }
 0x13c   : > { %v2627_v49 = vpop.f32.mrb[35].mxu0  ;;  %v2715_v10 = vpop.f32.mrb[35].mxu1 }
 0x13d   : > { %v3969_v52 = vadd.f32 %v2713_v54, %v3914_v17  ;;  %v2628_v34 = vadd.f32 %v2627_v49, %v2626_v42  ;;  %v2716_v29 = vadd.f32 %v2715_v10, %v2714_v51 }
 0x13e   : > { %2072 = vmatmul.mubr.bf16.gmra.mrb[140].mxu1 %v857_v28  ;;  %3076 = vmatmul.mubr.bf16.gmra.mrb[140].mxu0 %v859_v32 }
 0x13f   : > { %v3972_v63 = vadd.f32 %v2716_v29, %v3919_v23 }
 0x141   : > { %v2629_v39 = vpop.f32.mrb[36].mxu0  ;;  %v2717_v43 = vpop.f32.mrb[36].mxu1 }
 0x142   : > { %v2630_v22 = vpop.f32.mrb[37].mxu0  ;;  %v2718_v3 = vpop.f32.mrb[37].mxu1 }
 0x143   : > { %v3974_v25 = vadd.f32 %v2630_v22, %v2629_v39  ;;  %v2719_v55 = vadd.f32 %v2718_v3, %v2717_v43  ;;  %v2632_v37 = vpop.f32.mrb[38].mxu0  ;;  %v2720_v31 = vpop.f32.mrb[38].mxu1 }
 0x144   : > { %v2633_v12 = vpop.f32.mrb[39].mxu0  ;;  %v2721_v41 = vpop.f32.mrb[39].mxu1 }
 0x145   : > { %v3977_v17 = vadd.f32 %v2719_v55, %v3927_v14  ;;  %v2634_v62 = vadd.f32 %v2633_v12, %v2632_v37  ;;  %v2722_v56 = vadd.f32 %v2721_v41, %v2720_v31 }
 0x147   : > { %v3980_v19 = vadd.f32 %v2722_v56, %v3932_v24 }
 0x149   : > { %v2635_v23 = vpop.f32.mrb[40].mxu0  ;;  %v2723_v33 = vpop.f32.mrb[40].mxu1 }
 0x14a   : > { %v2636_v5 = vpop.f32.mrb[41].mxu0  ;;  %v2724_v20 = vpop.f32.mrb[41].mxu1 }
 0x14b   : > { %v3982_v6 = vadd.f32 %v2636_v5, %v2635_v23  ;;  %v2725_v27 = vadd.f32 %v2724_v20, %v2723_v33  ;;  %v2638_v7 = vpop.f32.mrb[42].mxu0  ;;  %v2726_v60 = vpop.f32.mrb[42].mxu1 }
 0x14c   : > { %v2639_v57 = vpop.f32.mrb[43].mxu0  ;;  %v2727_v35 = vpop.f32.mrb[43].mxu1 }
 0x14d   : > { %v3985_v45 = vadd.f32 %v2725_v27, %v3940_v8  ;;  %v3987_v14 = vadd.f32 %v2639_v57, %v2638_v7  ;;  %v2728_v50 = vadd.f32 %v2727_v35, %v2726_v60 }
 0x14f   : > { %v3990_v24 = vadd.f32 %v2728_v50, %v3945_v11 }
 0x151   : > { %v2641_v15 = vpop.f32.mrb[44].mxu0  ;;  %v2729_v36 = vpop.f32.mrb[44].mxu1 }
 0x152   : > { %v2642_v21 = vpop.f32.mrb[45].mxu0  ;;  %v2730_v16 = vpop.f32.mrb[45].mxu1 }
 0x153   : > { %v3992_v28 = vadd.f32 %v2642_v21, %v2641_v15  ;;  %v2731_v32 = vadd.f32 %v2730_v16, %v2729_v36  ;;  %v2644_v54 = vpop.f32.mrb[46].mxu0  ;;  %v2732_v42 = vpop.f32.mrb[46].mxu1 }
 0x154   : > { %v2645_v51 = vpop.f32.mrb[47].mxu0  ;;  %v2733_v49 = vpop.f32.mrb[47].mxu1 }
 0x155   : > { %v3995_v8 = vadd.f32 %v2731_v32, %v3953_v58  ;;  %v3997_v10 = vadd.f32 %v2645_v51, %v2644_v54  ;;  %v2734_v29 = vadd.f32 %v2733_v49, %v2732_v42 }
 0x157   : > { %v4000_v11 = vadd.f32 %v2734_v29, %v3958_v1 }
 0x159   : > { %v2735_v39 = vpop.f32.mrb[48].mxu1  ;;  %v2799_v43 = vpop.f32.mrb[48].mxu0 }
 0x15a   : > { %v2736_v22 = vpop.f32.mrb[49].mxu1  ;;  %v2800_v3 = vpop.f32.mrb[49].mxu0 }
 0x15b   : > { %v2737_v55 = vadd.f32 %v2736_v22, %v2735_v39  ;;  %v2801_v37 = vadd.f32 %v2800_v3, %v2799_v43  ;;  %v2738_v31 = vpop.f32.mrb[50].mxu1  ;;  %v2802_v12 = vpop.f32.mrb[50].mxu0 }
 0x15c   : > { %v2739_v41 = vpop.f32.mrb[51].mxu1  ;;  %v2803_v56 = vpop.f32.mrb[51].mxu0 }
 0x15d   : > { %v4003_v23 = vadd.f32 %v2737_v55, %v3966_v18  ;;  %v4006_v58 = vadd.f32 %v2801_v37, %v3917_v9  ;;  %v2740_v33 = vadd.f32 %v2739_v41, %v2738_v31  ;;  %v2804_v5 = vadd.f32 %v2803_v56, %v2802_v12 }
 0x15f   : > { %v4008_v1 = vadd.f32 %v2740_v33, %v2628_v34  ;;  %v4011_v20 = vadd.f32 %v2804_v5, %v3923_v4 }
 0x161   : > { %v2741_v27 = vpop.f32.mrb[52].mxu1  ;;  %v2805_v7 = vpop.f32.mrb[52].mxu0 }
 0x162   : > { %v2742_v60 = vpop.f32.mrb[53].mxu1  ;;  %v2806_v57 = vpop.f32.mrb[53].mxu0 }
 0x163   : > { %v2743_v35 = vadd.f32 %v2742_v60, %v2741_v27  ;;  %v2807_v50 = vadd.f32 %v2806_v57, %v2805_v7  ;;  %v2744_v15 = vpop.f32.mrb[54].mxu1  ;;  %v2808_v36 = vpop.f32.mrb[54].mxu0 }
 0x164   : > { %v2745_v18 = vpop.f32.mrb[55].mxu1  ;;  %v2809_v21 = vpop.f32.mrb[55].mxu0 }
 0x165   : > { %v4014_v9 = vadd.f32 %v2743_v35, %v3974_v25  ;;  %v4017_v16 = vadd.f32 %v2807_v50, %v3930_v26  ;;  %v2746_v34 = vadd.f32 %v2745_v18, %v2744_v15  ;;  %v2810_v32 = vadd.f32 %v2809_v21, %v2808_v36 }
 0x167   : > { %v4019_v4 = vadd.f32 %v2746_v34, %v2634_v62  ;;  %v4022_v54 = vadd.f32 %v2810_v32, %v3936_v30 }
 0x169   : > { %v2747_v42 = vpop.f32.mrb[56].mxu1  ;;  %v2811_v51 = vpop.f32.mrb[56].mxu0 }
 0x16a   : > { %v2748_v49 = vpop.f32.mrb[57].mxu1  ;;  %v2812_v29 = vpop.f32.mrb[57].mxu0 }
 0x16b   : > { %v2749_v39 = vadd.f32 %v2748_v49, %v2747_v42  ;;  %v2813_v43 = vadd.f32 %v2812_v29, %v2811_v51  ;;  %v2750_v22 = vpop.f32.mrb[58].mxu1  ;;  %v2814_v3 = vpop.f32.mrb[58].mxu0 }
 0x16c   : > { %v2751_v25 = vpop.f32.mrb[59].mxu1  ;;  %v2815_v55 = vpop.f32.mrb[59].mxu0 }
 0x16d   : > { %v4025_v26 = vadd.f32 %v2749_v39, %v3982_v6  ;;  %v4028_v37 = vadd.f32 %v2813_v43, %v3943_v53  ;;  %v2752_v62 = vadd.f32 %v2751_v25, %v2750_v22  ;;  %v2816_v31 = vadd.f32 %v2815_v55, %v2814_v3 }
 0x16f   : > { %v4031_v30 = vadd.f32 %v2752_v62, %v3987_v14  ;;  %v4034_v12 = vadd.f32 %v2816_v31, %v3949_v59 }
 0x171   : > { %v2753_v41 = vpop.f32.mrb[60].mxu1  ;;  %v2817_v56 = vpop.f32.mrb[60].mxu0 }
 0x172   : > { %v2754_v33 = vpop.f32.mrb[61].mxu1  ;;  %v2818_v5 = vpop.f32.mrb[61].mxu0 }
 0x173   : > { %v2755_v27 = vadd.f32 %v2754_v33, %v2753_v41  ;;  %v2819_v7 = vadd.f32 %v2818_v5, %v2817_v56  ;;  %v2756_v60 = vpop.f32.mrb[62].mxu1  ;;  %v2820_v6 = vpop.f32.mrb[62].mxu0 }
 0x174   : > { %v2757_v57 = vpop.f32.mrb[63].mxu1  ;;  %v2821_v35 = vpop.f32.mrb[63].mxu0 }
 0x175   : > { %v4037_v53 = vadd.f32 %v2755_v27, %v3992_v28  ;;  %v4040_v50 = vadd.f32 %v2819_v7, %v3956_v44  ;;  %v2758_v14 = vadd.f32 %v2757_v57, %v2756_v60  ;;  %v2822_v15 = vadd.f32 %v2821_v35, %v2820_v6 }
 0x177   : > { %v4043_v59 = vadd.f32 %v2758_v14, %v3997_v10  ;;  %v4046_v36 = vadd.f32 %v2822_v15, %v3963_v47 }
 0x179   : > { %v2759_v18 = vpop.f32.mrb[64].mxu1  ;;  %v2823_v21 = vpop.f32.mrb[64].mxu0 }
 0x17a   : > { %v2760_v34 = vpop.f32.mrb[65].mxu1  ;;  %v2824_v32 = vpop.f32.mrb[65].mxu0 }
 0x17b   : > { %v2761_v42 = vadd.f32 %v2760_v34, %v2759_v18  ;;  %v2825_v51 = vadd.f32 %v2824_v32, %v2823_v21  ;;  %v2762_v49 = vpop.f32.mrb[66].mxu1  ;;  %v2826_v28 = vpop.f32.mrb[66].mxu0 }
 0x17c   : > { %v2763_v29 = vpop.f32.mrb[67].mxu1  ;;  %v2827_v39 = vpop.f32.mrb[67].mxu0 }
 0x17d   : > { %v4049_v44 = vadd.f32 %v2761_v42, %v3870_v38  ;;  %v4052_v43 = vadd.f32 %v2825_v51, %v3969_v52  ;;  %v2764_v10 = vadd.f32 %v2763_v29, %v2762_v49  ;;  %v2828_v22 = vadd.f32 %v2827_v39, %v2826_v28 }
 0x17f   : > { %v4055_v47 = vadd.f32 %v2764_v10, %v3874_v61  ;;  %v4058_v3 = vadd.f32 %v2828_v22, %v3972_v63 }
 0x181   : > { %v2765_v25 = vpop.f32.mrb[68].mxu1  ;;  %v2829_v55 = vpop.f32.mrb[68].mxu0 }
 0x182   : > { %v2766_v62 = vpop.f32.mrb[69].mxu1  ;;  %v2830_v31 = vpop.f32.mrb[69].mxu0 }
 0x183   : > { %v2767_v41 = vadd.f32 %v2766_v62, %v2765_v25  ;;  %v2831_v56 = vadd.f32 %v2830_v31, %v2829_v55  ;;  %v2768_v33 = vpop.f32.mrb[70].mxu1  ;;  %v2832_v38 = vpop.f32.mrb[70].mxu0 }
 0x184   : > { %v2769_v5 = vpop.f32.mrb[71].mxu1  ;;  %v2833_v27 = vpop.f32.mrb[71].mxu0 }
 0x185   : > { %v4061_v52 = vadd.f32 %v2767_v41, %v3881_v2  ;;  %v4064_v7 = vadd.f32 %v2831_v56, %v3977_v17  ;;  %v2770_v61 = vadd.f32 %v2769_v5, %v2768_v33  ;;  %v2834_v60 = vadd.f32 %v2833_v27, %v2832_v38 }
 0x187   : > { %v4067_v63 = vadd.f32 %v2770_v61, %v3885_v40  ;;  %v4070_v6 = vadd.f32 %v2834_v60, %v3980_v19 }
 0x189   : > { %v2771_v57 = vpop.f32.mrb[72].mxu1  ;;  %v2835_v35 = vpop.f32.mrb[72].mxu0 }
 0x18a   : > { %v2772_v14 = vpop.f32.mrb[73].mxu1  ;;  %v2836_v15 = vpop.f32.mrb[73].mxu0 }
 0x18b   : > { %v2773_v18 = vadd.f32 %v2772_v14, %v2771_v57  ;;  %v2837_v21 = vadd.f32 %v2836_v15, %v2835_v35  ;;  %v2774_v34 = vpop.f32.mrb[74].mxu1  ;;  %v2838_v2 = vpop.f32.mrb[74].mxu0 }
 0x18c   : > { %v2775_v32 = vpop.f32.mrb[75].mxu1  ;;  %v2839_v42 = vpop.f32.mrb[75].mxu0 }
 0x18d   : > { %v4073_v17 = vadd.f32 %v2773_v18, %v3892_v48  ;;  %v4076_v51 = vadd.f32 %v2837_v21, %v3985_v45  ;;  %v2776_v40 = vadd.f32 %v2775_v32, %v2774_v34  ;;  %v2840_v49 = vadd.f32 %v2839_v42, %v2838_v2 }
 0x18f   : > { %v4079_v19 = vadd.f32 %v2776_v40, %v3896_v46  ;;  %v4082_v28 = vadd.f32 %v2840_v49, %v3990_v24 }
 0x191   : > { %v2777_v29 = vpop.f32.mrb[76].mxu1  ;;  %v2841_v39 = vpop.f32.mrb[76].mxu0 }
 0x192   : > { %v2778_v10 = vpop.f32.mrb[77].mxu1  ;;  %v2842_v22 = vpop.f32.mrb[77].mxu0 }
 0x193   : > { %v2779_v25 = vadd.f32 %v2778_v10, %v2777_v29  ;;  %v2843_v55 = vadd.f32 %v2842_v22, %v2841_v39  ;;  %v2780_v62 = vpop.f32.mrb[78].mxu1  ;;  %v2844_v48 = vpop.f32.mrb[78].mxu0 }
 0x194   : > { %v2781_v31 = vpop.f32.mrb[79].mxu1  ;;  %v2845_v41 = vpop.f32.mrb[79].mxu0 }
 0x195   : > { %v4085_v45 = vadd.f32 %v2779_v25, %v3904_v13  ;;  %v4088_v56 = vadd.f32 %v2843_v55, %v3995_v8  ;;  %v2782_v46 = vadd.f32 %v2781_v31, %v2780_v62  ;;  %v2846_v33 = vadd.f32 %v2845_v41, %v2844_v48 }
 0x197   : > { %v4091_v24 = vadd.f32 %v2782_v46, %v3908_v0  ;;  %v4094_v38 = vadd.f32 %v2846_v33, %v4000_v11 }
 0x199   : > { %v2847_v5 = vpop.f32.mrb[80].mxu0  ;;  %v2911_v27 = vpop.f32.mrb[80].mxu1 }
 0x19a   : > { %v2848_v61 = vpop.f32.mrb[81].mxu0  ;;  %v2912_v60 = vpop.f32.mrb[81].mxu1 }
 0x19b   : > { %v2849_v57 = vadd.f32 %v2848_v61, %v2847_v5  ;;  %v2913_v35 = vadd.f32 %v2912_v60, %v2911_v27  ;;  %v2850_v14 = vpop.f32.mrb[82].mxu0  ;;  %v2914_v13 = vpop.f32.mrb[82].mxu1 }
 0x19c   : > { %v2851_v15 = vpop.f32.mrb[83].mxu0  ;;  %v2915_v18 = vpop.f32.mrb[83].mxu1 }
 0x19d   : > { %v4097_v8 = vadd.f32 %v2849_v57, %v4003_v23  ;;  %v2852_v21 = vadd.f32 %v2851_v15, %v2850_v14  ;;  %v2916_v34 = vadd.f32 %v2915_v18, %v2914_v13  ;;  %v4100_v0 = vadd.f32 %v2913_v35, %v4006_v58 }
 0x19f   : > { %v4103_v11 = vadd.f32 %v2852_v21, %v4008_v1  ;;  %v4106_v2 = vadd.f32 %v2916_v34, %v4011_v20 }
 0x1a1   : > { %v2853_v32 = vpop.f32.mrb[84].mxu0  ;;  %v2917_v42 = vpop.f32.mrb[84].mxu1 }
 0x1a2   : > { %v2854_v40 = vpop.f32.mrb[85].mxu0  ;;  %v2918_v49 = vpop.f32.mrb[85].mxu1 }
 0x1a3   : > { %v2855_v29 = vadd.f32 %v2854_v40, %v2853_v32  ;;  %v2919_v39 = vadd.f32 %v2918_v49, %v2917_v42  ;;  %v2856_v10 = vpop.f32.mrb[86].mxu0  ;;  %v2920_v23 = vpop.f32.mrb[86].mxu1 }
 0x1a4   : > { %v2857_v22 = vpop.f32.mrb[87].mxu0  ;;  %v2921_v25 = vpop.f32.mrb[87].mxu1 }
 0x1a5   : > { %v4109_v55 = vadd.f32 %v2855_v29, %v4014_v9  ;;  %v2858_v58 = vadd.f32 %v2857_v22, %v2856_v10  ;;  %v2922_v62 = vadd.f32 %v2921_v25, %v2920_v23  ;;  %v4112_v1 = vadd.f32 %v2919_v39, %v4017_v16 }
 0x1a7   : > { %v4115_v20 = vadd.f32 %v2858_v58, %v4019_v4  ;;  %v4118_v48 = vadd.f32 %v2922_v62, %v4022_v54 }
 0x1a9   : > { %v2859_v31 = vpop.f32.mrb[88].mxu0  ;;  %v2923_v41 = vpop.f32.mrb[88].mxu1 }
 0x1aa   : > { %v2860_v46 = vpop.f32.mrb[89].mxu0  ;;  %v2924_v33 = vpop.f32.mrb[89].mxu1 }
 0x1ab   : > { %v2861_v5 = vadd.f32 %v2860_v46, %v2859_v31  ;;  %v2925_v27 = vadd.f32 %v2924_v33, %v2923_v41  ;;  %v2862_v61 = vpop.f32.mrb[90].mxu0  ;;  %v2926_v9 = vpop.f32.mrb[90].mxu1 }
 0x1ac   : > { %v2863_v60 = vpop.f32.mrb[91].mxu0  ;;  %v2927_v57 = vpop.f32.mrb[91].mxu1 }
 0x1ad   : > { %v4121_v35 = vadd.f32 %v2861_v5, %v4025_v26  ;;  %v2864_v16 = vadd.f32 %v2863_v60, %v2862_v61  ;;  %v2928_v14 = vadd.f32 %v2927_v57, %v2926_v9  ;;  %v4124_v4 = vadd.f32 %v2925_v27, %v4028_v37 }
 0x1af   : > { %v4127_v54 = vadd.f32 %v2864_v16, %v4031_v30  ;;  %v4130_v13 = vadd.f32 %v2928_v14, %v4034_v12 }
 0x1b1   : > { %v2865_v15 = vpop.f32.mrb[92].mxu0  ;;  %v2929_v18 = vpop.f32.mrb[92].mxu1 }
 0x1b2   : > { %v2866_v21 = vpop.f32.mrb[93].mxu0  ;;  %v2930_v34 = vpop.f32.mrb[93].mxu1 }
 0x1b3   : > { %v2867_v32 = vadd.f32 %v2866_v21, %v2865_v15  ;;  %v2931_v42 = vadd.f32 %v2930_v34, %v2929_v18  ;;  %v2868_v40 = vpop.f32.mrb[94].mxu0  ;;  %v2932_v26 = vpop.f32.mrb[94].mxu1 }
 0x1b4   : > { %v2869_v49 = vpop.f32.mrb[95].mxu0  ;;  %v2933_v29 = vpop.f32.mrb[95].mxu1 }
 0x1b5   : > { %v4133_v39 = vadd.f32 %v2867_v32, %v4037_v53  ;;  %v2870_v37 = vadd.f32 %v2869_v49, %v2868_v40  ;;  %v2934_v10 = vadd.f32 %v2933_v29, %v2932_v26  ;;  %v4136_v30 = vadd.f32 %v2931_v42, %v4040_v50 }
 0x1b7   : > { %v4139_v12 = vadd.f32 %v2870_v37, %v4043_v59  ;;  %v4142_v23 = vadd.f32 %v2934_v10, %v4046_v36 }
 0x1b9   : > { %v2871_v22 = vpop.f32.mrb[96].mxu0  ;;  %v2935_v25 = vpop.f32.mrb[96].mxu1 }
 0x1ba   : > { %v2872_v58 = vpop.f32.mrb[97].mxu0  ;;  %v2936_v62 = vpop.f32.mrb[97].mxu1 }
 0x1bb   : > { %v2873_v31 = vadd.f32 %v2872_v58, %v2871_v22  ;;  %v2937_v41 = vadd.f32 %v2936_v62, %v2935_v25  ;;  %v2874_v46 = vpop.f32.mrb[98].mxu0  ;;  %v2938_v53 = vpop.f32.mrb[98].mxu1 }
 0x1bc   : > { %v2875_v33 = vpop.f32.mrb[99].mxu0  ;;  %v2939_v5 = vpop.f32.mrb[99].mxu1 }
 0x1bd   : > { %v4145_v27 = vadd.f32 %v2873_v31, %v4049_v44  ;;  %v2876_v50 = vadd.f32 %v2875_v33, %v2874_v46  ;;  %v2940_v61 = vadd.f32 %v2939_v5, %v2938_v53  ;;  %v4148_v59 = vadd.f32 %v2937_v41, %v4052_v43 }
 0x1bf   : > { %v4151_v36 = vadd.f32 %v2876_v50, %v4055_v47  ;;  %v4154_v9 = vadd.f32 %v2940_v61, %v4058_v3 }
 0x1c1   : > { %v2877_v60 = vpop.f32.mrb[100].mxu0  ;;  %v2941_v57 = vpop.f32.mrb[100].mxu1 }
 0x1c2   : > { %v2878_v16 = vpop.f32.mrb[101].mxu0  ;;  %v2942_v14 = vpop.f32.mrb[101].mxu1 }
 0x1c3   : > { %v2879_v15 = vadd.f32 %v2878_v16, %v2877_v60  ;;  %v2943_v18 = vadd.f32 %v2942_v14, %v2941_v57  ;;  %v2880_v21 = vpop.f32.mrb[102].mxu0  ;;  %v2944_v44 = vpop.f32.mrb[102].mxu1 }
 0x1c4   : > { %v2881_v34 = vpop.f32.mrb[103].mxu0  ;;  %v2945_v32 = vpop.f32.mrb[103].mxu1 }
 0x1c5   : > { %v4157_v42 = vadd.f32 %v2879_v15, %v4061_v52  ;;  %v2882_v43 = vadd.f32 %v2881_v34, %v2880_v21  ;;  %v2946_v40 = vadd.f32 %v2945_v32, %v2944_v44  ;;  %v4160_v47 = vadd.f32 %v2943_v18, %v4064_v7 }
 0x1c7   : > { %v4163_v3 = vadd.f32 %v2882_v43, %v4067_v63  ;;  %v4166_v26 = vadd.f32 %v2946_v40, %v4070_v6 }
 0x1c9   : > { %v2883_v49 = vpop.f32.mrb[104].mxu0  ;;  %v2947_v29 = vpop.f32.mrb[104].mxu1 }
 0x1ca   : > { %v2884_v37 = vpop.f32.mrb[105].mxu0  ;;  %v2948_v10 = vpop.f32.mrb[105].mxu1 }
 0x1cb   : > { %v2885_v22 = vadd.f32 %v2884_v37, %v2883_v49  ;;  %v2949_v25 = vadd.f32 %v2948_v10, %v2947_v29  ;;  %v2886_v58 = vpop.f32.mrb[106].mxu0  ;;  %v2950_v52 = vpop.f32.mrb[106].mxu1 }
 0x1cc   : > { %v2887_v62 = vpop.f32.mrb[107].mxu0  ;;  %v2951_v31 = vpop.f32.mrb[107].mxu1 }
 0x1cd   : > { %v4169_v41 = vadd.f32 %v2885_v22, %v4073_v17  ;;  %v2888_v7 = vadd.f32 %v2887_v62, %v2886_v58  ;;  %v2952_v46 = vadd.f32 %v2951_v31, %v2950_v52  ;;  %v4172_v63 = vadd.f32 %v2949_v25, %v4076_v51 }
 0x1cf   : > { %v4175_v6 = vadd.f32 %v2888_v7, %v4079_v19  ;;  %v4178_v53 = vadd.f32 %v2952_v46, %v4082_v28 }
 0x1d1   : > { %v2889_v33 = vpop.f32.mrb[108].mxu0  ;;  %v2953_v5 = vpop.f32.mrb[108].mxu1 }
 0x1d2   : > { %v2890_v50 = vpop.f32.mrb[109].mxu0  ;;  %v2954_v61 = vpop.f32.mrb[109].mxu1 }
 0x1d3   : > { %v2891_v60 = vadd.f32 %v2890_v50, %v2889_v33  ;;  %v2955_v57 = vadd.f32 %v2954_v61, %v2953_v5  ;;  %v2892_v17 = vpop.f32.mrb[110].mxu0  ;;  %v2956_v16 = vpop.f32.mrb[110].mxu1 }
 0x1d4   : > { %v2893_v14 = vpop.f32.mrb[111].mxu0  ;;  %v2957_v15 = vpop.f32.mrb[111].mxu1 }
 0x1d5   : > { %v4181_v51 = vadd.f32 %v2891_v60, %v4085_v45  ;;  %v2894_v18 = vadd.f32 %v2893_v14, %v2892_v17  ;;  %v2958_v19 = vadd.f32 %v2957_v15, %v2956_v16  ;;  %v4184_v21 = vadd.f32 %v2955_v57, %v4088_v56 }
 0x1d7   : > { %v4187_v28 = vadd.f32 %v2894_v18, %v4091_v24  ;;  %v4190_v44 = vadd.f32 %v2958_v19, %v4094_v38 }
 0x1d9   : > { %v2959_v34 = vpop.f32.mrb[112].mxu1  ;;  %v3049_v45 = vpop.f32.mrb[112].mxu0 }
 0x1da   : > { %v2123_v56 = vadd.f32 %v3049_v45, %v4112_v1  ;;  %v2960_v32 = vpop.f32.mrb[113].mxu1  ;;  %v2114_v24 = vpop.f32.mrb[113].mxu0 }
 0x1db   : > { %v2961_v43 = vadd.f32 %v2960_v32, %v2959_v34  ;;  %v2115_v38 = vadd.f32 %v2114_v24, %v4100_v0  ;;  %v2962_v40 = vpop.f32.mrb[114].mxu1  ;;  %v3050_v49 = vpop.f32.mrb[114].mxu0 }
 0x1dc   : > { %2243 = vst [vmem:[%s4197_s22 + $0x10] sm:$0xff] %v2123_v56  ;;  %v2126_v29 = vadd.f32 %v3050_v49, %v4118_v48  ;;  %v2963_v37 = vpop.f32.mrb[115].mxu1  ;;  %v2117_v10 = vpop.f32.mrb[115].mxu0  ;;  %v2313_v31 = vmul.f32 %v2123_v56, %v2123_v56 }
 0x1dd   : > { %2241 = vst [vmem:[%s4197_s22] sm:$0xff] %v2115_v38  ;;  %v2964_v22 = vadd.f32 %v2963_v37, %v2962_v40  ;;  %v2118_v25 = vadd.f32 %v2117_v10, %v4106_v2  ;;  %v4206_v58 = vadd.f32 %v2961_v43, %v4097_v8  ;;  %v2311_v1 = vmul.f32 %v2115_v38, %v2115_v38 }
 0x1de   : > { %2244 = vst [vmem:[%s4197_s22 + $0x18] sm:$0xff] %v2126_v29  ;;  %v2314_v5 = vmul.f32 %v2126_v29, %v2126_v29 }
 0x1df   : > { %2242 = vst [vmem:[%s4197_s22 + $0x8] sm:$0xff] %v2118_v25  ;;  %v2273_v52 = vadd.f32 %v2118_v25, %v2115_v38  ;;  %v2312_v62 = vmul.f32 %v2118_v25, %v2118_v25  ;;  %v4211_v0 = vadd.f32 %v2964_v22, %v4103_v11 }
 0x1e1   : > { %v2274_v48 = vadd.f32 %v2273_v52, %v2123_v56  ;;  %v2343_v7 = vadd.f32 %v2312_v62, %v2311_v1  ;;  %v2965_v46 = vpop.f32.mrb[116].mxu1  ;;  %v3053_v33 = vpop.f32.mrb[116].mxu0 }
 0x1e2   : > { %v2139_v2 = vadd.f32 %v3053_v33, %v4136_v30  ;;  %v2966_v8 = vpop.f32.mrb[117].mxu1  ;;  %v2130_v50 = vpop.f32.mrb[117].mxu0 }
 0x1e3   : > { %v2344_v61 = vadd.f32 %v2343_v7, %v2313_v31  ;;  %v2967_v60 = vadd.f32 %v2966_v8, %v2965_v46  ;;  %v2131_v57 = vadd.f32 %v2130_v50, %v4124_v4  ;;  %v2275_v17 = vadd.f32 %v2274_v48, %v2126_v29  ;;  %v2968_v11 = vpop.f32.mrb[118].mxu1  ;;  %v3054_v16 = vpop.f32.mrb[118].mxu0 }
 0x1e4   : > { %2247 = vst [vmem:[%s4197_s22 + $0x30] sm:$0xff] %v2139_v2  ;;  %v2142_v14 = vadd.f32 %v3054_v16, %v4142_v23  ;;  %v2969_v15 = vpop.f32.mrb[119].mxu1  ;;  %v2133_v18 = vpop.f32.mrb[119].mxu0  ;;  %v2317_v49 = vmul.f32 %v2139_v2, %v2139_v2 }
 0x1e5   : > { %2245 = vst [vmem:[%s4197_s22 + $0x20] sm:$0xff] %v2131_v57  ;;  %v2276_v19 = vadd.f32 %v2275_v17, %v2131_v57  ;;  %v2315_v34 = vmul.f32 %v2131_v57, %v2131_v57  ;;  %v2345_v30 = vadd.f32 %v2344_v61, %v2314_v5  ;;  %v2970_v45 = vadd.f32 %v2969_v15, %v2968_v11 }
 0x1e6   : > { %2248 = vst [vmem:[%s4197_s22 + $0x38] sm:$0xff] %v2142_v14  ;;  %v2134_v56 = vadd.f32 %v2133_v18, %v4130_v13  ;;  %v4221_v32 = vadd.f32 %v2967_v60, %v4109_v55  ;;  %v2318_v52 = vmul.f32 %v2142_v14, %v2142_v14 }
 0x1e7   : > { %v2346_v4 = vadd.f32 %v2345_v30, %v2315_v34  ;;  %v4224_v24 = vadd.f32 %v2970_v45, %v4115_v20 }
 0x1e8   : > { %2246 = vst [vmem:[%s4197_s22 + $0x28] sm:$0xff] %v2134_v56  ;;  %v2277_v43 = vadd.f32 %v2276_v19, %v2134_v56  ;;  %v2316_v23 = vmul.f32 %v2134_v56, %v2134_v56 }
 0x1e9   : > { %v2971_v38 = vpop.f32.mrb[120].mxu1  ;;  %v3057_v40 = vpop.f32.mrb[120].mxu0 }
 0x1ea   : > { %v2278_v29 = vadd.f32 %v2277_v43, %v2139_v2  ;;  %v2347_v37 = vadd.f32 %v2346_v4, %v2316_v23  ;;  %v2155_v10 = vadd.f32 %v3057_v40, %v4160_v47  ;;  %v2972_v13 = vpop.f32.mrb[121].mxu1  ;;  %v2146_v22 = vpop.f32.mrb[121].mxu0 }
 0x1eb   : > { %v2973_v55 = vadd.f32 %v2972_v13, %v2971_v38  ;;  %v2147_v25 = vadd.f32 %v2146_v22, %v4148_v59  ;;  %v2974_v1 = vpop.f32.mrb[122].mxu1  ;;  %v3058_v20 = vpop.f32.mrb[122].mxu0 }
 0x1ec   : > { %v2348_v62 = vadd.f32 %v2347_v37, %v2317_v49  ;;  %2251 = vst [vmem:[%s4197_s22 + $0x50] sm:$0xff] %v2155_v10  ;;  %v2279_v31 = vadd.f32 %v2278_v29, %v2142_v14  ;;  %v2158_v48 = vadd.f32 %v3058_v20, %v4166_v26  ;;  %v2975_v7 = vpop.f32.mrb[123].mxu1  ;;  %v2149_v46 = vpop.f32.mrb[123].mxu0  ;;  %v2321_v11 = vmul.f32 %v2155_v10, %v2155_v10 }
 0x1ed   : > { %2249 = vst [vmem:[%s4197_s22 + $0x40] sm:$0xff] %v2147_v25  ;;  %v2319_v33 = vmul.f32 %v2147_v25, %v2147_v25  ;;  %v2976_v47 = vadd.f32 %v2975_v7, %v2974_v1  ;;  %v2150_v5 = vadd.f32 %v2149_v46, %v4154_v9  ;;  %v4234_v2 = vadd.f32 %v2973_v55, %v4121_v35 }
 0x1ee   : > { %v2280_v59 = vadd.f32 %v2279_v31, %v2147_v25  ;;  %v2349_v8 = vadd.f32 %v2348_v62, %v2318_v52  ;;  %2252 = vst [vmem:[%s4197_s22 + $0x58] sm:$0xff] %v2158_v48  ;;  %v2322_v30 = vmul.f32 %v2158_v48, %v2158_v48 }
 0x1ef   : > { %2250 = vst [vmem:[%s4197_s22 + $0x48] sm:$0xff] %v2150_v5  ;;  %v2320_v50 = vmul.f32 %v2150_v5, %v2150_v5  ;;  %v4239_v61 = vadd.f32 %v2976_v47, %v4127_v54 }
 0x1f0   : > { %v2350_v60 = vadd.f32 %v2349_v8, %v2319_v33  ;;  %v2281_v26 = vadd.f32 %v2280_v59, %v2150_v5 }
 0x1f1   : > { %v2977_v57 = vpop.f32.mrb[124].mxu1  ;;  %v3061_v17 = vpop.f32.mrb[124].mxu0 }
 0x1f2   : > { %v2282_v16 = vadd.f32 %v2281_v26, %v2155_v10  ;;  %v2351_v9 = vadd.f32 %v2350_v60, %v2320_v50  ;;  %v2171_v35 = vadd.f32 %v3061_v17, %v4184_v21  ;;  %v2978_v14 = vpop.f32.mrb[125].mxu1  ;;  %v2162_v15 = vpop.f32.mrb[125].mxu0 }
 0x1f3   : > { %v2979_v18 = vadd.f32 %v2978_v14, %v2977_v57  ;;  %v2163_v19 = vadd.f32 %v2162_v15, %v4172_v63  ;;  %v2980_v34 = vpop.f32.mrb[126].mxu1  ;;  %v3062_v54 = vpop.f32.mrb[126].mxu0 }
 0x1f4   : > { %v2352_v45 = vadd.f32 %v2351_v9, %v2321_v11  ;;  %2255 = vst [vmem:[%s4197_s22 + $0x70] sm:$0xff] %v2171_v35  ;;  %v2283_v56 = vadd.f32 %v2282_v16, %v2158_v48  ;;  %v2174_v4 = vadd.f32 %v3062_v54, %v4190_v44  ;;  %v2981_v43 = vpop.f32.mrb[127].mxu1  ;;  %v2165_v23 = vpop.f32.mrb[127].mxu0  ;;  %v2325_v25 = vmul.f32 %v2171_v35, %v2171_v35 }
 0x1f5   : > { %2253 = vst [vmem:[%s4197_s22 + $0x60] sm:$0xff] %v2163_v19  ;;  %v2323_v38 = vmul.f32 %v2163_v19, %v2163_v19  ;;  %v2982_v21 = vadd.f32 %v2981_v43, %v2980_v34  ;;  %v2166_v40 = vadd.f32 %v2165_v23, %v4178_v53  ;;  %v2042_v49 = vadd.f32 %v2979_v18, %v4133_v39 }
 0x1f6   : > { %v2284_v63 = vadd.f32 %v2283_v56, %v2163_v19  ;;  %v2353_v29 = vadd.f32 %v2352_v45, %v2322_v30  ;;  %2256 = vst [vmem:[%s4197_s22 + $0x78] sm:$0xff] %v2174_v4 }
 0x1f7   : > { %2254 = vst [vmem:[%s4197_s22 + $0x68] sm:$0xff] %v2166_v40  ;;  %v2324_v37 = vmul.f32 %v2166_v40, %v2166_v40  ;;  %v2045_v10 = vadd.f32 %v2982_v21, %v4139_v12  ;;  %v2326_v12 = vmul.f32 %v2174_v4, %v2174_v4 }
 0x1f8   : > { %v2354_v13 = vadd.f32 %v2353_v29, %v2323_v38  ;;  %v2285_v22 = vadd.f32 %v2284_v63, %v2166_v40 }
 0x1f9   : > { %v2983_v44 = vpop.f32.mrb[128].mxu1  ;;  %v3065_v55 = vpop.f32.mrb[128].mxu0 }
 0x1fa   : > { %v2286_v1 = vadd.f32 %v2285_v22, %v2171_v35  ;;  %v2355_v20 = vadd.f32 %v2354_v13, %v2324_v37  ;;  %v2187_v53 = vadd.f32 %v3065_v55, %v4221_v32  ;;  %v2984_v52 = vpop.f32.mrb[129].mxu1  ;;  %v2178_v39 = vpop.f32.mrb[129].mxu0 }
 0x1fb   : > { %v2985_v62 = vadd.f32 %v2984_v52, %v2983_v44  ;;  %v2179_v31 = vadd.f32 %v2178_v39, %v4206_v58  ;;  %v2986_v48 = vpop.f32.mrb[130].mxu1  ;;  %v3066_v7 = vpop.f32.mrb[130].mxu0 }
 0x1fc   : > { %v2356_v46 = vadd.f32 %v2355_v20, %v2325_v25  ;;  %2259 = vst [vmem:[%s4197_s22 + $0x90] sm:$0xff] %v2187_v53  ;;  %v2287_v33 = vadd.f32 %v2286_v1, %v2174_v4  ;;  %v2190_v47 = vadd.f32 %v3066_v7, %v4224_v24  ;;  %v2987_v5 = vpop.f32.mrb[131].mxu1  ;;  %v2181_v59 = vpop.f32.mrb[131].mxu0  ;;  %v2329_v35 = vmul.f32 %v2187_v53, %v2187_v53 }
 0x1fd   : > { %2257 = vst [vmem:[%s4197_s22 + $0x80] sm:$0xff] %v2179_v31  ;;  %v2327_v8 = vmul.f32 %v2179_v31, %v2179_v31  ;;  %v2988_v32 = vadd.f32 %v2987_v5, %v2986_v48  ;;  %v2182_v50 = vadd.f32 %v2181_v59, %v4211_v0  ;;  %v2050_v60 = vadd.f32 %v2985_v62, %v4145_v27 }
 0x1fe   : > { %v2288_v58 = vadd.f32 %v2287_v33, %v2179_v31  ;;  %v2357_v26 = vadd.f32 %v2356_v46, %v2326_v12  ;;  %2260 = vst [vmem:[%s4197_s22 + $0x98] sm:$0xff] %v2190_v47 }
 0x1ff   : > { %2258 = vst [vmem:[%s4197_s22 + $0x88] sm:$0xff] %v2182_v50  ;;  %v2328_v57 = vmul.f32 %v2182_v50, %v2182_v50  ;;  %v2053_v17 = vadd.f32 %v2988_v32, %v4151_v36  ;;  %v2330_v36 = vmul.f32 %v2190_v47, %v2190_v47 }
 0x200   : > { %v2358_v11 = vadd.f32 %v2357_v26, %v2327_v8  ;;  %v2289_v16 = vadd.f32 %v2288_v58, %v2182_v50 }
 0x201   : > { %v2989_v24 = vpop.f32.mrb[132].mxu1  ;;  %v3069_v9 = vpop.f32.mrb[132].mxu0 }
 0x202   : > { %v2290_v14 = vadd.f32 %v2289_v16, %v2187_v53  ;;  %v2359_v15 = vadd.f32 %v2358_v11, %v2328_v57  ;;  %v2203_v18 = vadd.f32 %v3069_v9, %v2042_v49  ;;  %v2990_v0 = vpop.f32.mrb[133].mxu1  ;;  %v2194_v19 = vpop.f32.mrb[133].mxu0 }
 0x203   : > { %v2991_v27 = vadd.f32 %v2990_v0, %v2989_v24  ;;  %v2195_v34 = vadd.f32 %v2194_v19, %v4234_v2  ;;  %v2992_v54 = vpop.f32.mrb[134].mxu1  ;;  %v3070_v30 = vpop.f32.mrb[134].mxu0 }
 0x204   : > { %v2360_v45 = vadd.f32 %v2359_v15, %v2329_v35  ;;  %2263 = vst [vmem:[%s4197_s22 + $0xb0] sm:$0xff] %v2203_v18  ;;  %v2291_v56 = vadd.f32 %v2290_v14, %v2190_v47  ;;  %v2206_v4 = vadd.f32 %v3070_v30, %v2045_v10  ;;  %v2993_v43 = vpop.f32.mrb[135].mxu1  ;;  %v2197_v23 = vpop.f32.mrb[135].mxu0  ;;  %v2333_v55 = vmul.f32 %v2203_v18, %v2203_v18 }
 0x205   : > { %2261 = vst [vmem:[%s4197_s22 + $0xa0] sm:$0xff] %v2195_v34  ;;  %v2331_v38 = vmul.f32 %v2195_v34, %v2195_v34  ;;  %v2994_v21 = vadd.f32 %v2993_v43, %v2992_v54  ;;  %v2198_v40 = vadd.f32 %v2197_v23, %v4239_v61  ;;  %v2058_v49 = vadd.f32 %v2991_v27, %v4157_v42 }
 0x206   : > { %v2292_v63 = vadd.f32 %v2291_v56, %v2195_v34  ;;  %v2361_v2 = vadd.f32 %v2360_v45, %v2330_v36  ;;  %2264 = vst [vmem:[%s4197_s22 + $0xb8] sm:$0xff] %v2206_v4  ;;  %v2334_v31 = vmul.f32 %v2206_v4, %v2206_v4 }
 0x207   : > { %2262 = vst [vmem:[%s4197_s22 + $0xa8] sm:$0xff] %v2198_v40  ;;  %v2332_v29 = vmul.f32 %v2198_v40, %v2198_v40  ;;  %v2061_v37 = vadd.f32 %v2994_v21, %v4163_v3 }
 0x208   : > { %v2362_v13 = vadd.f32 %v2361_v2, %v2331_v38  ;;  %v2293_v22 = vadd.f32 %v2292_v63, %v2198_v40 }
 0x209   : > { %v2995_v10 = vpop.f32.mrb[136].mxu1  ;;  %v3073_v44 = vpop.f32.mrb[136].mxu0 }
 0x20a   : > { %v2294_v25 = vadd.f32 %v2293_v22, %v2203_v18  ;;  %v2363_v1 = vadd.f32 %v2362_v13, %v2332_v29  ;;  %v2219_v20 = vadd.f32 %v3073_v44, %v2058_v49  ;;  %v2996_v61 = vpop.f32.mrb[137].mxu1  ;;  %v2210_v53 = vpop.f32.mrb[137].mxu0 }
 0x20b   : > { %v2997_v42 = vadd.f32 %v2996_v61, %v2995_v10  ;;  %v2211_v52 = vadd.f32 %v2210_v53, %v2050_v60  ;;  %v2998_v39 = vpop.f32.mrb[138].mxu1  ;;  %v3074_v62 = vpop.f32.mrb[138].mxu0 }
 0x20c   : > { %v2364_v3 = vadd.f32 %v2363_v1, %v2333_v55  ;;  %2267 = vst [vmem:[%s4197_s22 + $0xd0] sm:$0xff] %v2219_v20  ;;  %v2295_v48 = vadd.f32 %v2294_v25, %v2206_v4  ;;  %v2222_v7 = vadd.f32 %v3074_v62, %v2061_v37  ;;  %v2999_v12 = vpop.f32.mrb[139].mxu1  ;;  %v2213_v46 = vpop.f32.mrb[139].mxu0  ;;  %v2337_v16 = vmul.f32 %v2219_v20, %v2219_v20 }
 0x20d   : > { %2265 = vst [vmem:[%s4197_s22 + $0xc0] sm:$0xff] %v2211_v52  ;;  %v2335_v33 = vmul.f32 %v2211_v52, %v2211_v52  ;;  %v3000_v47 = vadd.f32 %v2999_v12, %v2998_v39  ;;  %v2214_v5 = vadd.f32 %v2213_v46, %v2053_v17  ;;  %v2066_v59 = vadd.f32 %v2997_v42, %v4169_v41 }
 0x20e   : > { %v2296_v8 = vadd.f32 %v2295_v48, %v2211_v52  ;;  %v2365_v32 = vadd.f32 %v2364_v3, %v2334_v31  ;;  %2268 = vst [vmem:[%s4197_s22 + $0xd8] sm:$0xff] %v2222_v7  ;;  %v2338_v0 = vmul.f32 %v2222_v7, %v2222_v7 }
 0x20f   : > { %2266 = vst [vmem:[%s4197_s22 + $0xc8] sm:$0xff] %v2214_v5  ;;  %v2336_v50 = vmul.f32 %v2214_v5, %v2214_v5  ;;  %v2069_v60 = vadd.f32 %v3000_v47, %v4175_v6 }
 0x210   : > { %v2366_v58 = vadd.f32 %v2365_v32, %v2335_v33  ;;  %v2297_v26 = vadd.f32 %v2296_v8, %v2214_v5 }
 0x211   : > { %v3001_v57 = vpop.f32.mrb[140].mxu1  ;;  %v3077_v11 = vpop.f32.mrb[140].mxu0 }
 0x212   : > { %v2298_v24 = vadd.f32 %v2297_v26, %v2219_v20  ;;  %v2367_v9 = vadd.f32 %v2366_v58, %v2336_v50  ;;  %v3002_v35 = vpop.f32.mrb[141].mxu1  ;;  %v2226_v14 = vpop.f32.mrb[141].mxu0 }
 0x213   : > { %v3003_v17 = vadd.f32 %v3002_v35, %v3001_v57  ;;  %v2227_v15 = vadd.f32 %v2226_v14, %v2066_v59  ;;  %v3004_v41 = vpop.f32.mrb[142].mxu1  ;;  %v3078_v18 = vpop.f32.mrb[142].mxu0 }
 0x214   : > { %v2368_v19 = vadd.f32 %v2367_v9, %v2337_v16  ;;  %v2299_v27 = vadd.f32 %v2298_v24, %v2222_v7  ;;  %v3005_v6 = vpop.f32.mrb[143].mxu1  ;;  %v2229_v34 = vpop.f32.mrb[143].mxu0 }
 0x215   : > { %v2074_v54 = vadd.f32 %v3003_v17, %v4181_v51  ;;  %2269 = vst [vmem:[%s4197_s22 + $0xe0] sm:$0xff] %v2227_v15  ;;  %v2339_v30 = vmul.f32 %v2227_v15, %v2227_v15  ;;  %v3006_v36 = vadd.f32 %v3005_v6, %v3004_v41  ;;  %v2230_v45 = vadd.f32 %v2229_v34, %v2069_v60 }
 0x216   : > { %v2300_v56 = vadd.f32 %v2299_v27, %v2227_v15  ;;  %v2369_v4 = vadd.f32 %v2368_v19, %v2338_v0 }
 0x217   : > { %v2235_v43 = vadd.f32 %v3077_v11, %v2074_v54  ;;  %v2077_v23 = vadd.f32 %v3006_v36, %v4187_v28  ;;  %2270 = vst [vmem:[%s4197_s22 + $0xe8] sm:$0xff] %v2230_v45  ;;  %v2340_v38 = vmul.f32 %v2230_v45, %v2230_v45 }
 0x218   : > { %v2370_v21 = vadd.f32 %v2369_v4, %v2339_v30  ;;  %v2301_v40 = vadd.f32 %v2300_v56, %v2230_v45 }
 0x219   : > { %2271 = vst [vmem:[%s4197_s22 + $0xf0] sm:$0xff] %v2235_v43  ;;  %v2341_v49 = vmul.f32 %v2235_v43, %v2235_v43  ;;  %v2238_v63 = vadd.f32 %v3078_v18, %v2077_v23 }
 0x21a   : > { %v2302_v51 = vadd.f32 %v2301_v40, %v2235_v43  ;;  %v2371_v2 = vadd.f32 %v2370_v21, %v2340_v38 }
 0x21b   : > { %2272 = vst [vmem:[%s4197_s22 + $0xf8] sm:$0xff] %v2238_v63  ;;  %v2342_v29 = vmul.f32 %v2238_v63, %v2238_v63 }
 0x21c   : > { %v2303_v37 = vadd.f32 %v2302_v51, %v2238_v63  ;;  %v2372_v13 = vadd.f32 %v2371_v2, %v2341_v49 }
 0x21e   : > { %v2304_v22 = vrot.slane %v2303_v37, 4  ;;  %v2373_v10 = vadd.f32 %v2372_v13, %v2342_v29 }
 0x220   : > { %v2305_v44 = vadd.f32 %v2304_v22, %v2303_v37  ;;  %v2374_v28 = vrot.slane %v2373_v10, 4 }
 0x222   : > { %v2306_v55 = vrot.slane %v2305_v44, 2  ;;  %v2375_v25 = vadd.f32 %v2374_v28, %v2373_v10 }
 0x224   : > { %v2307_v1 = vadd.f32 %v2306_v55, %v2305_v44  ;;  %v2376_v20 = vrot.slane %v2375_v25, 2 }
 0x226   : > { %v2308_v61 = vrot.slane %v2307_v1, 1  ;;  %v2377_v53 = vadd.f32 %v2376_v20, %v2375_v25 }
 0x228   : > { %v2378_v42 = vrot.slane %v2377_v53, 1  ;;  %v2309_v52 = vadd.f32 %v2308_v61, %v2307_v1 }
 0x22a   : > { %v2379_v39 = vadd.f32 %v2378_v42, %v2377_v53 }
 0x22c   : > { %v2382_v62 = vsel %vm2381_vm0, %v2309_v52, %v2379_v39 }
 0x22d   : > { %v2384_v31 = vsel %vm2383_vm1, %v2382_v62, 0.0 }
 0x22e   : > { %2385 = vst [vmem:[%s211_s24] sm:$0xff] %v2384_v31 }
 0x22f PF: > { %s15_s15 = sadd.s32 1, %s3183_s15  }
 0x230   : > { %p12_p5 = scmp.ge.s32.totalorder %s15_s15, 4  }
 0x232   :  { %14 = sbr.rel (!%p12_p5) target bundleno = 1 (0x1), region = 77 }

</bundles_post_ra>
